<compile_context>
chip_gen: v5e
topology: v5e:2x2
jax: 0.10.0
libtpu: 0.0.40
codegen_flags: <defaults>
</compile_context>

<pallas_src>
import jax
import jax.numpy as jnp
from jax.experimental import pallas as pl
from jax.experimental.pallas import tpu as pltpu

_EPS = 1e-5
_LANE = 128
_PREC = jax.lax.Precision.HIGHEST          # reference only


def _rup(x, m):
    return (x + m - 1) // m * m


def _cparams():
    return pltpu.CompilerParams(
        dimension_semantics=("parallel",),
        vmem_limit_bytes=48 * 1024 * 1024,
    )


def _bn_coeffs(st_sum, st_sq, gamma, beta, inv_m):
    # one-pass batch-norm statistics: var = E[x^2] - mean^2  (all f32)
    mean = st_sum * inv_m
    var = jnp.maximum(st_sq * inv_m - mean * mean, 0.0)
    scale = gamma * jax.lax.rsqrt(var + _EPS)
    shift = beta - mean * scale
    return scale, shift


# ---------------------------------------------------------------------------
# pass 1: conv1 (+ optional 1x1 shortcut conv) + partial BN statistics
# ---------------------------------------------------------------------------
def _make_pass1_kernel(nb, Ho, Wo, Cpi, Cpo, stride, has_shortcut):
    s = stride
    Mt = nb * Ho * Wo

    def kernel(x_ref, w1_ref, *rest):
        if has_shortcut:
            ws_ref, y1_ref, ys_ref, st_ref = rest
        else:
            y1_ref, st_ref = rest

        # conv1: 9 shifted matmuls on the stride-parity planes (K = Cpi each);
        # accumulator is initialized by the first tap (no zero fill).
        # x_ref is already bf16; MXU accumulates in f32.
        acc = None
        for ky in range(3):
            for kx in range(3):
                p = (ky % s) * s + (kx % s)
                r0, c0 = ky // s, kx // s
                patch = x_ref[:, r0:r0 + Ho, c0:c0 + Wo, p * Cpi:(p + 1) * Cpi]
                t = jnp.dot(patch.reshape(Mt, Cpi),
                            w1_ref[ky * 3 + kx],
                            preferred_element_type=jnp.float32)
                acc = t if acc is None else acc + t
        y1_ref[...] = acc.reshape(nb, Ho * Wo, Cpo).astype(jnp.bfloat16)
        st_ref[0:1, 0:1, :] = jnp.sum(acc, axis=0, keepdims=True)[None]
        st_ref[0:1, 1:2, :] = jnp.sum(acc * acc, axis=0, keepdims=True)[None]

        if has_shortcut:
            # 1x1 conv, stride s: reads original x at (s*i, s*j), i.e. the
            # (1%s, 1%s) parity plane of the padded input at offset (1-1%s)//s.
            ph = 1 % s
            r0 = (1 - ph) // s
            p = ph * s + ph
            xs = x_ref[:, r0:r0 + Ho, r0:r0 + Wo, p * Cpi:(p + 1) * Cpi]
            rs = jnp.dot(xs.reshape(Mt, Cpi), ws_ref[...],
                         preferred_element_type=jnp.float32)
            ys_ref[...] = rs.reshape(nb, Ho * Wo, Cpo).astype(jnp.bfloat16)
            st_ref[0:1, 2:3, :] = jnp.sum(rs, axis=0, keepdims=True)[None]
            st_ref[0:1, 3:4, :] = jnp.sum(rs * rs, axis=0, keepdims=True)[None]

    return kernel


# ---------------------------------------------------------------------------
# pass 2: bn1 + ReLU + conv2 (3x3, stride 1) + partial bn2 statistics
# ---------------------------------------------------------------------------
def _make_pass2_kernel(nb, Ho, Wo, Cpo, m_total):
    Mt = nb * Ho * Wo
    inv_m = 1.0 / float(m_total)

    def kernel(y1_ref, st1_ref, g1_ref, b1_ref, w2_ref, y2_ref, st2_ref, apad_ref):
        st = jnp.sum(st1_ref[...], axis=0)        # reduce partial sums over tiles
        scale, shift = _bn_coeffs(st[0:1, :], st[1:2, :],
                                  g1_ref[...], b1_ref[...], inv_m)
        y1 = y1_ref[...].astype(jnp.float32).reshape(Mt, Cpo)
        a1 = jnp.maximum(y1 * scale + shift, 0.0)

        # zero ONLY the 1-pixel border of the bf16 padded scratch each step
        # (cheap, and safe if the grid is sharded across TensorCores), then
        # write the interior once in matmul-ready bf16.
        zrow = jnp.zeros((nb, 1, Wo + 2, Cpo), jnp.bfloat16)
        zcol = jnp.zeros((nb, Ho, 1, Cpo), jnp.bfloat16)
        apad_ref[:, 0:1, :, :] = zrow
        apad_ref[:, Ho + 1:Ho + 2, :, :] = zrow
        apad_ref[:, 1:Ho + 1, 0:1, :] = zcol
        apad_ref[:, 1:Ho + 1, Wo + 1:Wo + 2, :] = zcol
        apad_ref[:, 1:Ho + 1, 1:Wo + 1, :] = (
            a1.reshape(nb, Ho, Wo, Cpo).astype(jnp.bfloat16))

        # conv2: 9 shifted matmuls; accumulator starts from the first tap
        acc = None
        for ky in range(3):
            for kx in range(3):
                patch = apad_ref[:, ky:ky + Ho, kx:kx + Wo, :]
                t = jnp.dot(patch.reshape(Mt, Cpo),
                            w2_ref[ky * 3 + kx],
                            preferred_element_type=jnp.float32)
                acc = t if acc is None else acc + t
        y2_ref[...] = acc.reshape(nb, Ho * Wo, Cpo).astype(jnp.bfloat16)
        st2_ref[0:1, 0:1, :] = jnp.sum(acc, axis=0, keepdims=True)[None]
        st2_ref[0:1, 1:2, :] = jnp.sum(acc * acc, axis=0, keepdims=True)[None]

    return kernel


# ---------------------------------------------------------------------------
# pass 3: bn2 + shortcut bn (or identity) + residual add + ReLU
# ---------------------------------------------------------------------------
def _make_pass3_kernel(nb, Ho, Wo, Cpo, m_total, has_shortcut):
    Mt = nb * Ho * Wo
    inv_m = 1.0 / float(m_total)

    def kernel(y2_ref, st2_ref, g2_ref, b2_ref, *rest):
        if has_shortcut:
            ys_ref, st1_ref, gs_ref, bs_ref, out_ref = rest
        else:
            xres_ref, out_ref = rest

        st2 = jnp.sum(st2_ref[...], axis=0)
        sc2, sh2 = _bn_coeffs(st2[0:1, :], st2[1:2, :],
                              g2_ref[...], b2_ref[...], inv_m)
        y2 = y2_ref[...].astype(jnp.float32).reshape(Mt, Cpo) * sc2 + sh2

        if has_shortcut:
            st1 = jnp.sum(st1_ref[...], axis=0)
            scs, shs = _bn_coeffs(st1[2:3, :], st1[3:4, :],
                                  gs_ref[...], bs_ref[...], inv_m)
            res = ys_ref[...].astype(jnp.float32).reshape(Mt, Cpo) * scs + shs
        else:
            res = xres_ref[...].reshape(Mt, Cpo)          # identity kept in f32

        out_ref[...] = jnp.maximum(y2 + res, 0.0).reshape(nb, Ho * Wo, Cpo)

    return kernel


# ---------------------------------------------------------------------------
# wrapper
# ---------------------------------------------------------------------------
def _pick_batch_tile(n, rows_per_image, target_rows=512):
    nb = max(1, min(n, max(1, target_rows // max(1, rows_per_image))))
    while n % nb:
        nb -= 1
    return nb


def basic_block_forward(x_nchw, params, stride, batch_tile=None):
    N, Cin, H, W = x_nchw.shape
    Cout = params["w1"].shape[0]
    s = int(stride)
    Ho = (H - 1) // s + 1
    Wo = (W - 1) // s + 1
    rows = Ho * Wo
    has_shortcut = (s != 1) or (Cin != Cout)

    Cpi = _rup(Cin, _LANE)          # lane-dense channel padding
    Cpo = _rup(Cout, _LANE)

    nb = _pick_batch_tile(N, rows) if batch_tile is None else int(batch_tile)
    assert N % nb == 0, "batch tile must divide the batch"
    G = N // nb
    M = N * rows

    # NHWC, channel-padded to the lane width, spatially padded by 1.
    x = jnp.transpose(x_nchw, (0, 2, 3, 1)).astype(jnp.float32)
    xc = jnp.pad(x, ((0, 0), (0, 0), (0, 0), (0, Cpi - Cin)))   # f32 (identity residual)
    # bf16 for everything fed to the MXU: identical rounding to an in-kernel
    # cast, half the HBM->VMEM bytes.
    xpad = jnp.pad(xc, ((0, 0), (1, 1), (1, 1), (0, 0))).astype(jnp.bfloat16)

    # Space-to-depth by stride parity: tap (ky,kx) of the strided 3x3 conv is a
    # contiguous slice of exactly one parity plane -> no im2col blow-up and no
    # strided reads inside the kernel.
    Hp, Wp = H + 2, W + 2
    Hq, Wq = -(-Hp // s), -(-Wp // s)
    planes = []
    for ph in range(s):
        for pw in range(s):
            pln = xpad[:, ph::s, pw::s, :]
            pln = jnp.pad(pln, ((0, 0), (0, Hq - pln.shape[1]),
                                (0, Wq - pln.shape[2]), (0, 0)))
            planes.append(pln)
    xplanes = jnp.concatenate(planes, axis=-1)            # (N, Hq, Wq, s*s*Cpi) bf16

    # weights: (ky*3+kx, Cin, Cout), channel-padded, bf16 (f32 accumulation)
    w1 = jnp.transpose(params["w1"], (2, 3, 1, 0)).reshape(9, Cin, Cout)
    w1 = jnp.pad(w1, ((0, 0), (0, Cpi - Cin), (0, Cpo - Cout))).astype(jnp.bfloat16)
    w2 = jnp.transpose(params["w2"], (2, 3, 1, 0)).reshape(9, Cout, Cout)
    w2 = jnp.pad(w2, ((0, 0), (0, Cpo - Cout), (0, Cpo - Cout))).astype(jnp.bfloat16)

    def bn_vec(name):
        v = params[name].astype(jnp.float32).reshape(1, Cout)
        return jnp.pad(v, ((0, 0), (0, Cpo - Cout)))      # padded channels -> 0

    g1, b1 = bn_vec("gamma1"), bn_vec("beta1")
    g2, b2 = bn_vec("gamma2"), bn_vec("beta2")

    cparams = _cparams()
    n_stats = 4 if has_shortcut else 2

    y_spec = pl.BlockSpec((nb, rows, Cpo), lambda g: (g, 0, 0))
    y_shape = jax.ShapeDtypeStruct((N, rows, Cpo), jnp.bfloat16)     # intermediates
    out_shape3d = jax.ShapeDtypeStruct((N, rows, Cpo), jnp.float32)  # final output
    st1_tile_spec = pl.BlockSpec((1, n_stats, Cpo), lambda g: (g, 0, 0))
    st1_full_spec = pl.BlockSpec((G, n_stats, Cpo), lambda g: (0, 0, 0))
    st1_shape = jax.ShapeDtypeStruct((G, n_stats, Cpo), jnp.float32)
    st2_tile_spec = pl.BlockSpec((1, 2, Cpo), lambda g: (g, 0, 0))
    st2_full_spec = pl.BlockSpec((G, 2, Cpo), lambda g: (0, 0, 0))
    st2_shape = jax.ShapeDtypeStruct((G, 2, Cpo), jnp.float32)
    vec_spec = pl.BlockSpec((1, Cpo), lambda g: (0, 0))
    x_spec = pl.BlockSpec((nb, Hq, Wq, s * s * Cpi), lambda g: (g, 0, 0, 0))
    w1_spec = pl.BlockSpec((9, Cpi, Cpo), lambda g: (0, 0, 0))
    w2_spec = pl.BlockSpec((9, Cpo, Cpo), lambda g: (0, 0, 0))

    # ---- pass 1: conv1 (+ shortcut conv) + partial stats --------------------
    k1 = _make_pass1_kernel(nb, Ho, Wo, Cpi, Cpo, s, has_shortcut)
    if has_shortcut:
        ws = params["ws"].reshape(Cout, Cin).T
        ws = jnp.pad(ws, ((0, Cpi - Cin), (0, Cpo - Cout))).astype(jnp.bfloat16)
        y1, ys, st1 = pl.pallas_call(
            k1,
            grid=(G,),
            in_specs=[x_spec, w1_spec, pl.BlockSpec((Cpi, Cpo), lambda g: (0, 0))],
            out_specs=(y_spec, y_spec, st1_tile_spec),
            out_shape=(y_shape, y_shape, st1_shape),
            compiler_params=cparams,
        )(xplanes, w1, ws)
    else:
        ys = None
        y1, st1 = pl.pallas_call(
            k1,
            grid=(G,),
            in_specs=[x_spec, w1_spec],
            out_specs=(y_spec, st1_tile_spec),
            out_shape=(y_shape, st1_shape),
            compiler_params=cparams,
        )(xplanes, w1)

    # ---- pass 2: bn1 + relu + conv2 + partial bn2 stats ----------------------
    k2 = _make_pass2_kernel(nb, Ho, Wo, Cpo, M)
    y2, st2 = pl.pallas_call(
        k2,
        grid=(G,),
        in_specs=[y_spec, st1_full_spec, vec_spec, vec_spec, w2_spec],
        out_specs=(y_spec, st2_tile_spec),
        out_shape=(y_shape, st2_shape),
        scratch_shapes=[pltpu.VMEM((nb, Ho + 2, Wo + 2, Cpo), jnp.bfloat16)],
        compiler_params=cparams,
    )(y1, st1, g1, b1, w2)

    # ---- pass 3: bn2 + shortcut bn / identity + add + relu -------------------
    k3 = _make_pass3_kernel(nb, Ho, Wo, Cpo, M, has_shortcut)
    if has_shortcut:
        gs, bs = bn_vec("gammas"), bn_vec("betas")
        out3d = pl.pallas_call(
            k3,
            grid=(G,),
            in_specs=[y_spec, st2_full_spec, vec_spec, vec_spec,
                      y_spec, st1_full_spec, vec_spec, vec_spec],
            out_specs=y_spec,
            out_shape=out_shape3d,
            compiler_params=cparams,
        )(y2, st2, g2, b2, ys, st1, gs, bs)
    else:
        xres = xc.reshape(N, rows, Cpo)          # identity: H==Ho, Cpi==Cpo, f32
        out3d = pl.pallas_call(
            k3,
            grid=(G,),
            in_specs=[y_spec, st2_full_spec, vec_spec, vec_spec, y_spec],
            out_specs=y_spec,
            out_shape=out_shape3d,
            compiler_params=cparams,
        )(y2, st2, g2, b2, xres)

    out = out3d[:, :, :Cout].reshape(N, Ho, Wo, Cout)
    return jnp.transpose(out, (0, 3, 1, 2))                 # back to NCHW


# ---------------------------------------------------------------------------
# deterministic parameter init (shapes from BasicBlock.__init__)
# ---------------------------------------------------------------------------
def init_params(key, in_channels, out_channels, stride):
    ks = jax.random.split(key, 9)
    p = {
        "w1": 0.2 * jax.random.normal(ks[0], (out_channels, in_channels, 3, 3), jnp.float32),
        "gamma1": jax.random.uniform(ks[1], (out_channels,), jnp.float32, 0.5, 1.5),
        "beta1": 0.1 * jax.random.normal(ks[2], (out_channels,), jnp.float32),
        "w2": 0.2 * jax.random.normal(ks[3], (out_channels, out_channels, 3, 3), jnp.float32),
        "gamma2": jax.random.uniform(ks[4], (out_channels,), jnp.float32, 0.5, 1.5),
        "beta2": 0.1 * jax.random.normal(ks[5], (out_channels,), jnp.float32),
    }
    if stride != 1 or in_channels != out_channels:
        p["ws"] = 0.2 * jax.random.normal(ks[6], (out_channels, in_channels, 1, 1), jnp.float32)
        p["gammas"] = jax.random.uniform(ks[7], (out_channels,), jnp.float32, 0.5, 1.5)
        p["betas"] = 0.1 * jax.random.normal(ks[8], (out_channels,), jnp.float32)
    return p


# ---------------------------------------------------------------------------
# pure-JAX reference (mirrors the PyTorch forward, NCHW, f32 HIGHEST)
# ---------------------------------------------------------------------------
def reference_basic_block(x, params, stride):
    def conv(x, w, s, pad):
        return jax.lax.conv_general_dilated(
            x, w, (s, s), [(pad, pad), (pad, pad)],
            dimension_numbers=("NCHW", "OIHW", "NCHW"), precision=_PREC)

    def bn(y, g, b):
        mean = jnp.mean(y, axis=(0, 2, 3), keepdims=True)
        var = jnp.mean((y - mean) ** 2, axis=(0, 2, 3), keepdims=True)
        return (g[None, :, None, None] * (y - mean) / jnp.sqrt(var + _EPS)
                + b[None, :, None, None])

    out = jax.nn.relu(bn(conv(x, params["w1"], stride, 1),
                         params["gamma1"], params["beta1"]))
    out = bn(conv(out, params["w2"], 1, 1), params["gamma2"], params["beta2"])
    if "ws" in params:
        res = bn(conv(x, params["ws"], stride, 0),
                 params["gammas"], params["betas"])
    else:
        res = x
    return jax.nn.relu(out + res)


if __name__ == "__main__":
    key = jax.random.PRNGKey(0)
    fwd = jax.jit(basic_block_forward, static_argnums=(2, 3))

    # case 1: downsampling block (stride 2, 1x1-conv + BN shortcut path),
    # batch_tile=1 -> 2-step grid, exercising cross-tile BN statistics.
    kx1, kp1, kx2, kp2 = jax.random.split(key, 4)
    N, Cin, H, W, Cout, stride = 2, 4, 16, 16, 8, 2
    x1 = jax.random.normal(kx1, (N, Cin, H, W), jnp.float32)
    p1 = init_params(kp1, Cin, Cout, stride)
    out1 = jax.block_until_ready(fwd(x1, p1, stride, 1))
    ref1 = reference_basic_block(x1, p1, stride)

    # case 2: identity-shortcut block (stride 1, Cin == Cout).
    x2 = jax.random.normal(kx2, (2, 8, 8, 8), jnp.float32)
    p2 = init_params(kp2, 8, 8, 1)
    out2 = jax.block_until_ready(fwd(x2, p2, 1, 1))
    ref2 = reference_basic_block(x2, p2, 1)

    # tolerance reflects a bf16 MXU pipeline with bf16-stored intermediates,
    # compared against an f32 HIGHEST-precision reference.
    TOL = 5e-2
    ok = True
    for out, ref, name in ((out1, ref1, "shortcut"), (out2, ref2, "identity")):
        err = float(jnp.max(jnp.abs(out - ref)))
        if out.shape != ref.shape or not jnp.allclose(out, ref, atol=TOL, rtol=TOL):
            ok = False
            print("mismatch (%s path): max abs err = %e" % (name, err))
    if not ok:
        raise SystemExit(1)
    print("KERNEL_OK")
</pallas_src>

<mosaic_0001>
module attributes {stable_mosaic.version = 11 : i64} {
  func.func @kernel(%arg0: i32, %arg1: memref<1x9x9x512xbf16, #tpu.memory_space<vmem>>, %arg2: memref<9x128x128xbf16, #tpu.memory_space<vmem>>, %arg3: memref<128x128xbf16, #tpu.memory_space<vmem>>, %arg4: memref<1x64x128xbf16, #tpu.memory_space<vmem>>, %arg5: memref<1x64x128xbf16, #tpu.memory_space<vmem>>, %arg6: memref<1x4x128xf32, #tpu.memory_space<vmem>>) attributes {dimension_semantics = [#tpu.dimension_semantics<parallel>], iteration_bounds = array<i64: 2>, scalar_prefetch = 0 : i64, scratch_operands = 0 : i64, tpu.core_type = #tpu.core_type<tc>, window_params = [{transform_indices = @transform_0, window_bounds = array<i64: 1, 9, 9, 512>}, {pipeline_mode = #tpu.pipeline_mode<synchronous>, transform_indices = @transform_1, window_bounds = array<i64: 9, 128, 128>}, {pipeline_mode = #tpu.pipeline_mode<synchronous>, transform_indices = @transform_2, window_bounds = array<i64: 128, 128>}, {transform_indices = @transform_3, window_bounds = array<i64: 1, 64, 128>}, {transform_indices = @transform_4, window_bounds = array<i64: 1, 64, 128>}, {transform_indices = @transform_5, window_bounds = array<i64: 1, 4, 128>}]} {
    %c0 = arith.constant 0 : index
    %c0_0 = arith.constant 0 : index
    %c0_1 = arith.constant 0 : index
    %c0_2 = arith.constant 0 : index
    %0 = vector.load %arg1[%c0, %c0_0, %c0_1, %c0_2] : memref<1x9x9x512xbf16, #tpu.memory_space<vmem>>, vector<1x8x8x128xbf16>
    %1 = vector.shape_cast %0 : vector<1x8x8x128xbf16> to vector<64x128xbf16>
    %c0_3 = arith.constant 0 : index
    %c0_4 = arith.constant 0 : index
    %c0_5 = arith.constant 0 : index
    %2 = vector.load %arg2[%c0_3, %c0_4, %c0_5] : memref<9x128x128xbf16, #tpu.memory_space<vmem>>, vector<1x128x128xbf16>
    %3 = vector.shape_cast %2 : vector<1x128x128xbf16> to vector<128x128xbf16>
    %cst = arith.constant dense<0.000000e+00> : vector<64x128xf32>
    %4 = tpu.matmul %1, %3, %cst {dimension_numbers = #tpu.dot_dimension_numbers<[1], [0], [0], [1], [0, 0, 1, 1], [], []>} : vector<64x128xbf16>, vector<128x128xbf16>, vector<64x128xf32> -> vector<64x128xf32>
    %c0_6 = arith.constant 0 : index
    %c0_7 = arith.constant 0 : index
    %c0_8 = arith.constant 0 : index
    %c128 = arith.constant 128 : index
    %5 = vector.load %arg1[%c0_6, %c0_7, %c0_8, %c128] : memref<1x9x9x512xbf16, #tpu.memory_space<vmem>>, vector<1x8x8x128xbf16>
    %6 = vector.shape_cast %5 : vector<1x8x8x128xbf16> to vector<64x128xbf16>
    %c1 = arith.constant 1 : index
    %c0_9 = arith.constant 0 : index
    %c0_10 = arith.constant 0 : index
    %7 = vector.load %arg2[%c1, %c0_9, %c0_10] : memref<9x128x128xbf16, #tpu.memory_space<vmem>>, vector<1x128x128xbf16>
    %8 = vector.shape_cast %7 : vector<1x128x128xbf16> to vector<128x128xbf16>
    %cst_11 = arith.constant dense<0.000000e+00> : vector<64x128xf32>
    %9 = tpu.matmul %6, %8, %cst_11 {dimension_numbers = #tpu.dot_dimension_numbers<[1], [0], [0], [1], [0, 0, 1, 1], [], []>} : vector<64x128xbf16>, vector<128x128xbf16>, vector<64x128xf32> -> vector<64x128xf32>
    %10 = arith.addf %4, %9 : vector<64x128xf32>
    %c0_12 = arith.constant 0 : index
    %c0_13 = arith.constant 0 : index
    %c1_14 = arith.constant 1 : index
    %c0_15 = arith.constant 0 : index
    %11 = vector.load %arg1[%c0_12, %c0_13, %c1_14, %c0_15] : memref<1x9x9x512xbf16, #tpu.memory_space<vmem>>, vector<1x8x8x128xbf16>
    %12 = vector.shape_cast %11 : vector<1x8x8x128xbf16> to vector<64x128xbf16>
    %c2 = arith.constant 2 : index
    %c0_16 = arith.constant 0 : index
    %c0_17 = arith.constant 0 : index
    %13 = vector.load %arg2[%c2, %c0_16, %c0_17] : memref<9x128x128xbf16, #tpu.memory_space<vmem>>, vector<1x128x128xbf16>
    %14 = vector.shape_cast %13 : vector<1x128x128xbf16> to vector<128x128xbf16>
    %cst_18 = arith.constant dense<0.000000e+00> : vector<64x128xf32>
    %15 = tpu.matmul %12, %14, %cst_18 {dimension_numbers = #tpu.dot_dimension_numbers<[1], [0], [0], [1], [0, 0, 1, 1], [], []>} : vector<64x128xbf16>, vector<128x128xbf16>, vector<64x128xf32> -> vector<64x128xf32>
    %16 = arith.addf %10, %15 : vector<64x128xf32>
    %c0_19 = arith.constant 0 : index
    %c0_20 = arith.constant 0 : index
    %c0_21 = arith.constant 0 : index
    %c256 = arith.constant 256 : index
    %17 = vector.load %arg1[%c0_19, %c0_20, %c0_21, %c256] : memref<1x9x9x512xbf16, #tpu.memory_space<vmem>>, vector<1x8x8x128xbf16>
    %18 = vector.shape_cast %17 : vector<1x8x8x128xbf16> to vector<64x128xbf16>
    %c3 = arith.constant 3 : index
    %c0_22 = arith.constant 0 : index
    %c0_23 = arith.constant 0 : index
    %19 = vector.load %arg2[%c3, %c0_22, %c0_23] : memref<9x128x128xbf16, #tpu.memory_space<vmem>>, vector<1x128x128xbf16>
    %20 = vector.shape_cast %19 : vector<1x128x128xbf16> to vector<128x128xbf16>
    %cst_24 = arith.constant dense<0.000000e+00> : vector<64x128xf32>
    %21 = tpu.matmul %18, %20, %cst_24 {dimension_numbers = #tpu.dot_dimension_numbers<[1], [0], [0], [1], [0, 0, 1, 1], [], []>} : vector<64x128xbf16>, vector<128x128xbf16>, vector<64x128xf32> -> vector<64x128xf32>
    %22 = arith.addf %16, %21 : vector<64x128xf32>
    %c0_25 = arith.constant 0 : index
    %c0_26 = arith.constant 0 : index
    %c0_27 = arith.constant 0 : index
    %c384 = arith.constant 384 : index
    %23 = vector.load %arg1[%c0_25, %c0_26, %c0_27, %c384] : memref<1x9x9x512xbf16, #tpu.memory_space<vmem>>, vector<1x8x8x128xbf16>
    %24 = vector.shape_cast %23 : vector<1x8x8x128xbf16> to vector<64x128xbf16>
    %c4 = arith.constant 4 : index
    %c0_28 = arith.constant 0 : index
    %c0_29 = arith.constant 0 : index
    %25 = vector.load %arg2[%c4, %c0_28, %c0_29] : memref<9x128x128xbf16, #tpu.memory_space<vmem>>, vector<1x128x128xbf16>
    %26 = vector.shape_cast %25 : vector<1x128x128xbf16> to vector<128x128xbf16>
    %cst_30 = arith.constant dense<0.000000e+00> : vector<64x128xf32>
    %27 = tpu.matmul %24, %26, %cst_30 {dimension_numbers = #tpu.dot_dimension_numbers<[1], [0], [0], [1], [0, 0, 1, 1], [], []>} : vector<64x128xbf16>, vector<128x128xbf16>, vector<64x128xf32> -> vector<64x128xf32>
    %28 = arith.addf %22, %27 : vector<64x128xf32>
    %c0_31 = arith.constant 0 : index
    %c0_32 = arith.constant 0 : index
    %c1_33 = arith.constant 1 : index
    %c256_34 = arith.constant 256 : index
    %29 = vector.load %arg1[%c0_31, %c0_32, %c1_33, %c256_34] : memref<1x9x9x512xbf16, #tpu.memory_space<vmem>>, vector<1x8x8x128xbf16>
    %30 = vector.shape_cast %29 : vector<1x8x8x128xbf16> to vector<64x128xbf16>
    %c5 = arith.constant 5 : index
    %c0_35 = arith.constant 0 : index
    %c0_36 = arith.constant 0 : index
    %31 = vector.load %arg2[%c5, %c0_35, %c0_36] : memref<9x128x128xbf16, #tpu.memory_space<vmem>>, vector<1x128x128xbf16>
    %32 = vector.shape_cast %31 : vector<1x128x128xbf16> to vector<128x128xbf16>
    %cst_37 = arith.constant dense<0.000000e+00> : vector<64x128xf32>
    %33 = tpu.matmul %30, %32, %cst_37 {dimension_numbers = #tpu.dot_dimension_numbers<[1], [0], [0], [1], [0, 0, 1, 1], [], []>} : vector<64x128xbf16>, vector<128x128xbf16>, vector<64x128xf32> -> vector<64x128xf32>
    %34 = arith.addf %28, %33 : vector<64x128xf32>
    %c0_38 = arith.constant 0 : index
    %c1_39 = arith.constant 1 : index
    %c0_40 = arith.constant 0 : index
    %c0_41 = arith.constant 0 : index
    %35 = vector.load %arg1[%c0_38, %c1_39, %c0_40, %c0_41] : memref<1x9x9x512xbf16, #tpu.memory_space<vmem>>, vector<1x8x8x128xbf16>
    %36 = vector.shape_cast %35 : vector<1x8x8x128xbf16> to vector<64x128xbf16>
    %c6 = arith.constant 6 : index
    %c0_42 = arith.constant 0 : index
    %c0_43 = arith.constant 0 : index
    %37 = vector.load %arg2[%c6, %c0_42, %c0_43] : memref<9x128x128xbf16, #tpu.memory_space<vmem>>, vector<1x128x128xbf16>
    %38 = vector.shape_cast %37 : vector<1x128x128xbf16> to vector<128x128xbf16>
    %cst_44 = arith.constant dense<0.000000e+00> : vector<64x128xf32>
    %39 = tpu.matmul %36, %38, %cst_44 {dimension_numbers = #tpu.dot_dimension_numbers<[1], [0], [0], [1], [0, 0, 1, 1], [], []>} : vector<64x128xbf16>, vector<128x128xbf16>, vector<64x128xf32> -> vector<64x128xf32>
    %40 = arith.addf %34, %39 : vector<64x128xf32>
    %c0_45 = arith.constant 0 : index
    %c1_46 = arith.constant 1 : index
    %c0_47 = arith.constant 0 : index
    %c128_48 = arith.constant 128 : index
    %41 = vector.load %arg1[%c0_45, %c1_46, %c0_47, %c128_48] : memref<1x9x9x512xbf16, #tpu.memory_space<vmem>>, vector<1x8x8x128xbf16>
    %42 = vector.shape_cast %41 : vector<1x8x8x128xbf16> to vector<64x128xbf16>
    %c7 = arith.constant 7 : index
    %c0_49 = arith.constant 0 : index
    %c0_50 = arith.constant 0 : index
    %43 = vector.load %arg2[%c7, %c0_49, %c0_50] : memref<9x128x128xbf16, #tpu.memory_space<vmem>>, vector<1x128x128xbf16>
    %44 = vector.shape_cast %43 : vector<1x128x128xbf16> to vector<128x128xbf16>
    %cst_51 = arith.constant dense<0.000000e+00> : vector<64x128xf32>
    %45 = tpu.matmul %42, %44, %cst_51 {dimension_numbers = #tpu.dot_dimension_numbers<[1], [0], [0], [1], [0, 0, 1, 1], [], []>} : vector<64x128xbf16>, vector<128x128xbf16>, vector<64x128xf32> -> vector<64x128xf32>
    %46 = arith.addf %40, %45 : vector<64x128xf32>
    %c0_52 = arith.constant 0 : index
    %c1_53 = arith.constant 1 : index
    %c1_54 = arith.constant 1 : index
    %c0_55 = arith.constant 0 : index
    %47 = vector.load %arg1[%c0_52, %c1_53, %c1_54, %c0_55] : memref<1x9x9x512xbf16, #tpu.memory_space<vmem>>, vector<1x8x8x128xbf16>
    %48 = vector.shape_cast %47 : vector<1x8x8x128xbf16> to vector<64x128xbf16>
    %c8 = arith.constant 8 : index
    %c0_56 = arith.constant 0 : index
    %c0_57 = arith.constant 0 : index
    %49 = vector.load %arg2[%c8, %c0_56, %c0_57] : memref<9x128x128xbf16, #tpu.memory_space<vmem>>, vector<1x128x128xbf16>
    %50 = vector.shape_cast %49 : vector<1x128x128xbf16> to vector<128x128xbf16>
    %cst_58 = arith.constant dense<0.000000e+00> : vector<64x128xf32>
    %51 = tpu.matmul %48, %50, %cst_58 {dimension_numbers = #tpu.dot_dimension_numbers<[1], [0], [0], [1], [0, 0, 1, 1], [], []>} : vector<64x128xbf16>, vector<128x128xbf16>, vector<64x128xf32> -> vector<64x128xf32>
    %52 = arith.addf %46, %51 : vector<64x128xf32>
    %53 = vector.shape_cast %52 : vector<64x128xf32> to vector<1x64x128xf32>
    %54 = arith.truncf %53 : vector<1x64x128xf32> to vector<1x64x128xbf16>
    %c0_59 = arith.constant 0 : index
    %c0_60 = arith.constant 0 : index
    %c0_61 = arith.constant 0 : index
    %55 = vector.load %arg4[%c0_59, %c0_60, %c0_61] : memref<1x64x128xbf16, #tpu.memory_space<vmem>>, vector<1x64x128xbf16>
    tpu.vector_store %arg4[%c0_59, %c0_60, %c0_61], %54 {strides = array<i32>} : memref<1x64x128xbf16, #tpu.memory_space<vmem>>, vector<1x64x128xbf16>,
    %cst_62 = arith.constant dense<0.000000e+00> : vector<128xf32>
    %56 = vector.multi_reduction <add>, %52, %cst_62 [0] : vector<64x128xf32> to vector<128xf32>
    %57 = vector.shape_cast %56 : vector<128xf32> to vector<1x128xf32>
    %58 = vector.shape_cast %57 : vector<1x128xf32> to vector<1x1x128xf32>
    %c0_63 = arith.constant 0 : index
    %c0_64 = arith.constant 0 : index
    %c0_65 = arith.constant 0 : index
    %59 = vector.load %arg6[%c0_63, %c0_64, %c0_65] : memref<1x4x128xf32, #tpu.memory_space<vmem>>, vector<1x1x128xf32>
    tpu.vector_store %arg6[%c0_63, %c0_64, %c0_65], %58 {strides = array<i32>} : memref<1x4x128xf32, #tpu.memory_space<vmem>>, vector<1x1x128xf32>,
    %60 = arith.mulf %52, %52 : vector<64x128xf32>
    %cst_66 = arith.constant dense<0.000000e+00> : vector<128xf32>
    %61 = vector.multi_reduction <add>, %60, %cst_66 [0] : vector<64x128xf32> to vector<128xf32>
    %62 = vector.shape_cast %61 : vector<128xf32> to vector<1x128xf32>
    %63 = vector.shape_cast %62 : vector<1x128xf32> to vector<1x1x128xf32>
    %c0_67 = arith.constant 0 : index
    %c1_68 = arith.constant 1 : index
    %c0_69 = arith.constant 0 : index
    %64 = vector.load %arg6[%c0_67, %c1_68, %c0_69] : memref<1x4x128xf32, #tpu.memory_space<vmem>>, vector<1x1x128xf32>
    tpu.vector_store %arg6[%c0_67, %c1_68, %c0_69], %63 {strides = array<i32>} : memref<1x4x128xf32, #tpu.memory_space<vmem>>, vector<1x1x128xf32>,
    %c0_70 = arith.constant 0 : index
    %c0_71 = arith.constant 0 : index
    %c0_72 = arith.constant 0 : index
    %c384_73 = arith.constant 384 : index
    %65 = vector.load %arg1[%c0_70, %c0_71, %c0_72, %c384_73] : memref<1x9x9x512xbf16, #tpu.memory_space<vmem>>, vector<1x8x8x128xbf16>
    %66 = vector.shape_cast %65 : vector<1x8x8x128xbf16> to vector<64x128xbf16>
    %c0_74 = arith.constant 0 : index
    %c0_75 = arith.constant 0 : index
    %67 = vector.load %arg3[%c0_74, %c0_75] : memref<128x128xbf16, #tpu.memory_space<vmem>>, vector<128x128xbf16>
    %cst_76 = arith.constant dense<0.000000e+00> : vector<64x128xf32>
    %68 = tpu.matmul %66, %67, %cst_76 {dimension_numbers = #tpu.dot_dimension_numbers<[1], [0], [0], [1], [0, 0, 1, 1], [], []>} : vector<64x128xbf16>, vector<128x128xbf16>, vector<64x128xf32> -> vector<64x128xf32>
    %69 = vector.shape_cast %68 : vector<64x128xf32> to vector<1x64x128xf32>
    %70 = arith.truncf %69 : vector<1x64x128xf32> to vector<1x64x128xbf16>
    %c0_77 = arith.constant 0 : index
    %c0_78 = arith.constant 0 : index
    %c0_79 = arith.constant 0 : index
    %71 = vector.load %arg5[%c0_77, %c0_78, %c0_79] : memref<1x64x128xbf16, #tpu.memory_space<vmem>>, vector<1x64x128xbf16>
    tpu.vector_store %arg5[%c0_77, %c0_78, %c0_79], %70 {strides = array<i32>} : memref<1x64x128xbf16, #tpu.memory_space<vmem>>, vector<1x64x128xbf16>,
    %cst_80 = arith.constant dense<0.000000e+00> : vector<128xf32>
    %72 = vector.multi_reduction <add>, %68, %cst_80 [0] : vector<64x128xf32> to vector<128xf32>
    %73 = vector.shape_cast %72 : vector<128xf32> to vector<1x128xf32>
    %74 = vector.shape_cast %73 : vector<1x128xf32> to vector<1x1x128xf32>
    %c0_81 = arith.constant 0 : index
    %c2_82 = arith.constant 2 : index
    %c0_83 = arith.constant 0 : index
    %75 = vector.load %arg6[%c0_81, %c2_82, %c0_83] : memref<1x4x128xf32, #tpu.memory_space<vmem>>, vector<1x1x128xf32>
    tpu.vector_store %arg6[%c0_81, %c2_82, %c0_83], %74 {strides = array<i32>} : memref<1x4x128xf32, #tpu.memory_space<vmem>>, vector<1x1x128xf32>,
    %76 = arith.mulf %68, %68 : vector<64x128xf32>
    %cst_84 = arith.constant dense<0.000000e+00> : vector<128xf32>
    %77 = vector.multi_reduction <add>, %76, %cst_84 [0] : vector<64x128xf32> to vector<128xf32>
    %78 = vector.shape_cast %77 : vector<128xf32> to vector<1x128xf32>
    %79 = vector.shape_cast %78 : vector<1x128xf32> to vector<1x1x128xf32>
    %c0_85 = arith.constant 0 : index
    %c3_86 = arith.constant 3 : index
    %c0_87 = arith.constant 0 : index
    %80 = vector.load %arg6[%c0_85, %c3_86, %c0_87] : memref<1x4x128xf32, #tpu.memory_space<vmem>>, vector<1x1x128xf32>
    tpu.vector_store %arg6[%c0_85, %c3_86, %c0_87], %79 {strides = array<i32>} : memref<1x4x128xf32, #tpu.memory_space<vmem>>, vector<1x1x128xf32>,
    return
  }
  func.func @transform_0(%arg0: i32) -> (i32, i32, i32, i32) {
    %c0_i32 = arith.constant 0 : i32
    %c0_i32_0 = arith.constant 0 : i32
    %c0_i32_1 = arith.constant 0 : i32
    %c0_i32_2 = arith.constant 0 : i32
    return %arg0, %c0_i32, %c0_i32_0, %c0_i32_1 : i32, i32, i32, i32
  }
  func.func @transform_1(%arg0: i32) -> (i32, i32, i32) {
    %c0_i32 = arith.constant 0 : i32
    %c0_i32_0 = arith.constant 0 : i32
    %c0_i32_1 = arith.constant 0 : i32
    %c0_i32_2 = arith.constant 0 : i32
    return %c0_i32, %c0_i32_0, %c0_i32_1 : i32, i32, i32
  }
  func.func @transform_2(%arg0: i32) -> (i32, i32) {
    %c0_i32 = arith.constant 0 : i32
    %c0_i32_0 = arith.constant 0 : i32
    %c0_i32_1 = arith.constant 0 : i32
    return %c0_i32, %c0_i32_0 : i32, i32
  }
  func.func @transform_3(%arg0: i32) -> (i32, i32, i32) {
    %c0_i32 = arith.constant 0 : i32
    %c0_i32_0 = arith.constant 0 : i32
    %c0_i32_1 = arith.constant 0 : i32
    return %arg0, %c0_i32, %c0_i32_0 : i32, i32, i32
  }
  func.func @transform_4(%arg0: i32) -> (i32, i32, i32) {
    %c0_i32 = arith.constant 0 : i32
    %c0_i32_0 = arith.constant 0 : i32
    %c0_i32_1 = arith.constant 0 : i32
    return %arg0, %c0_i32, %c0_i32_0 : i32, i32, i32
  }
  func.func @transform_5(%arg0: i32) -> (i32, i32, i32) {
    %c0_i32 = arith.constant 0 : i32
    %c0_i32_0 = arith.constant 0 : i32
    %c0_i32_1 = arith.constant 0 : i32
    return %arg0, %c0_i32, %c0_i32_0 : i32, i32, i32
  }
}

module attributes {stable_mosaic.version = 11 : i64} {
  func.func @kernel(%arg0: i32, %arg1: memref<1x64x128xbf16, #tpu.memory_space<vmem>>, %arg2: memref<2x4x128xf32, #tpu.memory_space<vmem>>, %arg3: memref<1x128xf32, #tpu.memory_space<vmem>>, %arg4: memref<1x128xf32, #tpu.memory_space<vmem>>, %arg5: memref<9x128x128xbf16, #tpu.memory_space<vmem>>, %arg6: memref<1x64x128xbf16, #tpu.memory_space<vmem>>, %arg7: memref<1x2x128xf32, #tpu.memory_space<vmem>>, %arg8: memref<1x10x10x128xbf16, #tpu.memory_space<vmem>>) attributes {dimension_semantics = [#tpu.dimension_semantics<parallel>], iteration_bounds = array<i64: 2>, scalar_prefetch = 0 : i64, scratch_operands = 1 : i64, tpu.core_type = #tpu.core_type<tc>, window_params = [{transform_indices = @transform_0, window_bounds = array<i64: 1, 64, 128>}, {pipeline_mode = #tpu.pipeline_mode<synchronous>, transform_indices = @transform_1, window_bounds = array<i64: 2, 4, 128>}, {pipeline_mode = #tpu.pipeline_mode<synchronous>, transform_indices = @transform_2, window_bounds = array<i64: 1, 128>}, {pipeline_mode = #tpu.pipeline_mode<synchronous>, transform_indices = @transform_3, window_bounds = array<i64: 1, 128>}, {pipeline_mode = #tpu.pipeline_mode<synchronous>, transform_indices = @transform_4, window_bounds = array<i64: 9, 128, 128>}, {transform_indices = @transform_5, window_bounds = array<i64: 1, 64, 128>}, {transform_indices = @transform_6, window_bounds = array<i64: 1, 2, 128>}]} {
    %c0 = arith.constant 0 : index
    %c0_0 = arith.constant 0 : index
    %c0_1 = arith.constant 0 : index
    %0 = vector.load %arg2[%c0, %c0_0, %c0_1] : memref<2x4x128xf32, #tpu.memory_space<vmem>>, vector<2x4x128xf32>
    %cst = arith.constant dense<0.000000e+00> : vector<4x128xf32>
    %1 = vector.multi_reduction <add>, %0, %cst [0] : vector<2x4x128xf32> to vector<4x128xf32>
    %2 = vector.extract_strided_slice %1 {offsets = [0, 0], sizes = [1, 128], strides = [1, 1]} : vector<4x128xf32> to vector<1x128xf32>
    %3 = vector.extract_strided_slice %1 {offsets = [1, 0], sizes = [1, 128], strides = [1, 1]} : vector<4x128xf32> to vector<1x128xf32>
    %c0_2 = arith.constant 0 : index
    %c0_3 = arith.constant 0 : index
    %4 = vector.load %arg3[%c0_2, %c0_3] : memref<1x128xf32, #tpu.memory_space<vmem>>, vector<1x128xf32>
    %c0_4 = arith.constant 0 : index
    %c0_5 = arith.constant 0 : index
    %5 = vector.load %arg4[%c0_4, %c0_5] : memref<1x128xf32, #tpu.memory_space<vmem>>, vector<1x128xf32>
    %cst_6 = arith.constant 7.812500e-03 : f32
    %6 = vector.broadcast %cst_6 : f32 to vector<1x128xf32>
    %7 = arith.mulf %2, %6 : vector<1x128xf32>
    %cst_7 = arith.constant 7.812500e-03 : f32
    %8 = vector.broadcast %cst_7 : f32 to vector<1x128xf32>
    %9 = arith.mulf %3, %8 : vector<1x128xf32>
    %10 = arith.mulf %7, %7 : vector<1x128xf32>
    %11 = arith.subf %9, %10 : vector<1x128xf32>
    %cst_8 = arith.constant 0.000000e+00 : f32
    %12 = vector.broadcast %cst_8 : f32 to vector<1x128xf32>
    %13 = arith.maximumf %11, %12 : vector<1x128xf32>
    %cst_9 = arith.constant 9.99999974E-6 : f32
    %14 = vector.broadcast %cst_9 : f32 to vector<1x128xf32>
    %15 = arith.addf %13, %14 : vector<1x128xf32>
    %16 = math.rsqrt %15 : vector<1x128xf32>
    %17 = arith.mulf %4, %16 : vector<1x128xf32>
    %18 = arith.mulf %7, %17 : vector<1x128xf32>
    %19 = arith.subf %5, %18 : vector<1x128xf32>
    %c0_10 = arith.constant 0 : index
    %c0_11 = arith.constant 0 : index
    %c0_12 = arith.constant 0 : index
    %20 = vector.load %arg1[%c0_10, %c0_11, %c0_12] : memref<1x64x128xbf16, #tpu.memory_space<vmem>>, vector<1x64x128xbf16>
    %21 = arith.extf %20 : vector<1x64x128xbf16> to vector<1x64x128xf32>
    %22 = vector.shape_cast %21 : vector<1x64x128xf32> to vector<64x128xf32>
    %23 = vector.broadcast %17 : vector<1x128xf32> to vector<64x128xf32>
    %24 = arith.mulf %22, %23 : vector<64x128xf32>
    %25 = vector.broadcast %19 : vector<1x128xf32> to vector<64x128xf32>
    %26 = arith.addf %24, %25 : vector<64x128xf32>
    %cst_13 = arith.constant 0.000000e+00 : f32
    %27 = vector.broadcast %cst_13 : f32 to vector<64x128xf32>
    %28 = arith.maximumf %26, %27 : vector<64x128xf32>
    %cst_14 = arith.constant 0.000000e+00 : bf16
    %29 = vector.broadcast %cst_14 : bf16 to vector<1x1x10x128xbf16>
    %cst_15 = arith.constant 0.000000e+00 : bf16
    %30 = vector.broadcast %cst_15 : bf16 to vector<1x8x1x128xbf16>
    %c0_16 = arith.constant 0 : index
    %c0_17 = arith.constant 0 : index
    %c0_18 = arith.constant 0 : index
    %c0_19 = arith.constant 0 : index
    %31 = vector.load %arg8[%c0_16, %c0_17, %c0_18, %c0_19] : memref<1x10x10x128xbf16, #tpu.memory_space<vmem>>, vector<1x1x10x128xbf16>
    tpu.vector_store %arg8[%c0_16, %c0_17, %c0_18, %c0_19], %29 {strides = array<i32>} : memref<1x10x10x128xbf16, #tpu.memory_space<vmem>>, vector<1x1x10x128xbf16>,
    %c0_20 = arith.constant 0 : index
    %c9 = arith.constant 9 : index
    %c0_21 = arith.constant 0 : index
    %c0_22 = arith.constant 0 : index
    %32 = vector.load %arg8[%c0_20, %c9, %c0_21, %c0_22] : memref<1x10x10x128xbf16, #tpu.memory_space<vmem>>, vector<1x1x10x128xbf16>
    tpu.vector_store %arg8[%c0_20, %c9, %c0_21, %c0_22], %29 {strides = array<i32>} : memref<1x10x10x128xbf16, #tpu.memory_space<vmem>>, vector<1x1x10x128xbf16>,
    %c0_23 = arith.constant 0 : index
    %c1 = arith.constant 1 : index
    %c0_24 = arith.constant 0 : index
    %c0_25 = arith.constant 0 : index
    %33 = vector.load %arg8[%c0_23, %c1, %c0_24, %c0_25] : memref<1x10x10x128xbf16, #tpu.memory_space<vmem>>, vector<1x8x1x128xbf16>
    tpu.vector_store %arg8[%c0_23, %c1, %c0_24, %c0_25], %30 {strides = array<i32>} : memref<1x10x10x128xbf16, #tpu.memory_space<vmem>>, vector<1x8x1x128xbf16>,
    %c0_26 = arith.constant 0 : index
    %c1_27 = arith.constant 1 : index
    %c9_28 = arith.constant 9 : index
    %c0_29 = arith.constant 0 : index
    %34 = vector.load %arg8[%c0_26, %c1_27, %c9_28, %c0_29] : memref<1x10x10x128xbf16, #tpu.memory_space<vmem>>, vector<1x8x1x128xbf16>
    tpu.vector_store %arg8[%c0_26, %c1_27, %c9_28, %c0_29], %30 {strides = array<i32>} : memref<1x10x10x128xbf16, #tpu.memory_space<vmem>>, vector<1x8x1x128xbf16>,
    %35 = vector.shape_cast %28 : vector<64x128xf32> to vector<1x8x8x128xf32>
    %36 = arith.truncf %35 : vector<1x8x8x128xf32> to vector<1x8x8x128xbf16>
    %c0_30 = arith.constant 0 : index
    %c1_31 = arith.constant 1 : index
    %c1_32 = arith.constant 1 : index
    %c0_33 = arith.constant 0 : index
    %37 = vector.load %arg8[%c0_30, %c1_31, %c1_32, %c0_33] : memref<1x10x10x128xbf16, #tpu.memory_space<vmem>>, vector<1x8x8x128xbf16>
    tpu.vector_store %arg8[%c0_30, %c1_31, %c1_32, %c0_33], %36 {strides = array<i32>} : memref<1x10x10x128xbf16, #tpu.memory_space<vmem>>, vector<1x8x8x128xbf16>,
    %c0_34 = arith.constant 0 : index
    %c0_35 = arith.constant 0 : index
    %c0_36 = arith.constant 0 : index
    %c0_37 = arith.constant 0 : index
    %38 = vector.load %arg8[%c0_34, %c0_35, %c0_36, %c0_37] : memref<1x10x10x128xbf16, #tpu.memory_space<vmem>>, vector<1x8x8x128xbf16>
    %39 = vector.shape_cast %38 : vector<1x8x8x128xbf16> to vector<64x128xbf16>
    %c0_38 = arith.constant 0 : index
    %c0_39 = arith.constant 0 : index
    %c0_40 = arith.constant 0 : index
    %40 = vector.load %arg5[%c0_38, %c0_39, %c0_40] : memref<9x128x128xbf16, #tpu.memory_space<vmem>>, vector<1x128x128xbf16>
    %41 = vector.shape_cast %40 : vector<1x128x128xbf16> to vector<128x128xbf16>
    %cst_41 = arith.constant dense<0.000000e+00> : vector<64x128xf32>
    %42 = tpu.matmul %39, %41, %cst_41 {dimension_numbers = #tpu.dot_dimension_numbers<[1], [0], [0], [1], [0, 0, 1, 1], [], []>} : vector<64x128xbf16>, vector<128x128xbf16>, vector<64x128xf32> -> vector<64x128xf32>
    %c0_42 = arith.constant 0 : index
    %c0_43 = arith.constant 0 : index
    %c1_44 = arith.constant 1 : index
    %c0_45 = arith.constant 0 : index
    %43 = vector.load %arg8[%c0_42, %c0_43, %c1_44, %c0_45] : memref<1x10x10x128xbf16, #tpu.memory_space<vmem>>, vector<1x8x8x128xbf16>
    %44 = vector.shape_cast %43 : vector<1x8x8x128xbf16> to vector<64x128xbf16>
    %c1_46 = arith.constant 1 : index
    %c0_47 = arith.constant 0 : index
    %c0_48 = arith.constant 0 : index
    %45 = vector.load %arg5[%c1_46, %c0_47, %c0_48] : memref<9x128x128xbf16, #tpu.memory_space<vmem>>, vector<1x128x128xbf16>
    %46 = vector.shape_cast %45 : vector<1x128x128xbf16> to vector<128x128xbf16>
    %cst_49 = arith.constant dense<0.000000e+00> : vector<64x128xf32>
    %47 = tpu.matmul %44, %46, %cst_49 {dimension_numbers = #tpu.dot_dimension_numbers<[1], [0], [0], [1], [0, 0, 1, 1], [], []>} : vector<64x128xbf16>, vector<128x128xbf16>, vector<64x128xf32> -> vector<64x128xf32>
    %48 = arith.addf %42, %47 : vector<64x128xf32>
    %c0_50 = arith.constant 0 : index
    %c0_51 = arith.constant 0 : index
    %c2 = arith.constant 2 : index
    %c0_52 = arith.constant 0 : index
    %49 = vector.load %arg8[%c0_50, %c0_51, %c2, %c0_52] : memref<1x10x10x128xbf16, #tpu.memory_space<vmem>>, vector<1x8x8x128xbf16>
    %50 = vector.shape_cast %49 : vector<1x8x8x128xbf16> to vector<64x128xbf16>
    %c2_53 = arith.constant 2 : index
    %c0_54 = arith.constant 0 : index
    %c0_55 = arith.constant 0 : index
    %51 = vector.load %arg5[%c2_53, %c0_54, %c0_55] : memref<9x128x128xbf16, #tpu.memory_space<vmem>>, vector<1x128x128xbf16>
    %52 = vector.shape_cast %51 : vector<1x128x128xbf16> to vector<128x128xbf16>
    %cst_56 = arith.constant dense<0.000000e+00> : vector<64x128xf32>
    %53 = tpu.matmul %50, %52, %cst_56 {dimension_numbers = #tpu.dot_dimension_numbers<[1], [0], [0], [1], [0, 0, 1, 1], [], []>} : vector<64x128xbf16>, vector<128x128xbf16>, vector<64x128xf32> -> vector<64x128xf32>
    %54 = arith.addf %48, %53 : vector<64x128xf32>
    %c0_57 = arith.constant 0 : index
    %c1_58 = arith.constant 1 : index
    %c0_59 = arith.constant 0 : index
    %c0_60 = arith.constant 0 : index
    %55 = vector.load %arg8[%c0_57, %c1_58, %c0_59, %c0_60] : memref<1x10x10x128xbf16, #tpu.memory_space<vmem>>, vector<1x8x8x128xbf16>
    %56 = vector.shape_cast %55 : vector<1x8x8x128xbf16> to vector<64x128xbf16>
    %c3 = arith.constant 3 : index
    %c0_61 = arith.constant 0 : index
    %c0_62 = arith.constant 0 : index
    %57 = vector.load %arg5[%c3, %c0_61, %c0_62] : memref<9x128x128xbf16, #tpu.memory_space<vmem>>, vector<1x128x128xbf16>
    %58 = vector.shape_cast %57 : vector<1x128x128xbf16> to vector<128x128xbf16>
    %cst_63 = arith.constant dense<0.000000e+00> : vector<64x128xf32>
    %59 = tpu.matmul %56, %58, %cst_63 {dimension_numbers = #tpu.dot_dimension_numbers<[1], [0], [0], [1], [0, 0, 1, 1], [], []>} : vector<64x128xbf16>, vector<128x128xbf16>, vector<64x128xf32> -> vector<64x128xf32>
    %60 = arith.addf %54, %59 : vector<64x128xf32>
    %c0_64 = arith.constant 0 : index
    %c1_65 = arith.constant 1 : index
    %c1_66 = arith.constant 1 : index
    %c0_67 = arith.constant 0 : index
    %61 = vector.load %arg8[%c0_64, %c1_65, %c1_66, %c0_67] : memref<1x10x10x128xbf16, #tpu.memory_space<vmem>>, vector<1x8x8x128xbf16>
    %62 = vector.shape_cast %61 : vector<1x8x8x128xbf16> to vector<64x128xbf16>
    %c4 = arith.constant 4 : index
    %c0_68 = arith.constant 0 : index
    %c0_69 = arith.constant 0 : index
    %63 = vector.load %arg5[%c4, %c0_68, %c0_69] : memref<9x128x128xbf16, #tpu.memory_space<vmem>>, vector<1x128x128xbf16>
    %64 = vector.shape_cast %63 : vector<1x128x128xbf16> to vector<128x128xbf16>
    %cst_70 = arith.constant dense<0.000000e+00> : vector<64x128xf32>
    %65 = tpu.matmul %62, %64, %cst_70 {dimension_numbers = #tpu.dot_dimension_numbers<[1], [0], [0], [1], [0, 0, 1, 1], [], []>} : vector<64x128xbf16>, vector<128x128xbf16>, vector<64x128xf32> -> vector<64x128xf32>
    %66 = arith.addf %60, %65 : vector<64x128xf32>
    %c0_71 = arith.constant 0 : index
    %c1_72 = arith.constant 1 : index
    %c2_73 = arith.constant 2 : index
    %c0_74 = arith.constant 0 : index
    %67 = vector.load %arg8[%c0_71, %c1_72, %c2_73, %c0_74] : memref<1x10x10x128xbf16, #tpu.memory_space<vmem>>, vector<1x8x8x128xbf16>
    %68 = vector.shape_cast %67 : vector<1x8x8x128xbf16> to vector<64x128xbf16>
    %c5 = arith.constant 5 : index
    %c0_75 = arith.constant 0 : index
    %c0_76 = arith.constant 0 : index
    %69 = vector.load %arg5[%c5, %c0_75, %c0_76] : memref<9x128x128xbf16, #tpu.memory_space<vmem>>, vector<1x128x128xbf16>
    %70 = vector.shape_cast %69 : vector<1x128x128xbf16> to vector<128x128xbf16>
    %cst_77 = arith.constant dense<0.000000e+00> : vector<64x128xf32>
    %71 = tpu.matmul %68, %70, %cst_77 {dimension_numbers = #tpu.dot_dimension_numbers<[1], [0], [0], [1], [0, 0, 1, 1], [], []>} : vector<64x128xbf16>, vector<128x128xbf16>, vector<64x128xf32> -> vector<64x128xf32>
    %72 = arith.addf %66, %71 : vector<64x128xf32>
    %c0_78 = arith.constant 0 : index
    %c2_79 = arith.constant 2 : index
    %c0_80 = arith.constant 0 : index
    %c0_81 = arith.constant 0 : index
    %73 = vector.load %arg8[%c0_78, %c2_79, %c0_80, %c0_81] : memref<1x10x10x128xbf16, #tpu.memory_space<vmem>>, vector<1x8x8x128xbf16>
    %74 = vector.shape_cast %73 : vector<1x8x8x128xbf16> to vector<64x128xbf16>
    %c6 = arith.constant 6 : index
    %c0_82 = arith.constant 0 : index
    %c0_83 = arith.constant 0 : index
    %75 = vector.load %arg5[%c6, %c0_82, %c0_83] : memref<9x128x128xbf16, #tpu.memory_space<vmem>>, vector<1x128x128xbf16>
    %76 = vector.shape_cast %75 : vector<1x128x128xbf16> to vector<128x128xbf16>
    %cst_84 = arith.constant dense<0.000000e+00> : vector<64x128xf32>
    %77 = tpu.matmul %74, %76, %cst_84 {dimension_numbers = #tpu.dot_dimension_numbers<[1], [0], [0], [1], [0, 0, 1, 1], [], []>} : vector<64x128xbf16>, vector<128x128xbf16>, vector<64x128xf32> -> vector<64x128xf32>
    %78 = arith.addf %72, %77 : vector<64x128xf32>
    %c0_85 = arith.constant 0 : index
    %c2_86 = arith.constant 2 : index
    %c1_87 = arith.constant 1 : index
    %c0_88 = arith.constant 0 : index
    %79 = vector.load %arg8[%c0_85, %c2_86, %c1_87, %c0_88] : memref<1x10x10x128xbf16, #tpu.memory_space<vmem>>, vector<1x8x8x128xbf16>
    %80 = vector.shape_cast %79 : vector<1x8x8x128xbf16> to vector<64x128xbf16>
    %c7 = arith.constant 7 : index
    %c0_89 = arith.constant 0 : index
    %c0_90 = arith.constant 0 : index
    %81 = vector.load %arg5[%c7, %c0_89, %c0_90] : memref<9x128x128xbf16, #tpu.memory_space<vmem>>, vector<1x128x128xbf16>
    %82 = vector.shape_cast %81 : vector<1x128x128xbf16> to vector<128x128xbf16>
    %cst_91 = arith.constant dense<0.000000e+00> : vector<64x128xf32>
    %83 = tpu.matmul %80, %82, %cst_91 {dimension_numbers = #tpu.dot_dimension_numbers<[1], [0], [0], [1], [0, 0, 1, 1], [], []>} : vector<64x128xbf16>, vector<128x128xbf16>, vector<64x128xf32> -> vector<64x128xf32>
    %84 = arith.addf %78, %83 : vector<64x128xf32>
    %c0_92 = arith.constant 0 : index
    %c2_93 = arith.constant 2 : index
    %c2_94 = arith.constant 2 : index
    %c0_95 = arith.constant 0 : index
    %85 = vector.load %arg8[%c0_92, %c2_93, %c2_94, %c0_95] : memref<1x10x10x128xbf16, #tpu.memory_space<vmem>>, vector<1x8x8x128xbf16>
    %86 = vector.shape_cast %85 : vector<1x8x8x128xbf16> to vector<64x128xbf16>
    %c8 = arith.constant 8 : index
    %c0_96 = arith.constant 0 : index
    %c0_97 = arith.constant 0 : index
    %87 = vector.load %arg5[%c8, %c0_96, %c0_97] : memref<9x128x128xbf16, #tpu.memory_space<vmem>>, vector<1x128x128xbf16>
    %88 = vector.shape_cast %87 : vector<1x128x128xbf16> to vector<128x128xbf16>
    %cst_98 = arith.constant dense<0.000000e+00> : vector<64x128xf32>
    %89 = tpu.matmul %86, %88, %cst_98 {dimension_numbers = #tpu.dot_dimension_numbers<[1], [0], [0], [1], [0, 0, 1, 1], [], []>} : vector<64x128xbf16>, vector<128x128xbf16>, vector<64x128xf32> -> vector<64x128xf32>
    %90 = arith.addf %84, %89 : vector<64x128xf32>
    %91 = vector.shape_cast %90 : vector<64x128xf32> to vector<1x64x128xf32>
    %92 = arith.truncf %91 : vector<1x64x128xf32> to vector<1x64x128xbf16>
    %c0_99 = arith.constant 0 : index
    %c0_100 = arith.constant 0 : index
    %c0_101 = arith.constant 0 : index
    %93 = vector.load %arg6[%c0_99, %c0_100, %c0_101] : memref<1x64x128xbf16, #tpu.memory_space<vmem>>, vector<1x64x128xbf16>
    tpu.vector_store %arg6[%c0_99, %c0_100, %c0_101], %92 {strides = array<i32>} : memref<1x64x128xbf16, #tpu.memory_space<vmem>>, vector<1x64x128xbf16>,
    %cst_102 = arith.constant dense<0.000000e+00> : vector<128xf32>
    %94 = vector.multi_reduction <add>, %90, %cst_102 [0] : vector<64x128xf32> to vector<128xf32>
    %95 = vector.shape_cast %94 : vector<128xf32> to vector<1x128xf32>
    %96 = vector.shape_cast %95 : vector<1x128xf32> to vector<1x1x128xf32>
    %c0_103 = arith.constant 0 : index
    %c0_104 = arith.constant 0 : index
    %c0_105 = arith.constant 0 : index
    %97 = vector.load %arg7[%c0_103, %c0_104, %c0_105] : memref<1x2x128xf32, #tpu.memory_space<vmem>>, vector<1x1x128xf32>
    tpu.vector_store %arg7[%c0_103, %c0_104, %c0_105], %96 {strides = array<i32>} : memref<1x2x128xf32, #tpu.memory_space<vmem>>, vector<1x1x128xf32>,
    %98 = arith.mulf %90, %90 : vector<64x128xf32>
    %cst_106 = arith.constant dense<0.000000e+00> : vector<128xf32>
    %99 = vector.multi_reduction <add>, %98, %cst_106 [0] : vector<64x128xf32> to vector<128xf32>
    %100 = vector.shape_cast %99 : vector<128xf32> to vector<1x128xf32>
    %101 = vector.shape_cast %100 : vector<1x128xf32> to vector<1x1x128xf32>
    %c0_107 = arith.constant 0 : index
    %c1_108 = arith.constant 1 : index
    %c0_109 = arith.constant 0 : index
    %102 = vector.load %arg7[%c0_107, %c1_108, %c0_109] : memref<1x2x128xf32, #tpu.memory_space<vmem>>, vector<1x1x128xf32>
    tpu.vector_store %arg7[%c0_107, %c1_108, %c0_109], %101 {strides = array<i32>} : memref<1x2x128xf32, #tpu.memory_space<vmem>>, vector<1x1x128xf32>,
    return
  }
  func.func @transform_0(%arg0: i32) -> (i32, i32, i32) {
    %c0_i32 = arith.constant 0 : i32
    %c0_i32_0 = arith.constant 0 : i32
    %c0_i32_1 = arith.constant 0 : i32
    return %arg0, %c0_i32, %c0_i32_0 : i32, i32, i32
  }
  func.func @transform_1(%arg0: i32) -> (i32, i32, i32) {
    %c0_i32 = arith.constant 0 : i32
    %c0_i32_0 = arith.constant 0 : i32
    %c0_i32_1 = arith.constant 0 : i32
    %c0_i32_2 = arith.constant 0 : i32
    return %c0_i32, %c0_i32_0, %c0_i32_1 : i32, i32, i32
  }
  func.func @transform_2(%arg0: i32) -> (i32, i32) {
    %c0_i32 = arith.constant 0 : i32
    %c0_i32_0 = arith.constant 0 : i32
    %c0_i32_1 = arith.constant 0 : i32
    return %c0_i32, %c0_i32_0 : i32, i32
  }
  func.func @transform_3(%arg0: i32) -> (i32, i32) {
    %c0_i32 = arith.constant 0 : i32
    %c0_i32_0 = arith.constant 0 : i32
    %c0_i32_1 = arith.constant 0 : i32
    return %c0_i32, %c0_i32_0 : i32, i32
  }
  func.func @transform_4(%arg0: i32) -> (i32, i32, i32) {
    %c0_i32 = arith.constant 0 : i32
    %c0_i32_0 = arith.constant 0 : i32
    %c0_i32_1 = arith.constant 0 : i32
    %c0_i32_2 = arith.constant 0 : i32
    return %c0_i32, %c0_i32_0, %c0_i32_1 : i32, i32, i32
  }
  func.func @transform_5(%arg0: i32) -> (i32, i32, i32) {
    %c0_i32 = arith.constant 0 : i32
    %c0_i32_0 = arith.constant 0 : i32
    %c0_i32_1 = arith.constant 0 : i32
    return %arg0, %c0_i32, %c0_i32_0 : i32, i32, i32
  }
  func.func @transform_6(%arg0: i32) -> (i32, i32, i32) {
    %c0_i32 = arith.constant 0 : i32
    %c0_i32_0 = arith.constant 0 : i32
    %c0_i32_1 = arith.constant 0 : i32
    return %arg0, %c0_i32, %c0_i32_0 : i32, i32, i32
  }
}

module attributes {stable_mosaic.version = 11 : i64} {
  func.func @kernel(%arg0: i32, %arg1: memref<1x64x128xbf16, #tpu.memory_space<vmem>>, %arg2: memref<2x2x128xf32, #tpu.memory_space<vmem>>, %arg3: memref<1x128xf32, #tpu.memory_space<vmem>>, %arg4: memref<1x128xf32, #tpu.memory_space<vmem>>, %arg5: memref<1x64x128xbf16, #tpu.memory_space<vmem>>, %arg6: memref<2x4x128xf32, #tpu.memory_space<vmem>>, %arg7: memref<1x128xf32, #tpu.memory_space<vmem>>, %arg8: memref<1x128xf32, #tpu.memory_space<vmem>>, %arg9: memref<1x64x128xf32, #tpu.memory_space<vmem>>) attributes {dimension_semantics = [#tpu.dimension_semantics<parallel>], iteration_bounds = array<i64: 2>, scalar_prefetch = 0 : i64, scratch_operands = 0 : i64, tpu.core_type = #tpu.core_type<tc>, window_params = [{transform_indices = @transform_0, window_bounds = array<i64: 1, 64, 128>}, {pipeline_mode = #tpu.pipeline_mode<synchronous>, transform_indices = @transform_1, window_bounds = array<i64: 2, 2, 128>}, {pipeline_mode = #tpu.pipeline_mode<synchronous>, transform_indices = @transform_2, window_bounds = array<i64: 1, 128>}, {pipeline_mode = #tpu.pipeline_mode<synchronous>, transform_indices = @transform_3, window_bounds = array<i64: 1, 128>}, {transform_indices = @transform_4, window_bounds = array<i64: 1, 64, 128>}, {pipeline_mode = #tpu.pipeline_mode<synchronous>, transform_indices = @transform_5, window_bounds = array<i64: 2, 4, 128>}, {pipeline_mode = #tpu.pipeline_mode<synchronous>, transform_indices = @transform_6, window_bounds = array<i64: 1, 128>}, {pipeline_mode = #tpu.pipeline_mode<synchronous>, transform_indices = @transform_7, window_bounds = array<i64: 1, 128>}, {transform_indices = @transform_8, window_bounds = array<i64: 1, 64, 128>}]} {
    %c0 = arith.constant 0 : index
    %c0_0 = arith.constant 0 : index
    %c0_1 = arith.constant 0 : index
    %0 = vector.load %arg2[%c0, %c0_0, %c0_1] : memref<2x2x128xf32, #tpu.memory_space<vmem>>, vector<2x2x128xf32>
    %cst = arith.constant dense<0.000000e+00> : vector<2x128xf32>
    %1 = vector.multi_reduction <add>, %0, %cst [0] : vector<2x2x128xf32> to vector<2x128xf32>
    %2 = vector.extract_strided_slice %1 {offsets = [0, 0], sizes = [1, 128], strides = [1, 1]} : vector<2x128xf32> to vector<1x128xf32>
    %3 = vector.extract_strided_slice %1 {offsets = [1, 0], sizes = [1, 128], strides = [1, 1]} : vector<2x128xf32> to vector<1x128xf32>
    %c0_2 = arith.constant 0 : index
    %c0_3 = arith.constant 0 : index
    %4 = vector.load %arg3[%c0_2, %c0_3] : memref<1x128xf32, #tpu.memory_space<vmem>>, vector<1x128xf32>
    %c0_4 = arith.constant 0 : index
    %c0_5 = arith.constant 0 : index
    %5 = vector.load %arg4[%c0_4, %c0_5] : memref<1x128xf32, #tpu.memory_space<vmem>>, vector<1x128xf32>
    %cst_6 = arith.constant 7.812500e-03 : f32
    %6 = vector.broadcast %cst_6 : f32 to vector<1x128xf32>
    %7 = arith.mulf %2, %6 : vector<1x128xf32>
    %cst_7 = arith.constant 7.812500e-03 : f32
    %8 = vector.broadcast %cst_7 : f32 to vector<1x128xf32>
    %9 = arith.mulf %3, %8 : vector<1x128xf32>
    %10 = arith.mulf %7, %7 : vector<1x128xf32>
    %11 = arith.subf %9, %10 : vector<1x128xf32>
    %cst_8 = arith.constant 0.000000e+00 : f32
    %12 = vector.broadcast %cst_8 : f32 to vector<1x128xf32>
    %13 = arith.maximumf %11, %12 : vector<1x128xf32>
    %cst_9 = arith.constant 9.99999974E-6 : f32
    %14 = vector.broadcast %cst_9 : f32 to vector<1x128xf32>
    %15 = arith.addf %13, %14 : vector<1x128xf32>
    %16 = math.rsqrt %15 : vector<1x128xf32>
    %17 = arith.mulf %4, %16 : vector<1x128xf32>
    %18 = arith.mulf %7, %17 : vector<1x128xf32>
    %19 = arith.subf %5, %18 : vector<1x128xf32>
    %c0_10 = arith.constant 0 : index
    %c0_11 = arith.constant 0 : index
    %c0_12 = arith.constant 0 : index
    %20 = vector.load %arg1[%c0_10, %c0_11, %c0_12] : memref<1x64x128xbf16, #tpu.memory_space<vmem>>, vector<1x64x128xbf16>
    %21 = arith.extf %20 : vector<1x64x128xbf16> to vector<1x64x128xf32>
    %22 = vector.shape_cast %21 : vector<1x64x128xf32> to vector<64x128xf32>
    %23 = vector.broadcast %17 : vector<1x128xf32> to vector<64x128xf32>
    %24 = arith.mulf %22, %23 : vector<64x128xf32>
    %25 = vector.broadcast %19 : vector<1x128xf32> to vector<64x128xf32>
    %26 = arith.addf %24, %25 : vector<64x128xf32>
    %c0_13 = arith.constant 0 : index
    %c0_14 = arith.constant 0 : index
    %c0_15 = arith.constant 0 : index
    %27 = vector.load %arg6[%c0_13, %c0_14, %c0_15] : memref<2x4x128xf32, #tpu.memory_space<vmem>>, vector<2x4x128xf32>
    %cst_16 = arith.constant dense<0.000000e+00> : vector<4x128xf32>
    %28 = vector.multi_reduction <add>, %27, %cst_16 [0] : vector<2x4x128xf32> to vector<4x128xf32>
    %29 = vector.extract_strided_slice %28 {offsets = [2, 0], sizes = [1, 128], strides = [1, 1]} : vector<4x128xf32> to vector<1x128xf32>
    %30 = vector.extract_strided_slice %28 {offsets = [3, 0], sizes = [1, 128], strides = [1, 1]} : vector<4x128xf32> to vector<1x128xf32>
    %c0_17 = arith.constant 0 : index
    %c0_18 = arith.constant 0 : index
    %31 = vector.load %arg7[%c0_17, %c0_18] : memref<1x128xf32, #tpu.memory_space<vmem>>, vector<1x128xf32>
    %c0_19 = arith.constant 0 : index
    %c0_20 = arith.constant 0 : index
    %32 = vector.load %arg8[%c0_19, %c0_20] : memref<1x128xf32, #tpu.memory_space<vmem>>, vector<1x128xf32>
    %cst_21 = arith.constant 7.812500e-03 : f32
    %33 = vector.broadcast %cst_21 : f32 to vector<1x128xf32>
    %34 = arith.mulf %29, %33 : vector<1x128xf32>
    %cst_22 = arith.constant 7.812500e-03 : f32
    %35 = vector.broadcast %cst_22 : f32 to vector<1x128xf32>
    %36 = arith.mulf %30, %35 : vector<1x128xf32>
    %37 = arith.mulf %34, %34 : vector<1x128xf32>
    %38 = arith.subf %36, %37 : vector<1x128xf32>
    %cst_23 = arith.constant 0.000000e+00 : f32
    %39 = vector.broadcast %cst_23 : f32 to vector<1x128xf32>
    %40 = arith.maximumf %38, %39 : vector<1x128xf32>
    %cst_24 = arith.constant 9.99999974E-6 : f32
    %41 = vector.broadcast %cst_24 : f32 to vector<1x128xf32>
    %42 = arith.addf %40, %41 : vector<1x128xf32>
    %43 = math.rsqrt %42 : vector<1x128xf32>
    %44 = arith.mulf %31, %43 : vector<1x128xf32>
    %45 = arith.mulf %34, %44 : vector<1x128xf32>
    %46 = arith.subf %32, %45 : vector<1x128xf32>
    %c0_25 = arith.constant 0 : index
    %c0_26 = arith.constant 0 : index
    %c0_27 = arith.constant 0 : index
    %47 = vector.load %arg5[%c0_25, %c0_26, %c0_27] : memref<1x64x128xbf16, #tpu.memory_space<vmem>>, vector<1x64x128xbf16>
    %48 = arith.extf %47 : vector<1x64x128xbf16> to vector<1x64x128xf32>
    %49 = vector.shape_cast %48 : vector<1x64x128xf32> to vector<64x128xf32>
    %50 = vector.broadcast %44 : vector<1x128xf32> to vector<64x128xf32>
    %51 = arith.mulf %49, %50 : vector<64x128xf32>
    %52 = vector.broadcast %46 : vector<1x128xf32> to vector<64x128xf32>
    %53 = arith.addf %51, %52 : vector<64x128xf32>
    %54 = arith.addf %26, %53 : vector<64x128xf32>
    %cst_28 = arith.constant 0.000000e+00 : f32
    %55 = vector.broadcast %cst_28 : f32 to vector<64x128xf32>
    %56 = arith.maximumf %54, %55 : vector<64x128xf32>
    %57 = vector.shape_cast %56 : vector<64x128xf32> to vector<1x64x128xf32>
    %c0_29 = arith.constant 0 : index
    %c0_30 = arith.constant 0 : index
    %c0_31 = arith.constant 0 : index
    %58 = vector.load %arg9[%c0_29, %c0_30, %c0_31] : memref<1x64x128xf32, #tpu.memory_space<vmem>>, vector<1x64x128xf32>
    tpu.vector_store %arg9[%c0_29, %c0_30, %c0_31], %57 {strides = array<i32>} : memref<1x64x128xf32, #tpu.memory_space<vmem>>, vector<1x64x128xf32>,
    return
  }
  func.func @transform_0(%arg0: i32) -> (i32, i32, i32) {
    %c0_i32 = arith.constant 0 : i32
    %c0_i32_0 = arith.constant 0 : i32
    %c0_i32_1 = arith.constant 0 : i32
    return %arg0, %c0_i32, %c0_i32_0 : i32, i32, i32
  }
  func.func @transform_1(%arg0: i32) -> (i32, i32, i32) {
    %c0_i32 = arith.constant 0 : i32
    %c0_i32_0 = arith.constant 0 : i32
    %c0_i32_1 = arith.constant 0 : i32
    %c0_i32_2 = arith.constant 0 : i32
    return %c0_i32, %c0_i32_0, %c0_i32_1 : i32, i32, i32
  }
  func.func @transform_2(%arg0: i32) -> (i32, i32) {
    %c0_i32 = arith.constant 0 : i32
    %c0_i32_0 = arith.constant 0 : i32
    %c0_i32_1 = arith.constant 0 : i32
    return %c0_i32, %c0_i32_0 : i32, i32
  }
  func.func @transform_3(%arg0: i32) -> (i32, i32) {
    %c0_i32 = arith.constant 0 : i32
    %c0_i32_0 = arith.constant 0 : i32
    %c0_i32_1 = arith.constant 0 : i32
    return %c0_i32, %c0_i32_0 : i32, i32
  }
  func.func @transform_4(%arg0: i32) -> (i32, i32, i32) {
    %c0_i32 = arith.constant 0 : i32
    %c0_i32_0 = arith.constant 0 : i32
    %c0_i32_1 = arith.constant 0 : i32
    return %arg0, %c0_i32, %c0_i32_0 : i32, i32, i32
  }
  func.func @transform_5(%arg0: i32) -> (i32, i32, i32) {
    %c0_i32 = arith.constant 0 : i32
    %c0_i32_0 = arith.constant 0 : i32
    %c0_i32_1 = arith.constant 0 : i32
    %c0_i32_2 = arith.constant 0 : i32
    return %c0_i32, %c0_i32_0, %c0_i32_1 : i32, i32, i32
  }
  func.func @transform_6(%arg0: i32) -> (i32, i32) {
    %c0_i32 = arith.constant 0 : i32
    %c0_i32_0 = arith.constant 0 : i32
    %c0_i32_1 = arith.constant 0 : i32
    return %c0_i32, %c0_i32_0 : i32, i32
  }
  func.func @transform_7(%arg0: i32) -> (i32, i32) {
    %c0_i32 = arith.constant 0 : i32
    %c0_i32_0 = arith.constant 0 : i32
    %c0_i32_1 = arith.constant 0 : i32
    return %c0_i32, %c0_i32_0 : i32, i32
  }
  func.func @transform_8(%arg0: i32) -> (i32, i32, i32) {
    %c0_i32 = arith.constant 0 : i32
    %c0_i32_0 = arith.constant 0 : i32
    %c0_i32_1 = arith.constant 0 : i32
    return %arg0, %c0_i32, %c0_i32_0 : i32, i32, i32
  }
}

</mosaic_0001>

<bundles_post_ra>
// kernel: basic_block_forward.5
= control target key start
LH: loop header
LB: loop body
LE: loop exit
PB: predicated region body
PF: predicated region fallthrough
CT: control target
= control target key end

     0   :  { %s685_s27 = smov 0   ;;  %s737_s0 = inlined_call_operand.vmem [shape: bf16[2,64,128], index: 0, kind: input, shape index: {}]   ;;  %s738_s1 = inlined_call_operand.vmem [shape: f32[2,2,128], index: 1, kind: input, shape index: {}]   ;;  %s739_s2 = inlined_call_operand.vmem [shape: f32[1,128], index: 2, kind: input, shape index: {}]   ;;  %s740_s3 = inlined_call_operand.vmem [shape: f32[1,128], index: 3, kind: input, shape index: {}]   ;;  %s741_s4 = inlined_call_operand.vmem [shape: bf16[2,64,128], index: 4, kind: input, shape index: {}]   ;;  %s742_s5 = inlined_call_operand.vmem [shape: f32[2,4,128], index: 5, kind: input, shape index: {}]   ;;  %s743_s6 = inlined_call_operand.vmem [shape: f32[1,128], index: 6, kind: input, shape index: {}]   ;;  %s744_s7 = inlined_call_operand.vmem [shape: f32[1,128], index: 7, kind: input, shape index: {}]   ;;  %s745_s8 = inlined_call_operand.vmem [shape: f32[2,64,128], index: 8, kind: output, shape index: {}]  }
   0x1 LB: > { %s566_s28 = sadd.s32 4294967295, %s638_s27   ;;  %p570_p0 = scmp.ge.s32.totalorder %s638_s27, 1  ;;  %s638_s27 = sphi %s685_s27, %s18_s27  }
   0x2   : > { %p272_p1 = scmp.lt.s32.totalorder %s638_s27, 3 }
   0x4   : > { %p273_p2 = pnand %p570_p0, %p272_p1 }
   0x5   : > { %p311_p3 = scmp.lt.s32.totalorder (!%p273_p2), %s566_s28, 1 }
   0x6   : > { %276 = sbr.rel (%p273_p2) target bundleno = 93 (0x5d), region = 52 }
   0xb   : > { %v326_v0 = vld [vmem:[%s738_s1] sm:$0x3]  ;;  %v327_v1 = vld [vmem:[%s738_s1 + $0x2] sm:$0x3]  ;;  %vm328_vm0 = vcmask 1041408   ;;  %vm400_vm1 = vcmask 1043456  }
   0xc   : > { %v329_v2 = vsel %vm328_vm0, %v326_v0, 0.0  ;;  %v330_v3 = vsel %vm328_vm0, %v327_v1, 0.0  ;;  %v398_v4 = vld [vmem:[%s742_s5] sm:$0xf]  ;;  %v399_v5 = vld [vmem:[%s742_s5 + $0x4] sm:$0xf] }
   0xd   : > { %v331_v6 = vadd.f32 %v330_v3, %v329_v2  ;;  %v401_v7 = vsel %vm400_vm1, %v398_v4, 0.0  ;;  %v402_v8 = vsel %vm400_vm1, %v399_v5, 0.0  ;;  %v332_v37 = vld [vmem:[%s739_s2] sm:$0x1]  ;;  %s747_s28 = smov (!%p311_p3, %s566_s28), 1 }
   0xe   : > { %v403_v9 = vadd.f32 %v402_v8, %v401_v7  ;;  %v404_v39 = vld [vmem:[%s743_s6] sm:$0x1]  ;;  %s579_s19 = sshll.u32 %s747_s28, 5  ;;  %s581_s10 = sshll.u32 %s747_s28, 6 }
   0xf   : > { %v334_v10 = vmul.f32 0.0078125, %v331_v6  ;;  %s315_s22 = scalar_lea.vmem %s737_s0, %s579_s19  ;;  %v333_v43 = vld [vmem:[%s740_s3] sm:$0x1]  ;;  %s320_s29 = scalar_lea.vmem %s741_s4, %s579_s19 }
  0x10   : > { %v406_v11 = vmul.f32 0.0078125, %v403_v9  ;;  %v583_v46 = vld [vmem:[%s315_s22] sm:$0xff]   ;;  %v614_v48 = vld [vmem:[%s315_s22 + $0x8] sm:$0xff]   ;;  %v615_v49 = vld [vmem:[%s315_s22 + $0x10] sm:$0xff]   ;;  %s325_s13 = scalar_lea.vmem %s745_s8, %s581_s10 }
  0x11   : > { %v335_v12 = vmul.f32 %v334_v10, %v334_v10  ;;  %v599_v50 = vld [vmem:[%s320_s29] sm:$0xff]   ;;  %v616_v51 = vld [vmem:[%s315_s22 + $0x18] sm:$0xff]   ;;  %v584_v53 = vunpack.c.l.bf16 %v583_v46  ;;  %v585_v54 = vunpack.c.h.bf16 %v583_v46  ;;  %v617_v55 = vld [vmem:[%s320_s29 + $0x8] sm:$0xff]   ;;  %v588_v57 = vunpack.c.l.bf16 %v614_v48 }
  0x12   : > { %v407_v13 = vmul.f32 %v406_v11, %v406_v11  ;;  %v618_v56 = vld [vmem:[%s320_s29 + $0x10] sm:$0xff]   ;;  %v589_v58 = vunpack.c.h.bf16 %v614_v48  ;;  %v592_v59 = vunpack.c.l.bf16 %v615_v49  ;;  %v593_v60 = vunpack.c.h.bf16 %v615_v49  ;;  %v619_v61 = vld [vmem:[%s320_s29 + $0x18] sm:$0xff]   ;;  %v405_v6 = vld [vmem:[%s744_s7] sm:$0x1] }
  0x13   : > { %v337_v14 = vrot.slane %v335_v12, 7  ;;  %v600_v63 = vunpack.c.l.bf16 %v599_v50  ;;  %v596_v0 = vunpack.c.l.bf16 %v616_v51  ;;  %v597_v1 = vunpack.c.h.bf16 %v616_v51 }
  0x14   : > { %v409_v15 = vrot.slane %v407_v13, 7  ;;  %v601_v2 = vunpack.c.h.bf16 %v599_v50  ;;  %v604_v3 = vunpack.c.l.bf16 %v617_v55  ;;  %v605_v4 = vunpack.c.h.bf16 %v617_v55 }
  0x15   : > { %v339_v16 = vsub.f32 %v334_v10, %v337_v14  ;;  %v608_v5 = vunpack.c.l.bf16 %v618_v56  ;;  %v609_v8 = vunpack.c.h.bf16 %v618_v56  ;;  %v612_v9 = vunpack.c.l.bf16 %v619_v61 }
  0x16   : > { %v411_v17 = vsub.f32 %v406_v11, %v409_v15 }
  0x17   : > { %v340_v18 = vmax.f32 %v339_v16, 0.0 }
  0x18   : > { %v412_v19 = vmax.f32 %v411_v17, 0.0 }
  0x19   : > { %v341_v20 = vadd.f32 1e-05, %v340_v18 }
  0x1a   : > { %v413_v21 = vadd.f32 1e-05, %v412_v19 }
  0x1b   : > { %628 = vrsqrt.f32 %v341_v20  ;;  %vm348_vm2 = vweird.f32 %v341_v20 }
  0x1c   : > { %630 = vrsqrt.f32 %v413_v21  ;;  %vm420_vm5 = vweird.f32 %v413_v21 }
  0x21   : > { %v629_v22 = vpop.eup %628 }
  0x22   : > { %v631_v23 = vpop.eup %630  ;;  %v343_v24 = vmul.f32 %v629_v22, %v341_v20  ;;  %vm349_vm3 = vweird.f32 %v629_v22 }
  0x23   : > { %v415_v25 = vmul.f32 %v631_v23, %v413_v21  ;;  %vm350_vm4 = vmor %vm348_vm2, %vm349_vm3  ;;  %vm421_vm6 = vweird.f32 %v631_v23 }
  0x24   : > { %v344_v26 = vmul.f32 %v629_v22, %v343_v24  ;;  %vm422_vm7 = vmor %vm420_vm5, %vm421_vm6 }
  0x25   : > { %v416_v27 = vmul.f32 %v631_v23, %v415_v25 }
  0x26   : > { %v345_v28 = vmul.f32 0.5, %v344_v26 }
  0x27   : > { %v417_v29 = vmul.f32 0.5, %v416_v27 }
  0x28   : > { %v346_v30 = vsub.f32 1.5, %v345_v28 }
  0x29   : > { %v418_v32 = vsub.f32 1.5, %v417_v29 }
  0x2a   : > { %v347_v31 = vmul.f32 %v629_v22, %v346_v30 }
  0x2b   : > { %v419_v34 = vmul.f32 %v631_v23, %v418_v32 }
  0x2c   : > { %v351_v33 = vsel %vm350_vm4, %v629_v22, %v347_v31 }
  0x2d   : > { %353 = vst [vmem:[#allocation1] sm:$0xff] %v351_v33  ;;  %v423_v35 = vsel %vm422_vm7, %v631_v23, %v419_v34 }
  0x34   : > { %v355_v36 = vld [vmem:[#allocation1 + $0x1] ss:$9 sm:$0xff] }
  0x35   : > { %425 = vst [vmem:[#allocation1] sm:$0xff] %v423_v35  ;;  %v357_v38 = vmul.f32 %v355_v36, %v332_v37 }
  0x37   : > { %v358_v42 = vmul.f32 %v357_v38, %v334_v10  ;;  %v377_v52 = vperm.slane %v357_v38, 0  ;;  %v613_v10 = vunpack.c.h.bf16 %v619_v61 }
  0x39   : > { %v359_v47 = vsub.f32 %v333_v43, %v358_v42  ;;  %v379_v7 = vmul.f32 %v584_v53, %v377_v52  ;;  %v381_v12 = vmul.f32 %v588_v57, %v377_v52  ;;  %v382_v13 = vmul.f32 %v589_v58, %v377_v52 }
  0x3a   : > { %v383_v14 = vmul.f32 %v592_v59, %v377_v52  ;;  %v384_v17 = vmul.f32 %v593_v60, %v377_v52  ;;  %v385_v18 = vmul.f32 %v596_v0, %v377_v52  ;;  %v386_v19 = vmul.f32 %v597_v1, %v377_v52 }
  0x3b   : > { %v388_v62 = vperm.slane %v359_v47, 0 }
  0x3c   : > { %v427_v40 = vld [vmem:[#allocation1 + $0x3] ss:$9 sm:$0xff] }
  0x3d   : > { %v429_v41 = vmul.f32 %v427_v40, %v404_v39  ;;  %v390_v16 = vadd.f32 %v388_v62, %v379_v7  ;;  %v392_v22 = vadd.f32 %v388_v62, %v381_v12  ;;  %v393_v23 = vadd.f32 %v388_v62, %v382_v13 }
  0x3e   : > { %v394_v25 = vadd.f32 %v388_v62, %v383_v14  ;;  %v395_v26 = vadd.f32 %v388_v62, %v384_v17  ;;  %v396_v27 = vadd.f32 %v388_v62, %v385_v18 }
  0x3f   : > { %v431_v44 = vperm.slane %v429_v41, 0 }
  0x41   : > { %v433_v45 = vmul.f32 %v431_v44, %v406_v11  ;;  %v380_v11 = vmul.f32 %v585_v54, %v377_v52  ;;  %v456_v24 = vmul.f32 %v600_v63, %v431_v44  ;;  %v457_v29 = vmul.f32 %v601_v2, %v431_v44 }
  0x42   : > { %v458_v30 = vmul.f32 %v604_v3, %v431_v44  ;;  %v459_v31 = vmul.f32 %v605_v4, %v431_v44  ;;  %v460_v32 = vmul.f32 %v608_v5, %v431_v44  ;;  %v461_v33 = vmul.f32 %v609_v8, %v431_v44 }
  0x43   : > { %435 = vst [vmem:[#allocation1] sm:$0xff] %v433_v45  ;;  %v391_v21 = vadd.f32 %v388_v62, %v380_v11  ;;  %v462_v34 = vmul.f32 %v612_v9, %v431_v44  ;;  %v463_v35 = vmul.f32 %v613_v10, %v431_v44  ;;  %v397_v44 = vadd.f32 %v388_v62, %v386_v19 }
  0x4a   : > { %v437_v15 = vld [vmem:[#allocation1 + $0x2] ss:$9 sm:$0xff] }
  0x4b   : > { %v439_v20 = vsub.f32 %v405_v6, %v437_v15 }
  0x4d   : > { %v465_v28 = vperm.slane %v439_v20, 0 }
  0x4f   : > { %v467_v36 = vadd.f32 %v465_v28, %v456_v24  ;;  %v468_v37 = vadd.f32 %v465_v28, %v457_v29  ;;  %v469_v38 = vadd.f32 %v465_v28, %v458_v30  ;;  %v470_v39 = vadd.f32 %v465_v28, %v459_v31 }
  0x50   : > { %v471_v40 = vadd.f32 %v465_v28, %v460_v32  ;;  %v472_v41 = vadd.f32 %v465_v28, %v461_v33  ;;  %v473_v42 = vadd.f32 %v465_v28, %v462_v34  ;;  %v474_v43 = vadd.f32 %v465_v28, %v463_v35 }
  0x51   : > { %v475_v45 = vadd.f32 %v467_v36, %v390_v16  ;;  %v476_v46 = vadd.f32 %v468_v37, %v391_v21  ;;  %v477_v47 = vadd.f32 %v469_v38, %v392_v22  ;;  %v478_v48 = vadd.f32 %v470_v39, %v393_v23 }
  0x52   : > { %v479_v49 = vadd.f32 %v471_v40, %v394_v25  ;;  %v480_v50 = vadd.f32 %v472_v41, %v395_v26  ;;  %v481_v54 = vadd.f32 %v473_v42, %v396_v27  ;;  %v482_v56 = vadd.f32 %v474_v43, %v397_v44 }
  0x53   : > { %v483_v51 = vmax.f32 %v475_v45, 0.0  ;;  %v484_v52 = vmax.f32 %v476_v46, 0.0  ;;  %v485_v53 = vmax.f32 %v477_v47, 0.0  ;;  %v486_v55 = vmax.f32 %v478_v48, 0.0 }
  0x54   : > { %v487_v57 = vmax.f32 %v479_v49, 0.0  ;;  %v488_v58 = vmax.f32 %v480_v50, 0.0  ;;  %v489_v59 = vmax.f32 %v481_v54, 0.0  ;;  %v490_v60 = vmax.f32 %v482_v56, 0.0 }
  0x55   : > { %491 = vst [vmem:[%s325_s13] sm:$0xff] %v483_v51 }
  0x56   : > { %492 = vst [vmem:[%s325_s13 + $0x8] sm:$0xff] %v484_v52 }
  0x57   : > { %493 = vst [vmem:[%s325_s13 + $0x10] sm:$0xff] %v485_v53 }
  0x58   : > { %494 = vst [vmem:[%s325_s13 + $0x18] sm:$0xff] %v486_v55 }
  0x59   : > { %495 = vst [vmem:[%s325_s13 + $0x20] sm:$0xff] %v487_v57 }
  0x5a   : > { %496 = vst [vmem:[%s325_s13 + $0x28] sm:$0xff] %v488_v58 }
  0x5b   : > { %497 = vst [vmem:[%s325_s13 + $0x30] sm:$0xff] %v489_v59 }
  0x5c   : > { %498 = vst [vmem:[%s325_s13 + $0x38] sm:$0xff] %v490_v60 }
  0x5d PF: > { %s18_s27 = sadd.s32 1, %s638_s27  }
  0x5e   : > { %p15_p4 = scmp.ge.s32.totalorder %s18_s27, 4  }
  0x60   :  { %17 = sbr.rel (!%p15_p4) target bundleno = 1 (0x1), region = 88 }

// kernel: basic_block_forward.3
= control target key start
LH: loop header
LB: loop body
LE: loop exit
PB: predicated region body
PF: predicated region fallthrough
CT: control target
= control target key end

     0   :  { %s2949_s18 = smov 0   ;;  %s3422_s0 = inlined_call_operand.vmem [shape: bf16[2,9,9,512], index: 0, kind: input, shape index: {}]   ;;  %s3423_s1 = inlined_call_operand.vmem [shape: bf16[9,128,128], index: 1, kind: input, shape index: {}]   ;;  %s3424_s2 = inlined_call_operand.vmem [shape: bf16[128,128], index: 2, kind: input, shape index: {}]   ;;  %s3425_s3 = inlined_call_operand.vmem [shape: bf16[2,64,128], index: 3, kind: output, shape index: {0}]   ;;  %s3426_s4 = inlined_call_operand.vmem [shape: bf16[2,64,128], index: 4, kind: output, shape index: {1}]   ;;  %s3427_s5 = inlined_call_operand.vmem [shape: f32[2,4,128], index: 5, kind: output, shape index: {2}]  }
   0x1 LB: > { %s2125_s19 = sadd.s32 4294967295, %s2917_s18   ;;  %p2129_p0 = scmp.ge.s32.totalorder %s2917_s18, 1  ;;  %s2917_s18 = sphi %s2949_s18, %s16_s18  }
   0x2   : > { %p192_p1 = scmp.lt.s32.totalorder %s2917_s18, 3 }
   0x4   : > { %p193_p2 = pnand %p2129_p0, %p192_p1 }
   0x5   : > { %p229_p3 = scmp.lt.s32.totalorder (!%p193_p2), %s2125_s19, 1 }
   0x6   : > { %196 = sbr.rel (%p193_p2) target bundleno = 352 (0x160), region = 32 }
   0xb   : > { %v2755_v0 = vld [vmem:[%s3423_s1 + $0x78] sm:$0xff]  ;;  %v2754_v2 = vld [vmem:[%s3423_s1 + $0x70] sm:$0xff]  ;;  %v2753_v4 = vld [vmem:[%s3423_s1 + $0x68] sm:$0xff]  ;;  %s3431_s19 = smov (!%p229_p3, %s2125_s19), 1  ;;  %vm515_vm0 = vsmask.f32 3328 }
   0xc   : > { %v2743_v1 = vld [vmem:[%s3423_s1 + $0x38] sm:$0xff]  ;;  %2886 = vmatpush.bf16.msra.mxu2 %v2755_v0  ;;  %v2742_v3 = vld [vmem:[%s3423_s1 + $0x30] sm:$0xff]  ;;  %369 = vmatpush.bf16.msra.mxu0 %v2755_v0  ;;  %v2741_v5 = vld [vmem:[%s3423_s1 + $0x28] sm:$0xff]  ;;  %s2902_s21 = smul.u32 288, %s3431_s19  ;;  %vm516_vm1 = vsmask.f32 7440 }
   0xd   : > { %470 = vmatpush.bf16.msra.mxu1 %v2743_v1  ;;  %2894 = vmatpush.bf16.msra.mxu3 %v2743_v1  ;;  %v2752_v6 = vld [vmem:[%s3423_s1 + $0x60] sm:$0xff]  ;;  %v2751_v8 = vld [vmem:[%s3423_s1 + $0x58] sm:$0xff]  ;;  %v2750_v10 = vld [vmem:[%s3423_s1 + $0x50] sm:$0xff]  ;;  %s2135_s10 = sshll.u32 %s3431_s19, 2 }
   0xe   : > { %v2740_v7 = vld [vmem:[%s3423_s1 + $0x20] sm:$0xff]  ;;  %v2739_v9 = vld [vmem:[%s3423_s1 + $0x18] sm:$0xff]  ;;  %v2738_v11 = vld [vmem:[%s3423_s1 + $0x10] sm:$0xff]  ;;  %s3009_s28 = scalar_lea.vmem %s3422_s0, %s2902_s21  ;;  %s247_s13 = scalar_lea.vmem %s3427_s5, %s2135_s10 }
   0xf   : > { %v2749_v12 = vld [vmem:[%s3423_s1 + $0x48] sm:$0xff]  ;;  %v2748_v14 = vld [vmem:[%s3423_s1 + $0x40] sm:$0xff]  ;;  %v2763_v22 = vld [vmem:[%s3423_s1 + $0xb8] sm:$0xff] }
  0x10   : > { %2887 = vmatpush.bf16.msra.mxu2 %v2754_v2  ;;  %370 = vmatpush.bf16.msra.mxu0 %v2754_v2  ;;  %v2737_v13 = vld [vmem:[%s3423_s1 + $0x8] sm:$0xff]  ;;  %v2736_v15 = vld [vmem:[%s3423_s1] sm:$0xff]  ;;  %v2775_v23 = vld [vmem:[%s3423_s1 + $0xf8] sm:$0xff] }
  0x11   : > { %471 = vmatpush.bf16.msra.mxu1 %v2742_v3  ;;  %2895 = vmatpush.bf16.msra.mxu3 %v2742_v3  ;;  %v2162_v16 = vld [vmem:[%s3009_s28 + $0x84] sm:$0xf]  ;;  %v2202_v18 = vld [vmem:[%s3009_s28] sm:$0xf]  ;;  %v2795_v29 = vld [vmem:[%s3423_s1 + $0x178] sm:$0xff] }
  0x12   : > { %v2746_v17 = vld [vmem:[%s3009_s28 + $0xa0] sm:$0xf0]  ;;  %v2732_v19 = vld [vmem:[%s3009_s28 + $0x1c] sm:$0xf0]  ;;  %v2787_v31 = vld [vmem:[%s3423_s1 + $0x138] sm:$0xff] }
  0x13   : > { %v2210_v20 = vld [vmem:[%s3009_s28 + $0x80] sm:$0xf]  ;;  %v2154_v24 = vld [vmem:[%s3009_s28 + $0x4] sm:$0xf]  ;;  %v2163_v26 = vor.u32 %v2746_v17, %v2162_v16  ;;  %v2203_v27 = vor.u32 %v2732_v19, %v2202_v18  ;;  %v2762_v32 = vld [vmem:[%s3423_s1 + $0xb0] sm:$0xff] }
  0x14   : > { %2888 = vmatpush.bf16.msra.mxu2 %v2753_v4  ;;  %371 = vmatpush.bf16.msra.mxu0 %v2753_v4  ;;  %v2734_v21 = vld [vmem:[%s3009_s28 + $0x9c] sm:$0xf0]  ;;  %v2744_v25 = vld [vmem:[%s3009_s28 + $0x20] sm:$0xf0]  ;;  %v2774_v35 = vld [vmem:[%s3423_s1 + $0xf0] sm:$0xff] }
  0x15   : > { %472 = vmatpush.bf16.msra.mxu1 %v2741_v5  ;;  %2896 = vmatpush.bf16.msra.mxu3 %v2741_v5  ;;  %v2211_v28 = vor.u32 %v2734_v21, %v2210_v20  ;;  %v2155_v30 = vor.u32 %v2744_v25, %v2154_v24  ;;  %v499_v33 = vld [vmem:[%s3009_s28] sm:$0xf]  ;;  %v1016_v36 = vld [vmem:[%s3009_s28 + $0x8] sm:$0xf]  ;;  %v2794_v38 = vld [vmem:[%s3423_s1 + $0x170] sm:$0xff] }
  0x16   : > { %v501_v34 = vld [vmem:[%s3009_s28 + $0x20] sm:$0xf]  ;;  %v1018_v37 = vld [vmem:[%s3009_s28 + $0x28] sm:$0xf]  ;;  %v519_v39 = vshrl.u32 %v499_v33, 16  ;;  %v522_v40 = vshll.u32 %v499_v33, 16  ;;  %vm3105_vm2 = vmor %vm515_vm0, %vm516_vm1 }
  0x17   : > { %v533_v41 = vshrl.u32 %v501_v34, 16  ;;  %v536_v42 = vshll.u32 %v501_v34, 16  ;;  %v2786_v43 = vld [vmem:[%s3423_s1 + $0x130] sm:$0xff]  ;;  %v2761_v44 = vld [vmem:[%s3423_s1 + $0xa8] sm:$0xff]  ;;  %v1033_v45 = vshrl.u32 %v1016_v36, 16  ;;  %v1036_v46 = vshll.u32 %v1016_v36, 16 }
  0x18   : > { %2889 = vmatpush.bf16.msra.mxu2 %v2752_v6  ;;  %372 = vmatpush.bf16.msra.mxu0 %v2752_v6  ;;  %v1047_v47 = vshrl.u32 %v1018_v37, 16  ;;  %v1050_v48 = vshll.u32 %v1018_v37, 16  ;;  %v2773_v49 = vld [vmem:[%s3423_s1 + $0xe8] sm:$0xff]  ;;  %v2760_v52 = vld [vmem:[%s3423_s1 + $0xa0] sm:$0xff]  ;;  %v500_v54 = vld [vmem:[%s3009_s28 + $0x10] sm:$0x1] }
  0x19   : > { %473 = vmatpush.bf16.msra.mxu1 %v2740_v7  ;;  %2897 = vmatpush.bf16.msra.mxu3 %v2740_v7  ;;  %v2793_v50 = vld [vmem:[%s3423_s1 + $0x168] sm:$0xff]  ;;  %v2772_v53 = vld [vmem:[%s3423_s1 + $0xe0] sm:$0xff]  ;;  %v521_v55 = vrot.slane %v519_v39, 4  ;;  %v524_v56 = vrot.slane %v522_v40, 5  ;;  %v535_v57 = vrot.slane %v533_v41, 4  ;;  %v538_v58 = vrot.slane %v536_v42, 5 }
  0x1a   : > { %v2785_v51 = vld [vmem:[%s3423_s1 + $0x128] sm:$0xff]  ;;  %v2792_v59 = vld [vmem:[%s3423_s1 + $0x160] sm:$0xff]  ;;  %v502_v62 = vld [vmem:[%s3009_s28 + $0x30] sm:$0x1]  ;;  %v1035_v63 = vrot.slane %v1033_v45, 4  ;;  %v1038_v0 = vrot.slane %v1036_v46, 5 }
  0x1b   : > { %v2166_v60 = vld [vmem:[%s3009_s28 + $0xc4] sm:$0xf]  ;;  %v1049_v1 = vrot.slane %v1047_v47, 4  ;;  %v1052_v2 = vrot.slane %v1050_v48, 5  ;;  %v2206_v3 = vld [vmem:[%s3009_s28 + $0x40] sm:$0xf] }
  0x1c   : > { %2890 = vmatpush.bf16.msra.mxu2 %v2751_v8  ;;  %373 = vmatpush.bf16.msra.mxu0 %v2751_v8  ;;  %v2747_v61 = vld [vmem:[%s3009_s28 + $0xe0] sm:$0xf0]  ;;  %v1017_v4 = vld [vmem:[%s3009_s28 + $0x18] sm:$0x1]  ;;  %v2733_v6 = vld [vmem:[%s3009_s28 + $0x5c] sm:$0xf0]  ;;  %v1039_v17 = vor.u32 %v1038_v0, %v1035_v63 }
  0x1d   : > { %474 = vmatpush.bf16.msra.mxu1 %v2739_v9  ;;  %2898 = vmatpush.bf16.msra.mxu3 %v2739_v9  ;;  %v1019_v5 = vld [vmem:[%s3009_s28 + $0x38] sm:$0x1]  ;;  %v2214_v7 = vld [vmem:[%s3009_s28 + $0xc0] sm:$0xf]  ;;  %v2158_v9 = vld [vmem:[%s3009_s28 + $0x44] sm:$0xf]  ;;  %v1053_v19 = vor.u32 %v1052_v2, %v1049_v1  ;;  %v2167_v21 = vor.u32 %v2747_v61, %v2166_v60 }
  0x1e   : > { %v2735_v8 = vld [vmem:[%s3009_s28 + $0xdc] sm:$0xf0]  ;;  %v2759_v16 = vld [vmem:[%s3423_s1 + $0x98] sm:$0xff]  ;;  %v1042_v18 = vshll.u32 %v1017_v4, 16  ;;  %v1056_v20 = vshll.u32 %v1019_v5, 16  ;;  %v1040_v34 = vrot.slane %v1039_v17, 4 }
  0x1f   : > { %v2791_v24 = vld [vmem:[%s3423_s1 + $0x158] sm:$0xff]  ;;  %v1054_v36 = vrot.slane %v1053_v19, 4  ;;  %v503_v39 = vld [vmem:[%s3009_s28 + $0x40] sm:$0xf]  ;;  %v2770_v41 = vld [vmem:[%s3423_s1 + $0xd0] sm:$0xff] }
  0x20   : > { %2891 = vmatpush.bf16.msra.mxu2 %v2750_v10  ;;  %374 = vmatpush.bf16.msra.mxu0 %v2750_v10  ;;  %v2745_v10 = vld [vmem:[%s3009_s28 + $0x60] sm:$0xf0]  ;;  %v1058_v37 = vrot.slane %v1056_v20, 5  ;;  %v505_v40 = vld [vmem:[%s3009_s28 + $0x60] sm:$0xf]  ;;  %v2782_v45 = vld [vmem:[%s3423_s1 + $0x110] sm:$0xff] }
  0x21   : > { %475 = vmatpush.bf16.msra.mxu1 %v2738_v11  ;;  %2899 = vmatpush.bf16.msra.mxu3 %v2738_v11  ;;  %v525_v11 = vor.u32 %v524_v56, %v521_v55  ;;  %v2159_v25 = vor.u32 %v2745_v10, %v2158_v9  ;;  %v2757_v46 = vld [vmem:[%s3423_s1 + $0x88] sm:$0xff]  ;;  %v2756_v61 = vld [vmem:[%s3423_s1 + $0x80] sm:$0xff]  ;;  %v2807_v5 = vld [vmem:[%s3423_s1 + $0x1b8] sm:$0xff] }
  0x22   : > { %v2789_v55 = vld [vmem:[%s3423_s1 + $0x148] sm:$0xff]  ;;  %v2788_v63 = vld [vmem:[%s3423_s1 + $0x140] sm:$0xff]  ;;  %v2839_v19 = vld [vmem:[%s3424_s2 + $0x38] sm:$0xff] }
  0x23   : > { %v2781_v60 = vld [vmem:[%s3423_s1 + $0x108] sm:$0xff]  ;;  %v1023_v20 = vld [vmem:[%s3009_s28 + $0x78] sm:$0x1] }
  0x24   : > { %2892 = vmatpush.bf16.msra.mxu2 %v2749_v12  ;;  %375 = vmatpush.bf16.msra.mxu0 %v2749_v12  ;;  %v528_v12 = vshll.u32 %v500_v54, 16  ;;  %v2769_v54 = vld [vmem:[%s3423_s1 + $0xc8] sm:$0xff] }
  0x25   : > { %476 = vmatpush.bf16.msra.mxu1 %v2737_v13  ;;  %2900 = vmatpush.bf16.msra.mxu3 %v2737_v13  ;;  %v539_v13 = vor.u32 %v538_v58, %v535_v57  ;;  %v2764_v2 = vld [vmem:[%s3009_s28 + $0x24] sm:$0xf0] }
  0x28   : > { %2893 = vmatpush.bf16.msra.mxu2 %v2748_v14  ;;  %376 = vmatpush.bf16.msra.mxu0 %v2748_v14  ;;  %v542_v14 = vshll.u32 %v502_v62, 16  ;;  %v3146_v62 = vld [vmem:[%s3009_s28 + $0x8] sm:$0xf] }
  0x29   : > { %477 = vmatpush.bf16.msra.mxu1 %v2736_v15  ;;  %2901 = vmatpush.bf16.msra.mxu3 %v2736_v15  ;;  %v2784_v15 = vld [vmem:[%s3423_s1 + $0x120] sm:$0xff] }
  0x2b   : > { %387 = vmatmul.bf16.vlgmr.msra.gmra.mxu2 %v2163_v26  ;;  %377 = vmatmul.bf16.vlgmr.msra.gmra.mxu0 %v2155_v30  ;;  %v2771_v26 = vld [vmem:[%s3423_s1 + $0xd8] sm:$0xff]  ;;  %v544_v30 = vrot.slane %v542_v14, 5 }
  0x2c   : > { %711 = vmatpush.bf16.msrb.mxu2 %v2763_v22  ;;  %478 = vmatmul.bf16.vlgmr.msra.gmra.mxu1 %v2203_v27  ;;  %v2207_v22 = vor.u32 %v2733_v6, %v2206_v3  ;;  %v526_v27 = vrot.slane %v525_v11, 4  ;;  %v504_v6 = vld [vmem:[%s3009_s28 + $0x50] sm:$0x1] }
  0x2d   : > { %845 = vmatpush.bf16.msrb.mxu3 %v2775_v23  ;;  %1225 = vmatpush.bf16.msrb.mxu1 %v2795_v29  ;;  %v2215_v23 = vor.u32 %v2735_v8, %v2214_v7  ;;  %v540_v29 = vrot.slane %v539_v13, 4  ;;  %v2768_v7 = vld [vmem:[%s3423_s1 + $0xc0] sm:$0xff]  ;;  %v506_v8 = vld [vmem:[%s3009_s28 + $0x70] sm:$0x1]  ;;  %v1021_v13 = vld [vmem:[%s3009_s28 + $0x58] sm:$0x1] }
  0x2e   : > { %488 = vmatmul.bf16.vlgmr.msra.gmra.mxu3 %v2211_v28  ;;  %979 = vmatpush.bf16.msrb.mxu0 %v2787_v31  ;;  %v530_v28 = vrot.slane %v528_v12, 5  ;;  %v2783_v31 = vld [vmem:[%s3423_s1 + $0x118] sm:$0xff] }
  0x2f   : > { %v545_v47 = vsel %vm3105_vm2, %v540_v29, %v544_v30  ;;  %v1070_v30 = vshll.u32 %v1021_v13, 16 }
  0x30   : > { %712 = vmatpush.bf16.msrb.mxu2 %v2762_v32  ;;  %v2758_v32 = vld [vmem:[%s3423_s1 + $0x90] sm:$0xff]  ;;  %v531_v42 = vsel %vm3105_vm2, %v526_v27, %v530_v28  ;;  %v648_v1 = vunpack.c.l.b16 %v545_v47  ;;  %v1024_v47 = vld [vmem:[%s3009_s28 + $0x88] sm:$0xf] }
  0x31   : > { %846 = vmatpush.bf16.msrb.mxu3 %v2774_v35  ;;  %1226 = vmatpush.bf16.msrb.mxu1 %v2794_v38  ;;  %v1044_v35 = vrot.slane %v1042_v18, 5  ;;  %v2790_v38 = vld [vmem:[%s3423_s1 + $0x150] sm:$0xff]  ;;  %v647_v0 = vunpack.c.l.b16 %v531_v42  ;;  %v2378_v18 = vld [vmem:[%s3009_s28 + $0xc] sm:$0xf] }
  0x32   : > { %980 = vmatpush.bf16.msrb.mxu0 %v2786_v43  ;;  %v1020_v43 = vld [vmem:[%s3009_s28 + $0x48] sm:$0xf] }
  0x33   : > { %v1045_v48 = vsel %vm3105_vm2, %v1040_v34, %v1044_v35  ;;  %v1061_v56 = vshrl.u32 %v1020_v43, 16  ;;  %v1064_v57 = vshll.u32 %v1020_v43, 16  ;;  %v655_v27 = vpack.c.b16 %v648_v1, %v647_v0  ;;  %v507_v43 = vld [vmem:[%s3009_s28 + $0x80] sm:$0xf] }
  0x34   : > { %713 = vmatpush.bf16.msrb.mxu2 %v2761_v44  ;;  %v1022_v44 = vld [vmem:[%s3009_s28 + $0x68] sm:$0xf]  ;;  %v1161_v3 = vunpack.c.l.b16 %v1045_v48  ;;  %v2804_v1 = vld [vmem:[%s3423_s1 + $0x1a0] sm:$0xff] }
  0x35   : > { %847 = vmatpush.bf16.msrb.mxu3 %v2773_v49  ;;  %1227 = vmatpush.bf16.msrb.mxu1 %v2793_v50  ;;  %v1059_v49 = vsel %vm3105_vm2, %v1054_v36, %v1058_v37  ;;  %v547_v50 = vshrl.u32 %v503_v39, 16  ;;  %v1075_v58 = vshrl.u32 %v1022_v44, 16  ;;  %v1063_v14 = vrot.slane %v1061_v56, 4  ;;  %v1026_v48 = vld [vmem:[%s3009_s28 + $0xa8] sm:$0xf] }
  0x36   : > { %981 = vmatpush.bf16.msrb.mxu0 %v2785_v51  ;;  %v550_v51 = vshll.u32 %v503_v39, 16  ;;  %v1162_v4 = vunpack.c.l.b16 %v1059_v49  ;;  %v1084_v36 = vshll.u32 %v1023_v20, 16  ;;  %v2827_v39 = vld [vmem:[%s3423_s1 + $0x238] sm:$0xff]  ;;  %v578_v56 = vshll.u32 %v507_v43, 16 }
  0x37   : > { %v549_v9 = vrot.slane %v547_v50, 4  ;;  %v1106_v0 = vshll.u32 %v1026_v48, 16 }
  0x38   : > { %714 = vmatpush.bf16.msrb.mxu2 %v2760_v52  ;;  %v561_v52 = vshrl.u32 %v505_v40, 16  ;;  %v552_v10 = vrot.slane %v550_v51, 5  ;;  %v1169_v28 = vpack.c.b16 %v1162_v4, %v1161_v3 }
  0x39   : > { %848 = vmatpush.bf16.msrb.mxu3 %v2772_v53  ;;  %1228 = vmatpush.bf16.msrb.mxu1 %v2792_v59  ;;  %v564_v53 = vshll.u32 %v505_v40, 16  ;;  %v1078_v59 = vshll.u32 %v1022_v44, 16  ;;  %v2838_v40 = vld [vmem:[%s3424_s2 + $0x30] sm:$0xff]  ;;  %v509_v44 = vld [vmem:[%s3009_s28 + $0xa0] sm:$0xf] }
  0x3a   : > { %982 = vmatpush.bf16.msrb.mxu0 %v2784_v15  ;;  %v563_v11 = vrot.slane %v561_v52, 4  ;;  %v1066_v15 = vrot.slane %v1064_v57, 5  ;;  %v553_v29 = vor.u32 %v552_v10, %v549_v9  ;;  %v1086_v52 = vrot.slane %v1084_v36, 5  ;;  %v2825_v9 = vld [vmem:[%s3423_s1 + $0x228] sm:$0xff] }
  0x3b   : > { %392 = vmatmul.bf16.gmra.mxu2 %v2167_v21  ;;  %382 = vmatmul.bf16.gmra.mxu0 %v2159_v25  ;;  %v566_v12 = vrot.slane %v564_v53, 5  ;;  %v1080_v17 = vrot.slane %v1078_v59, 5  ;;  %v2780_v21 = vld [vmem:[%s3423_s1 + $0x100] sm:$0xff]  ;;  %v556_v25 = vshll.u32 %v504_v6, 16  ;;  %v2805_v53 = vld [vmem:[%s3423_s1 + $0x1a8] sm:$0xff]  ;;  %v589_v57 = vshrl.u32 %v509_v44, 16 }
  0x3c   : > { %715 = vmatpush.bf16.msrb.mxu2 %v2759_v16  ;;  %483 = vmatmul.bf16.gmra.mxu1 %v2207_v22  ;;  %v1077_v16 = vrot.slane %v1075_v58, 4  ;;  %v2315_v22 = vor.u32 %v2764_v2, %v3146_v62  ;;  %v1067_v34 = vor.u32 %v1066_v15, %v1063_v14  ;;  %v592_v58 = vshll.u32 %v509_v44, 16  ;;  %v2817_v59 = vld [vmem:[%s3423_s1 + $0x1e8] sm:$0xff]  ;;  %v2816_v6 = vld [vmem:[%s3423_s1 + $0x1e0] sm:$0xff]  ;;  %v1025_v15 = vld [vmem:[%s3009_s28 + $0x98] sm:$0x1] }
  0x3d   : > { %1229 = vmatpush.bf16.msrb.mxu1 %v2791_v24  ;;  %849 = vmatpush.bf16.msrb.mxu3 %v2771_v26  ;;  %v2819_v24 = vld [vmem:[%s3423_s1 + $0x1f8] sm:$0xff]  ;;  %v570_v26 = vshll.u32 %v506_v8, 16  ;;  %v1092_v62 = vshll.u32 %v1024_v47, 16  ;;  %v510_v8 = vld [vmem:[%s3009_s28 + $0xb0] sm:$0x1]  ;;  %v2836_v14 = vld [vmem:[%s3424_s2 + $0x20] sm:$0xff] }
  0x3e   : > { %493 = vmatmul.bf16.gmra.mxu3 %v2215_v23  ;;  %983 = vmatpush.bf16.msrb.mxu0 %v2783_v31  ;;  %v2776_v23 = vld [vmem:[%s3009_s28 + $0x28] sm:$0xf0]  ;;  %v2806_v31 = vld [vmem:[%s3423_s1 + $0x1b0] sm:$0xff]  ;;  %v1081_v35 = vor.u32 %v1080_v17, %v1077_v16  ;;  %v1068_v50 = vrot.slane %v1067_v34, 4  ;;  %v594_v13 = vrot.slane %v592_v58, 5  ;;  %v1098_v34 = vshll.u32 %v1025_v15, 16 }
  0x3f   : > { %v2379_v37 = vor.u32 %v2776_v23, %v2378_v18  ;;  %v572_v42 = vrot.slane %v570_v26, 5  ;;  %v1094_v17 = vrot.slane %v1092_v62, 5  ;;  %v2765_v26 = vld [vmem:[%s3009_s28 + $0x64] sm:$0xf0]  ;;  %v513_v58 = vld [vmem:[%s3009_s28 + $0xe0] sm:$0xf] }
  0x40   : > { %716 = vmatpush.bf16.msrb.mxu2 %v2758_v32  ;;  %v567_v32 = vor.u32 %v566_v12, %v563_v11  ;;  %v1082_v51 = vrot.slane %v1081_v35, 4  ;;  %v580_v11 = vrot.slane %v578_v56, 5  ;;  %v591_v12 = vrot.slane %v589_v57, 4  ;;  %v2835_v35 = vld [vmem:[%s3424_s2 + $0x18] sm:$0xff]  ;;  %v511_v57 = vld [vmem:[%s3009_s28 + $0xc0] sm:$0xf] }
  0x41   : > { %1230 = vmatpush.bf16.msrb.mxu1 %v2790_v38  ;;  %850 = vmatpush.bf16.msrb.mxu3 %v2770_v41  ;;  %v2818_v38 = vld [vmem:[%s3423_s1 + $0x1f0] sm:$0xff]  ;;  %v558_v41 = vrot.slane %v556_v25, 5  ;;  %v1027_v25 = vld [vmem:[%s3009_s28 + $0xb8] sm:$0x1]  ;;  %v1030_v62 = vld [vmem:[%s3009_s28 + $0xe8] sm:$0xf] }
  0x42   : > { %984 = vmatpush.bf16.msrb.mxu0 %v2782_v45  ;;  %v554_v45 = vrot.slane %v553_v29, 4  ;;  %v568_v49 = vrot.slane %v567_v32, 4  ;;  %v2777_v29 = vld [vmem:[%s3009_s28 + $0x68] sm:$0xf0]  ;;  %v598_v32 = vshll.u32 %v510_v8, 16  ;;  %v595_v36 = vor.u32 %v594_v13, %v591_v12  ;;  %v2823_v56 = vld [vmem:[%s3423_s1 + $0x218] sm:$0xff] }
  0x43   : > { %v620_v8 = vshll.u32 %v513_v58, 16  ;;  %v1131_v12 = vshrl.u32 %v1030_v62, 16  ;;  %v1134_v13 = vshll.u32 %v1030_v62, 16  ;;  %v2322_v15 = vld [vmem:[%s3009_s28 + $0x88] sm:$0xf] }
  0x44   : > { %717 = vmatpush.bf16.msrb.mxu2 %v2757_v46  ;;  %v1072_v46 = vrot.slane %v1070_v30, 5  ;;  %v559_v2 = vsel %vm3105_vm2, %v554_v45, %v558_v41  ;;  %v573_v3 = vsel %vm3105_vm2, %v568_v49, %v572_v42  ;;  %v2824_v41 = vld [vmem:[%s3423_s1 + $0x220] sm:$0xff]  ;;  %v600_v49 = vrot.slane %v598_v32, 5 }
  0x45   : > { %1231 = vmatpush.bf16.msrb.mxu1 %v2789_v55  ;;  %851 = vmatpush.bf16.msrb.mxu3 %v2769_v54  ;;  %v2837_v54 = vld [vmem:[%s3424_s2 + $0x28] sm:$0xff]  ;;  %v575_v55 = vshrl.u32 %v507_v43, 16  ;;  %v649_v20 = vunpack.c.l.b16 %v559_v2 }
  0x46   : > { %985 = vmatpush.bf16.msrb.mxu0 %v2781_v60  ;;  %v2826_v60 = vld [vmem:[%s3423_s1 + $0x230] sm:$0xff]  ;;  %v1073_v4 = vsel %vm3105_vm2, %v1068_v50, %v1072_v46  ;;  %v1100_v50 = vrot.slane %v1098_v34, 5  ;;  %v1133_v34 = vrot.slane %v1131_v12, 4  ;;  %v2390_v12 = vld [vmem:[%s3009_s28 + $0xcc] sm:$0xf] }
  0x47   : > { %v577_v10 = vrot.slane %v575_v55, 4  ;;  %v1163_v23 = vunpack.c.l.b16 %v1073_v4  ;;  %v2802_v46 = vld [vmem:[%s3423_s1 + $0x190] sm:$0xff] }
  0x48   : > { %718 = vmatpush.bf16.msrb.mxu2 %v2756_v61  ;;  %v1089_v61 = vshrl.u32 %v1024_v47, 16  ;;  %v2814_v55 = vld [vmem:[%s3423_s1 + $0x1d0] sm:$0xff] }
  0x49   : > { %1232 = vmatpush.bf16.msrb.mxu1 %v2788_v63  ;;  %852 = vmatpush.bf16.msrb.mxu3 %v2768_v7  ;;  %v1103_v63 = vshrl.u32 %v1026_v48, 16  ;;  %v508_v7 = vld [vmem:[%s3009_s28 + $0x90] sm:$0x1]  ;;  %v581_v30 = vor.u32 %v580_v11, %v577_v10 }
  0x4a   : > { %986 = vmatpush.bf16.msrb.mxu0 %v2780_v21  ;;  %v1091_v16 = vrot.slane %v1089_v61, 4  ;;  %v650_v21 = vunpack.c.l.b16 %v573_v3  ;;  %v1028_v61 = vld [vmem:[%s3009_s28 + $0xc8] sm:$0xf]  ;;  %v2822_v4 = vld [vmem:[%s3423_s1 + $0x210] sm:$0xff] }
  0x4b   : > { %719 = vmatmul.bf16.vlgmr.msrb.gmra.mxu2 %v655_v27  ;;  %v1105_v18 = vrot.slane %v1103_v63, 4  ;;  %v2382_v27 = vld [vmem:[%s3009_s28 + $0x4c] sm:$0xf]  ;;  %v582_v47 = vrot.slane %v581_v30, 4  ;;  %v2834_v63 = vld [vmem:[%s3424_s2 + $0x10] sm:$0xff]  ;;  %v1117_v10 = vshrl.u32 %v1028_v61, 16 }
  0x4c   : > { %1360 = vmatpush.bf16.msra.mxu2 %v2807_v5  ;;  %1233 = vmatmul.bf16.vlgmr.msrb.gmra.mxu1 %v1169_v28  ;;  %v1087_v5 = vsel %vm3105_vm2, %v1082_v51, %v1086_v52  ;;  %v2803_v28 = vld [vmem:[%s3423_s1 + $0x198] sm:$0xff]  ;;  %v656_v42 = vpack.c.b16 %v650_v21, %v649_v20  ;;  %v2383_v45 = vor.u32 %v2777_v29, %v2382_v27  ;;  %v596_v51 = vrot.slane %v595_v36, 4  ;;  %v2813_v3 = vld [vmem:[%s3423_s1 + $0x1c8] sm:$0xff]  ;;  %v512_v21 = vld [vmem:[%s3009_s28 + $0xd0] sm:$0x1] }
  0x4d   : > { %1925 = vmatpush.bf16.msra.mxu1 %v2839_v19  ;;  %1494 = vmatpush.bf16.msra.mxu3 %v2819_v24  ;;  %v1108_v19 = vrot.slane %v1106_v0, 5  ;;  %v1164_v24 = vunpack.c.l.b16 %v1087_v5  ;;  %v603_v5 = vshrl.u32 %v511_v57, 16  ;;  %v1120_v11 = vshll.u32 %v1028_v61, 16  ;;  %v2832_v29 = vld [vmem:[%s3424_s2] sm:$0xff]  ;;  %v1029_v30 = vld [vmem:[%s3009_s28 + $0xd8] sm:$0x1] }
  0x4e   : > { %853 = vmatmul.bf16.vlgmr.msrb.gmra.mxu3 %v2315_v22  ;;  %987 = vmatmul.bf16.vlgmr.msrb.gmra.mxu0 %v2379_v37  ;;  %v2318_v22 = vld [vmem:[%s3009_s28 + $0x48] sm:$0xf]  ;;  %v1095_v37 = vor.u32 %v1094_v17, %v1091_v16  ;;  %v601_v0 = vsel %vm3105_vm2, %v596_v51, %v600_v49  ;;  %v1031_v36 = vld [vmem:[%s3009_s28 + $0xf8] sm:$0x1]  ;;  %v2618_v61 = vld [vmem:[%s3009_s28 + $0x40] sm:$0xf] }
  0x4f   : > { %1740 = vmatpush.bf16.msra.mxu0 %v2827_v39  ;;  %v1112_v39 = vshll.u32 %v1027_v25, 16  ;;  %v1170_v43 = vpack.c.b16 %v1164_v24, %v1163_v23  ;;  %v2319_v44 = vor.u32 %v2765_v26, %v2318_v22  ;;  %v2766_v16 = vld [vmem:[%s3009_s28 + $0xa4] sm:$0xf0]  ;;  %v514_v22 = vld [vmem:[%s3009_s28 + $0xf0] sm:$0x1]  ;;  %v2812_v23 = vld [vmem:[%s3423_s1 + $0x1c0] sm:$0xff] }
  0x50   : > { %1361 = vmatpush.bf16.msra.mxu2 %v2806_v31  ;;  %v584_v31 = vshll.u32 %v508_v7, 16  ;;  %v1096_v52 = vrot.slane %v1095_v37, 4  ;;  %v617_v7 = vshrl.u32 %v513_v58, 16  ;;  %v2821_v24 = vld [vmem:[%s3423_s1 + $0x208] sm:$0xff]  ;;  %v605_v25 = vrot.slane %v603_v5, 4 }
  0x51   : > { %1926 = vmatpush.bf16.msra.mxu1 %v2838_v40  ;;  %1495 = vmatpush.bf16.msra.mxu3 %v2818_v38  ;;  %v1109_v38 = vor.u32 %v1108_v19, %v1105_v18  ;;  %v2815_v40 = vld [vmem:[%s3423_s1 + $0x1d8] sm:$0xff]  ;;  %v652_v18 = vunpack.c.l.b16 %v601_v0  ;;  %v1122_v32 = vrot.slane %v1120_v11, 5  ;;  %v1565_v5 = vshll.u32 %v2618_v61, 16  ;;  %v2767_v11 = vld [vmem:[%s3009_s28 + $0xe4] sm:$0xf0] }
  0x52   : > { %v586_v48 = vrot.slane %v584_v31, 5  ;;  %v619_v27 = vrot.slane %v617_v7, 4  ;;  %v1119_v31 = vrot.slane %v1117_v10, 4  ;;  %v2326_v10 = vld [vmem:[%s3009_s28 + $0xc8] sm:$0xf] }
  0x53   : > { %1741 = vmatpush.bf16.msra.mxu0 %v2826_v60 }
  0x54   : > { %1362 = vmatpush.bf16.msra.mxu2 %v2805_v53  ;;  %v1110_v53 = vrot.slane %v1109_v38, 4  ;;  %v587_v60 = vsel %vm3105_vm2, %v582_v47, %v586_v48  ;;  %v2323_v38 = vor.u32 %v2766_v16, %v2322_v15  ;;  %v1123_v48 = vor.u32 %v1122_v32, %v1119_v31 }
  0x55   : > { %1927 = vmatpush.bf16.msra.mxu1 %v2837_v54  ;;  %1496 = vmatpush.bf16.msra.mxu3 %v2817_v59  ;;  %v1114_v54 = vrot.slane %v1112_v39, 5  ;;  %v2801_v59 = vld [vmem:[%s3423_s1 + $0x188] sm:$0xff]  ;;  %v651_v17 = vunpack.c.l.b16 %v587_v60  ;;  %v2616_v60 = vld [vmem:[%s3009_s28 + $0x20] sm:$0xf] }
  0x57   : > { %1742 = vmatpush.bf16.msra.mxu0 %v2825_v9  ;;  %v1115_v2 = vsel %vm3105_vm2, %v1110_v53, %v1114_v54  ;;  %v2833_v9 = vld [vmem:[%s3424_s2 + $0x8] sm:$0xff]  ;;  %v657_v37 = vpack.c.b16 %v652_v18, %v651_v17  ;;  %v1567_v17 = vrot.slane %v1565_v5, 5 }
  0x58   : > { %1363 = vmatpush.bf16.msra.mxu2 %v2804_v1  ;;  %v1101_v1 = vsel %vm3105_vm2, %v1096_v52, %v1100_v50  ;;  %v1166_v20 = vunpack.c.l.b16 %v1115_v2  ;;  %v1140_v50 = vshll.u32 %v1031_v36, 16  ;;  %v1548_v2 = vshrl.u32 %v2616_v60, 16 }
  0x59   : > { %1928 = vmatpush.bf16.msra.mxu1 %v2836_v14  ;;  %1497 = vmatpush.bf16.msra.mxu3 %v2816_v6  ;;  %v606_v6 = vshll.u32 %v511_v57, 16  ;;  %v2800_v14 = vld [vmem:[%s3423_s1 + $0x180] sm:$0xff]  ;;  %v1165_v19 = vunpack.c.l.b16 %v1101_v1  ;;  %v1124_v57 = vrot.slane %v1123_v48, 4 }
  0x5b   : > { %1743 = vmatpush.bf16.msra.mxu0 %v2824_v41  ;;  %724 = vmatmul.bf16.gmra.mxu2 %v656_v42  ;;  %v608_v26 = vrot.slane %v606_v6, 5  ;;  %v1171_v39 = vpack.c.b16 %v1166_v20, %v1165_v19  ;;  %v2778_v41 = vld [vmem:[%s3009_s28 + $0xa8] sm:$0xf0]  ;;  %v2820_v42 = vld [vmem:[%s3423_s1 + $0x200] sm:$0xff]  ;;  %v2617_v20 = vld [vmem:[%s3009_s28 + $0x30] sm:$0x1] }
  0x5c   : > { %1364 = vmatpush.bf16.msra.mxu2 %v2803_v28  ;;  %1238 = vmatmul.bf16.gmra.mxu1 %v1170_v43  ;;  %v622_v28 = vrot.slane %v620_v8, 5 }
  0x5d   : > { %1929 = vmatpush.bf16.msra.mxu1 %v2835_v35  ;;  %1498 = vmatpush.bf16.msra.mxu3 %v2815_v40  ;;  %v1136_v35 = vrot.slane %v1134_v13, 5  ;;  %v2386_v40 = vld [vmem:[%s3009_s28 + $0x8c] sm:$0xf]  ;;  %v609_v43 = vor.u32 %v608_v26, %v605_v25  ;;  %v1557_v25 = vshll.u32 %v2617_v20, 16 }
  0x5e   : > { %858 = vmatmul.bf16.gmra.mxu3 %v2319_v44  ;;  %992 = vmatmul.bf16.gmra.mxu0 %v2383_v45  ;;  %v612_v44 = vshll.u32 %v512_v21, 16  ;;  %v626_v45 = vshll.u32 %v514_v22, 16  ;;  %v623_v47 = vor.u32 %v622_v28, %v619_v27  ;;  %v2387_v51 = vor.u32 %v2778_v41, %v2386_v40  ;;  %v2779_v13 = vld [vmem:[%s3009_s28 + $0xe8] sm:$0xf0]  ;;  %v2619_v21 = vld [vmem:[%s3009_s28 + $0x50] sm:$0x1] }
  0x5f   : > { %1744 = vmatpush.bf16.msra.mxu0 %v2823_v56  ;;  %v1137_v49 = vor.u32 %v1136_v35, %v1133_v34  ;;  %v610_v52 = vrot.slane %v609_v43, 4  ;;  %v2327_v22 = vor.u32 %v2767_v11, %v2326_v10  ;;  %v1571_v27 = vshll.u32 %v2619_v21, 16  ;;  %v2620_v28 = vld [vmem:[%s3009_s28 + $0x60] sm:$0xf]  ;;  %v2570_v43 = vld [vmem:[%s3009_s28 + $0x24] sm:$0xf] }
  0x60   : > { %1365 = vmatpush.bf16.msra.mxu2 %v2802_v46  ;;  %v1126_v46 = vshll.u32 %v1029_v30, 16  ;;  %v614_v53 = vrot.slane %v612_v44, 5  ;;  %v628_v54 = vrot.slane %v626_v45, 5  ;;  %v624_v56 = vrot.slane %v623_v47, 4  ;;  %v2796_v40 = vld [vmem:[%s3009_s28 + $0x3c] sm:$0xf0] }
  0x61   : > { %1499 = vmatpush.bf16.msra.mxu3 %v2814_v55  ;;  %1930 = vmatpush.bf16.msra.mxu1 %v2834_v63  ;;  %v1138_v58 = vrot.slane %v1137_v49, 4  ;;  %v1559_v31 = vrot.slane %v1557_v25, 5  ;;  %v1573_v34 = vrot.slane %v1571_v27, 5  ;;  %v1576_v35 = vshrl.u32 %v2620_v28, 16  ;;  %v2808_v44 = vld [vmem:[%s3009_s28 + $0x40] sm:$0xf0] }
  0x62   : > { %v1128_v55 = vrot.slane %v1126_v46, 5  ;;  %v615_v62 = vsel %vm3105_vm2, %v610_v52, %v614_v53  ;;  %v629_v63 = vsel %vm3105_vm2, %v624_v56, %v628_v54  ;;  %v1579_v36 = vshll.u32 %v2620_v28, 16  ;;  %v2682_v45 = vld [vmem:[%s3009_s28 + $0xc] sm:$0xf]  ;;  %v2621_v53 = vld [vmem:[%s3009_s28 + $0x70] sm:$0x1] }
  0x63   : > { %1745 = vmatpush.bf16.msra.mxu0 %v2822_v4  ;;  %v1562_v4 = vshrl.u32 %v2618_v61, 16  ;;  %v653_v6 = vunpack.c.l.b16 %v615_v62  ;;  %v654_v7 = vunpack.c.l.b16 %v629_v63  ;;  %v2828_v46 = vld [vmem:[%s3009_s28 + $0x28] sm:$0xf0]  ;;  %v1578_v47 = vrot.slane %v1576_v35, 4  ;;  %v2623_v54 = vld [vmem:[%s3009_s28 + $0x90] sm:$0x1] }
  0x64   : > { %1366 = vmatpush.bf16.msra.mxu2 %v2801_v59  ;;  %v1142_v59 = vrot.slane %v1140_v50, 5  ;;  %v1129_v0 = vsel %vm3105_vm2, %v1124_v57, %v1128_v55  ;;  %v1581_v48 = vrot.slane %v1579_v36, 5  ;;  %v2571_v56 = vor.u32 %v2808_v44, %v2570_v43  ;;  %v2502_v11 = vld [vmem:[%s3009_s28 + $0x60] sm:$0xf] }
  0x65   : > { %1500 = vmatpush.bf16.msra.mxu3 %v2813_v3  ;;  %1931 = vmatpush.bf16.msra.mxu1 %v2833_v9  ;;  %v1551_v3 = vshll.u32 %v2616_v60, 16  ;;  %v1167_v8 = vunpack.c.l.b16 %v1129_v0  ;;  %v1564_v16 = vrot.slane %v1562_v4, 4  ;;  %v658_v18 = vpack.c.b16 %v654_v7, %v653_v6  ;;  %v2626_v4 = vld [vmem:[%s3009_s28 + $0xc0] sm:$0xf] }
  0x66   : > { %v1143_v1 = vsel %vm3105_vm2, %v1138_v58, %v1142_v59  ;;  %v2683_v57 = vor.u32 %v2828_v46, %v2682_v45  ;;  %v1582_v58 = vor.u32 %v1581_v48, %v1578_v47  ;;  %v1585_v59 = vshll.u32 %v2621_v53, 16  ;;  %v2506_v46 = vld [vmem:[%s3009_s28 + $0xa0] sm:$0xf]  ;;  %v2690_v48 = vld [vmem:[%s3009_s28 + $0x8c] sm:$0xf] }
  0x67   : > { %1746 = vmatpush.bf16.msra.mxu0 %v2821_v24  ;;  %v1168_v9 = vunpack.c.l.b16 %v1143_v1  ;;  %v1553_v15 = vrot.slane %v1551_v3, 5  ;;  %v1568_v26 = vor.u32 %v1567_v17, %v1564_v16  ;;  %v1599_v61 = vshll.u32 %v2623_v54, 16  ;;  %v2624_v3 = vld [vmem:[%s3009_s28 + $0xa0] sm:$0xf] }
  0x68   : > { %1367 = vmatpush.bf16.msra.mxu2 %v2800_v14  ;;  %v1550_v14 = vrot.slane %v1548_v2, 4  ;;  %v1583_v63 = vrot.slane %v1582_v58, 4  ;;  %v1587_v0 = vrot.slane %v1585_v59, 5  ;;  %v1604_v7 = vshrl.u32 %v2624_v3, 16  ;;  %v2798_v47 = vld [vmem:[%s3009_s28 + $0xbc] sm:$0xf0] }
  0x69   : > { %1501 = vmatpush.bf16.msra.mxu3 %v2812_v23  ;;  %1932 = vmatpush.bf16.msra.mxu1 %v2832_v29  ;;  %v1172_v19 = vpack.c.b16 %v1168_v9, %v1167_v8  ;;  %v2391_v23 = vor.u32 %v2779_v13, %v2390_v12  ;;  %v2622_v29 = vld [vmem:[%s3009_s28 + $0x80] sm:$0xf]  ;;  %v1569_v32 = vrot.slane %v1568_v26, 4  ;;  %v1601_v2 = vrot.slane %v1599_v61, 5  ;;  %v2574_v13 = vld [vmem:[%s3009_s28 + $0x64] sm:$0xf] }
  0x6a   : > { %v1554_v24 = vor.u32 %v1553_v15, %v1550_v14  ;;  %v1588_v5 = vsel %vm3105_vm2, %v1583_v63, %v1587_v0  ;;  %v1607_v8 = vshll.u32 %v2624_v3, 16  ;;  %v1618_v9 = vshrl.u32 %v2626_v4, 16  ;;  %v2797_v12 = vld [vmem:[%s3009_s28 + $0x7c] sm:$0xf0]  ;;  %v2686_v14 = vld [vmem:[%s3009_s28 + $0x4c] sm:$0xf] }
  0x6b   : > { %1747 = vmatpush.bf16.msra.mxu0 %v2820_v42  ;;  %729 = vmatmul.bf16.gmra.mxu2 %v657_v37  ;;  %v1590_v37 = vshrl.u32 %v2622_v29, 16  ;;  %v1574_v42 = vsel %vm3105_vm2, %v1569_v32, %v1573_v34  ;;  %v1621_v10 = vshll.u32 %v2626_v4, 16  ;;  %v2829_v15 = vld [vmem:[%s3009_s28 + $0x68] sm:$0xf0]  ;;  %v1678_v16 = vunpack.c.l.b16 %v1588_v5  ;;  %v2631_v61 = vld [vmem:[%s3009_s28 + $0x110] sm:$0x1] }
  0x6c   : > { %1243 = vmatmul.bf16.gmra.mxu1 %v1171_v39  ;;  %v1555_v30 = vrot.slane %v1554_v24, 4  ;;  %v2498_v39 = vld [vmem:[%s3009_s28 + $0x20] sm:$0xf]  ;;  %v1677_v52 = vunpack.c.l.b16 %v1574_v42  ;;  %v1609_v20 = vrot.slane %v1607_v8, 5  ;;  %v1620_v21 = vrot.slane %v1618_v9, 4 }
  0x6d   : > { %v1592_v49 = vrot.slane %v1590_v37, 4  ;;  %v2499_v55 = vor.u32 %v2796_v40, %v2498_v39  ;;  %v2627_v24 = vld [vmem:[%s3009_s28 + $0xd0] sm:$0x1]  ;;  %v2503_v25 = vor.u32 %v2797_v12, %v2502_v11  ;;  %v2687_v26 = vor.u32 %v2829_v15, %v2686_v14  ;;  %v2630_v39 = vld [vmem:[%s3009_s28 + $0x100] sm:$0xf] }
  0x6e   : > { %863 = vmatmul.bf16.gmra.mxu3 %v2323_v38  ;;  %997 = vmatmul.bf16.gmra.mxu0 %v2387_v51  ;;  %v1593_v38 = vshll.u32 %v2622_v29, 16  ;;  %v1560_v41 = vsel %vm3105_vm2, %v1555_v30, %v1559_v31  ;;  %v1627_v32 = vshll.u32 %v2627_v24, 16  ;;  %v1646_v44 = vshrl.u32 %v2630_v39, 16  ;;  %v2811_v24 = vld [vmem:[%s3009_s28 + $0x100] sm:$0xf0] }
  0x6f   : > { %v1676_v51 = vunpack.c.l.b16 %v1560_v41  ;;  %v1649_v45 = vshll.u32 %v2630_v39, 16  ;;  %v2507_v58 = vor.u32 %v2798_v47, %v2506_v46  ;;  %v1655_v5 = vshll.u32 %v2631_v61, 16 }
  0x70   : > { %v1595_v50 = vrot.slane %v1593_v38, 5  ;;  %v1629_v37 = vrot.slane %v1627_v32, 5  ;;  %v2628_v38 = vld [vmem:[%s3009_s28 + $0xe0] sm:$0xf] }
  0x71   : > { %v1684_v62 = vpack.c.b16 %v1677_v52, %v1676_v51  ;;  %v1632_v42 = vshrl.u32 %v2628_v38, 16  ;;  %v1635_v43 = vshll.u32 %v2628_v38, 16  ;;  %v2810_v51 = vld [vmem:[%s3009_s28 + $0xc0] sm:$0xf0]  ;;  %v1657_v11 = vrot.slane %v1655_v5, 5 }
  0x72   : > { %v1596_v60 = vor.u32 %v1595_v50, %v1592_v49  ;;  %v2830_v49 = vld [vmem:[%s3009_s28 + $0xa8] sm:$0xf0]  ;;  %v2578_v50 = vld [vmem:[%s3009_s28 + $0xa4] sm:$0xf] }
  0x73   : > { %v1634_v54 = vrot.slane %v1632_v42, 4  ;;  %v2691_v59 = vor.u32 %v2830_v49, %v2690_v48  ;;  %v2579_v63 = vor.u32 %v2810_v51, %v2578_v50 }
  0x74   : > { %v1597_v1 = vrot.slane %v1596_v60, 4  ;;  %v2629_v60 = vld [vmem:[%s3009_s28 + $0xf0] sm:$0x1] }
  0x75   : > { %v1641_v3 = vshll.u32 %v2629_v60, 16 }
  0x76   : > { %v1602_v6 = vsel %vm3105_vm2, %v1597_v1, %v1601_v2 }
  0x77   : > { %v1679_v17 = vunpack.c.l.b16 %v1602_v6  ;;  %v1643_v9 = vrot.slane %v1641_v3, 5 }
  0x79   : > { %v1685_v28 = vpack.c.b16 %v1679_v17, %v1678_v16 }
  0x7b   : > { %734 = vmatmul.bf16.gmra.mxu2 %v658_v18  ;;  %v2809_v18 = vld [vmem:[%s3009_s28 + $0x80] sm:$0xf0] }
  0x7c   : > { %1248 = vmatmul.bf16.gmra.mxu1 %v1172_v19  ;;  %v1606_v19 = vrot.slane %v1604_v7, 4  ;;  %v2575_v27 = vor.u32 %v2809_v18, %v2574_v13 }
  0x7e   : > { %868 = vmatmul.bf16.gmra.mxu3 %v2327_v22  ;;  %1002 = vmatmul.bf16.gmra.mxu0 %v2391_v23  ;;  %v1623_v22 = vrot.slane %v1621_v10, 5  ;;  %v2625_v23 = vld [vmem:[%s3009_s28 + $0xb0] sm:$0x1]  ;;  %v1610_v29 = vor.u32 %v1609_v20, %v1606_v19  ;;  %v2510_v19 = vld [vmem:[%s3009_s28 + $0xe0] sm:$0xf] }
  0x7f   : > { %v1613_v30 = vshll.u32 %v2625_v23, 16  ;;  %v2799_v20 = vld [vmem:[%s3009_s28 + $0xfc] sm:$0xf0]  ;;  %v2582_v23 = vld [vmem:[%s3009_s28 + $0xe4] sm:$0xf] }
  0x80   : > { %v1624_v31 = vor.u32 %v1623_v22, %v1620_v21  ;;  %v1611_v34 = vrot.slane %v1610_v29, 4  ;;  %v2694_v21 = vld [vmem:[%s3009_s28 + $0xcc] sm:$0xf]  ;;  %v2511_v29 = vor.u32 %v2799_v20, %v2510_v19 }
  0x81   : > { %v1615_v35 = vrot.slane %v1613_v30, 5  ;;  %v2831_v22 = vld [vmem:[%s3009_s28 + $0xe8] sm:$0xf0]  ;;  %s2730_s28 = sshll.u32 %s3431_s19, 5 }
  0x82   : > { %v1625_v36 = vrot.slane %v1624_v31, 4  ;;  %v2695_v30 = vor.u32 %v2831_v22, %v2694_v21  ;;  %s3390_s6 = scalar_lea.vmem %s3426_s4, %s2730_s28  ;;  %s3397_s9 = scalar_lea.vmem %s3425_s3, %s2730_s28 }
  0x83   : > { %v1616_v40 = vsel %vm3105_vm2, %v1611_v34, %v1615_v35  ;;  %v2583_v34 = vor.u32 %v2811_v24, %v2582_v23 }
  0x84   : > { %v1630_v41 = vsel %vm3105_vm2, %v1625_v36, %v1629_v37  ;;  %v1680_v52 = vunpack.c.l.b16 %v1616_v40 }
  0x85   : > { %v1681_v53 = vunpack.c.l.b16 %v1630_v41 }
  0x87   : > { %v1686_v0 = vpack.c.b16 %v1681_v53, %v1680_v52 }
  0x8b   : > { %1368 = vmatmul.bf16.vlgmr.msra.gmra.mxu2 %v2499_v55  ;;  %v1637_v55 = vrot.slane %v1635_v43, 5 }
  0x8c   : > { %1933 = vmatmul.bf16.vlgmr.msra.gmra.mxu1 %v2683_v57  ;;  %v1651_v57 = vrot.slane %v1649_v45, 5 }
  0x8d   : > { %v1638_v2 = vor.u32 %v1637_v55, %v1634_v54 }
  0x8e   : > { %1502 = vmatmul.bf16.vlgmr.msra.gmra.mxu3 %v2571_v56  ;;  %1748 = vmatmul.bf16.vlgmr.msra.gmra.mxu0 %v1684_v62  ;;  %v1648_v56 = vrot.slane %v1646_v44, 4 }
  0x8f   : > { %v1639_v8 = vrot.slane %v1638_v2, 4 }
  0x90   : > { %v1652_v4 = vor.u32 %v1651_v57, %v1648_v56 }
  0x91   : > { %v1644_v16 = vsel %vm3105_vm2, %v1639_v8, %v1643_v9 }
  0x92   : > { %v1653_v10 = vrot.slane %v1652_v4, 4 }
  0x94   : > { %v1658_v17 = vsel %vm3105_vm2, %v1653_v10, %v1657_v11 }
  0x9b   : > { %1373 = vmatmul.bf16.gmra.mxu2 %v2503_v25  ;;  %v1682_v25 = vunpack.c.l.b16 %v1644_v16 }
  0x9c   : > { %1938 = vmatmul.bf16.gmra.mxu1 %v2687_v26  ;;  %v1683_v26 = vunpack.c.l.b16 %v1658_v17 }
  0x9e   : > { %1507 = vmatmul.bf16.gmra.mxu3 %v2575_v27  ;;  %1753 = vmatmul.bf16.gmra.mxu0 %v1685_v28  ;;  %v1687_v35 = vpack.c.b16 %v1683_v26, %v1682_v25 }
  0xa8   : > { %v378_v1 = vpop.f32.mrf.mxu0 }
  0xa9   : > { %v479_v62 = vpop.f32.mrf.mxu1 }
  0xaa   : > { %v480_v6 = vadd.f32 %v479_v62, %v378_v1 }
  0xab   : > { %1378 = vmatmul.bf16.gmra.mxu2 %v2507_v58 }
  0xac   : > { %1943 = vmatmul.bf16.gmra.mxu1 %v2691_v59 }
  0xae   : > { %1512 = vmatmul.bf16.gmra.mxu3 %v2579_v63  ;;  %1758 = vmatmul.bf16.gmra.mxu0 %v1686_v0  ;;  %v388_v7 = vpop.f32.mrf.mxu2 }
  0xb0   : > { %v380_v15 = vpop.f32.mrf.mxu0 }
  0xb1   : > { %v489_v12 = vpop.f32.mrf.mxu3  ;;  %v481_v14 = vpop.f32.mrf.mxu1 }
  0xb2   : > { %v3359_v13 = vadd.f32 %v489_v12, %v388_v7  ;;  %v482_v18 = vadd.f32 %v481_v14, %v380_v15 }
  0xb6   : > { %v390_v27 = vpop.f32.mrf.mxu2 }
  0xb8   : > { %v383_v36 = vpop.f32.mrf.mxu0 }
  0xb9   : > { %v491_v28 = vpop.f32.mrf.mxu3  ;;  %v484_v32 = vpop.f32.mrf.mxu1 }
  0xba   : > { %v492_v31 = vadd.f32 %v491_v28, %v390_v27  ;;  %v485_v33 = vadd.f32 %v484_v32, %v383_v36 }
  0xbb   : > { %1383 = vmatmul.bf16.gmra.mxu2 %v2511_v29 }
  0xbc   : > { %1948 = vmatmul.bf16.gmra.mxu1 %v2695_v30 }
  0xbe   : > { %1517 = vmatmul.bf16.gmra.mxu3 %v2583_v34  ;;  %1763 = vmatmul.bf16.gmra.mxu0 %v1687_v35  ;;  %v393_v37 = vpop.f32.mrf.mxu2 }
  0xc0   : > { %v385_v41 = vpop.f32.mrf.mxu0 }
  0xc1   : > { %v494_v38 = vpop.f32.mrf.mxu3  ;;  %v486_v40 = vpop.f32.mrf.mxu1 }
  0xc2   : > { %v495_v39 = vadd.f32 %v494_v38, %v393_v37  ;;  %v487_v42 = vadd.f32 %v486_v40, %v385_v41 }
  0xc6   : > { %v395_v43 = vpop.f32.mrf.mxu2 }
  0xc9   : > { %v496_v44 = vpop.f32.mrf.mxu3  ;;  %v1234_v46 = vpop.f32.mrf.mxu1 }
  0xca   : > { %v497_v45 = vadd.f32 %v496_v44, %v395_v43 }
  0xcb   : > { %v988_v47 = vpop.f32.mrf.mxu0 }
  0xce   : > { %v720_v48 = vpop.f32.mrf.mxu2 }
  0xcf   : > { %v740_v49 = vadd.f32 %v720_v48, %v480_v6 }
  0xd1   : > { %v854_v50 = vpop.f32.mrf.mxu3  ;;  %v1236_v51 = vpop.f32.mrf.mxu1 }
  0xd2   : > { %v874_v52 = vadd.f32 %v854_v50, %v740_v49 }
  0xd3   : > { %v990_v53 = vpop.f32.mrf.mxu0 }
  0xd4   : > { %v1008_v54 = vadd.f32 %v988_v47, %v874_v52 }
  0xd6   : > { %v1254_v55 = vadd.f32 %v1234_v46, %v1008_v54  ;;  %v722_v56 = vpop.f32.mrf.mxu2 }
  0xd7   : > { %v741_v57 = vadd.f32 %v722_v56, %v482_v18 }
  0xd9   : > { %v856_v58 = vpop.f32.mrf.mxu3  ;;  %v1239_v59 = vpop.f32.mrf.mxu1 }
  0xda   : > { %v875_v60 = vadd.f32 %v856_v58, %v741_v57 }
  0xdb   : > { %v993_v61 = vpop.f32.mrf.mxu0 }
  0xdc   : > { %v1009_v62 = vadd.f32 %v990_v53, %v875_v60 }
  0xde   : > { %v1255_v63 = vadd.f32 %v1236_v51, %v1009_v62  ;;  %v725_v0 = vpop.f32.mrf.mxu2 }
  0xdf   : > { %v742_v1 = vadd.f32 %v725_v0, %v485_v33 }
  0xe1   : > { %v859_v2 = vpop.f32.mrf.mxu3  ;;  %v1241_v3 = vpop.f32.mrf.mxu1 }
  0xe2   : > { %v876_v4 = vadd.f32 %v859_v2, %v742_v1 }
  0xe3   : > { %v995_v5 = vpop.f32.mrf.mxu0 }
  0xe4   : > { %v1010_v6 = vadd.f32 %v993_v61, %v876_v4 }
  0xe6   : > { %v3371_v7 = vadd.f32 %v1239_v59, %v1010_v6  ;;  %v727_v8 = vpop.f32.mrf.mxu2 }
  0xe7   : > { %v743_v9 = vadd.f32 %v727_v8, %v487_v42 }
  0xe9   : > { %v861_v10 = vpop.f32.mrf.mxu3  ;;  %v1244_v11 = vpop.f32.mrf.mxu1 }
  0xea   : > { %v877_v12 = vadd.f32 %v861_v10, %v743_v9 }
  0xeb   : > { %v998_v14 = vpop.f32.mrf.mxu0 }
  0xec   : > { %v1011_v15 = vadd.f32 %v995_v5, %v877_v12 }
  0xee   : > { %v3373_v16 = vadd.f32 %v1241_v3, %v1011_v15  ;;  %v730_v17 = vpop.f32.mrf.mxu2 }
  0xef   : > { %v744_v18 = vadd.f32 %v730_v17, %v3359_v13 }
  0xf1   : > { %v864_v19 = vpop.f32.mrf.mxu3  ;;  %v1246_v20 = vpop.f32.mrf.mxu1 }
  0xf2   : > { %v878_v21 = vadd.f32 %v864_v19, %v744_v18 }
  0xf3   : > { %v1000_v22 = vpop.f32.mrf.mxu0 }
  0xf4   : > { %v1012_v23 = vadd.f32 %v998_v14, %v878_v21 }
  0xf6   : > { %v3376_v24 = vadd.f32 %v1244_v11, %v1012_v23  ;;  %v732_v25 = vpop.f32.mrf.mxu2 }
  0xf7   : > { %v745_v26 = vadd.f32 %v732_v25, %v492_v31 }
  0xf9   : > { %v866_v27 = vpop.f32.mrf.mxu3  ;;  %v1249_v28 = vpop.f32.mrf.mxu1 }
  0xfa   : > { %v879_v29 = vadd.f32 %v866_v27, %v745_v26 }
  0xfb   : > { %v1003_v30 = vpop.f32.mrf.mxu0 }
  0xfc   : > { %v1013_v32 = vadd.f32 %v1000_v22, %v879_v29 }
  0xfe   : > { %v3378_v34 = vadd.f32 %v1246_v20, %v1013_v32  ;;  %v735_v35 = vpop.f32.mrf.mxu2 }
  0xff   : > { %v746_v36 = vadd.f32 %v735_v35, %v495_v39 }
 0x101   : > { %v869_v13 = vpop.f32.mrf.mxu3  ;;  %v1251_v33 = vpop.f32.mrf.mxu1 }
 0x102   : > { %v880_v37 = vadd.f32 %v869_v13, %v746_v36 }
 0x103   : > { %v1005_v38 = vpop.f32.mrf.mxu0 }
 0x104   : > { %v1014_v40 = vadd.f32 %v1003_v30, %v880_v37 }
 0x106   : > { %v3380_v41 = vadd.f32 %v1249_v28, %v1014_v40  ;;  %v737_v42 = vpop.f32.mrf.mxu2 }
 0x107   : > { %v747_v43 = vadd.f32 %v737_v42, %v497_v45 }
 0x109   : > { %v871_v31 = vpop.f32.mrf.mxu3  ;;  %v3382_v44 = vpop.f32.mrf.mxu1 }
 0x10a   : > { %v881_v46 = vadd.f32 %v871_v31, %v747_v43 }
 0x10b   : > { %v1749_v47 = vpop.f32.mrf.mxu0 }
 0x10c   : > { %v1015_v48 = vadd.f32 %v1005_v38, %v881_v46 }
 0x10e   : > { %v3385_v49 = vadd.f32 %v1251_v33, %v1015_v48  ;;  %v1369_v50 = vpop.f32.mrf.mxu2 }
 0x10f   : > { %v1389_v52 = vadd.f32 %v1369_v50, %v1254_v55 }
 0x111   : > { %v1503_v39 = vpop.f32.mrf.mxu3  ;;  %v1936_v51 = vpop.f32.mrf.mxu1 }
 0x112   : > { %v2863_v45 = vpack.c.bf16 %v1936_v51, %v3382_v44  ;;  %v1523_v54 = vadd.f32 %v1503_v39, %v1389_v52  ;;  %v1985_v33 = vmul.f32 %v1936_v51, %v1936_v51  ;;  %v1970_v40 = vadd.f32 %v1936_v51, %v3382_v44 }
 0x113   : > { %v1751_v53 = vpop.f32.mrf.mxu0 }
 0x114   : > { %2864 = vst [vmem:[%s3390_s6] sm:$0xff] %v2863_v45   ;;  %v1769_v60 = vadd.f32 %v1749_v47, %v1523_v54 }
 0x116   : > { %v1371_v56 = vpop.f32.mrf.mxu2  ;;  %v1807_v55 = vmul.f32 %v1769_v60, %v1769_v60 }
 0x117   : > { %v1390_v57 = vadd.f32 %v1371_v56, %v1255_v63 }
 0x119   : > { %v1505_v58 = vpop.f32.mrf.mxu3  ;;  %v1939_v59 = vpop.f32.mrf.mxu1 }
 0x11a   : > { %v1524_v61 = vadd.f32 %v1505_v58, %v1390_v57  ;;  %v1986_v38 = vmul.f32 %v1939_v59, %v1939_v59 }
 0x11b   : > { %v1754_v62 = vpop.f32.mrf.mxu0 }
 0x11c   : > { %v1770_v0 = vadd.f32 %v1751_v53, %v1524_v61 }
 0x11e   : > { %v2843_v1 = vpack.c.bf16 %v1770_v0, %v1769_v60  ;;  %v1793_v2 = vadd.f32 %v1770_v0, %v1769_v60  ;;  %v1808_v3 = vmul.f32 %v1770_v0, %v1770_v0  ;;  %v1374_v4 = vpop.f32.mrf.mxu2 }
 0x11f   : > { %v1391_v5 = vadd.f32 %v1374_v4, %v3371_v7 }
 0x120   : > { %2844 = vst [vmem:[%s3397_s9] sm:$0xff] %v2843_v1   ;;  %v1815_v63 = vadd.f32 %v1808_v3, %v1807_v55 }
 0x121   : > { %v1508_v6 = vpop.f32.mrf.mxu3  ;;  %v1941_v8 = vpop.f32.mrf.mxu1 }
 0x122   : > { %v1525_v9 = vadd.f32 %v1508_v6, %v1391_v5  ;;  %v2868_v10 = vpack.c.bf16 %v1941_v8, %v1939_v59  ;;  %v1987_v46 = vmul.f32 %v1941_v8, %v1941_v8 }
 0x123   : > { %v1756_v11 = vpop.f32.mrf.mxu0 }
 0x124   : > { %v1771_v12 = vadd.f32 %v1754_v62, %v1525_v9  ;;  %2883 = vst [vmem:[%s3390_s6 + $0x8] sm:$0xff] %v2868_v10  }
 0x126   : > { %v1794_v14 = vadd.f32 %v1793_v2, %v1771_v12  ;;  %v1809_v15 = vmul.f32 %v1771_v12, %v1771_v12  ;;  %v1376_v17 = vpop.f32.mrf.mxu2 }
 0x127   : > { %v1392_v19 = vadd.f32 %v1376_v17, %v3373_v16  ;;  %v1984_v16 = vmul.f32 %v3382_v44, %v3382_v44 }
 0x128   : > { %v1816_v18 = vadd.f32 %v1815_v63, %v1809_v15 }
 0x129   : > { %v1510_v20 = vpop.f32.mrf.mxu3  ;;  %v1944_v21 = vpop.f32.mrf.mxu1  ;;  %v1992_v31 = vadd.f32 %v1985_v33, %v1984_v16 }
 0x12a   : > { %v1526_v22 = vadd.f32 %v1510_v20, %v1392_v19  ;;  %v1988_v53 = vmul.f32 %v1944_v21, %v1944_v21 }
 0x12b   : > { %v1759_v7 = vpop.f32.mrf.mxu0  ;;  %v1993_v45 = vadd.f32 %v1992_v31, %v1986_v38 }
 0x12c   : > { %v1772_v23 = vadd.f32 %v1756_v11, %v1526_v22 }
 0x12d   : > { %v1994_v58 = vadd.f32 %v1993_v45, %v1987_v46 }
 0x12e   : > { %v2848_v25 = vpack.c.bf16 %v1772_v23, %v1771_v12  ;;  %v1795_v26 = vadd.f32 %v1794_v14, %v1772_v23  ;;  %v1810_v27 = vmul.f32 %v1772_v23, %v1772_v23  ;;  %v1379_v28 = vpop.f32.mrf.mxu2 }
 0x12f   : > { %v1393_v30 = vadd.f32 %v1379_v28, %v3376_v24  ;;  %v1971_v24 = vadd.f32 %v1970_v40, %v1939_v59  ;;  %v1995_v61 = vadd.f32 %v1994_v58, %v1988_v53 }
 0x130   : > { %2880 = vst [vmem:[%s3397_s9 + $0x8] sm:$0xff] %v2848_v25   ;;  %v1817_v29 = vadd.f32 %v1816_v18, %v1810_v27 }
 0x131   : > { %v1513_v32 = vpop.f32.mrf.mxu3  ;;  %v1946_v35 = vpop.f32.mrf.mxu1  ;;  %v1972_v56 = vadd.f32 %v1971_v24, %v1941_v8 }
 0x132   : > { %v1527_v36 = vadd.f32 %v1513_v32, %v1393_v30  ;;  %v2873_v13 = vpack.c.bf16 %v1946_v35, %v1944_v21  ;;  %v1989_v60 = vmul.f32 %v1946_v35, %v1946_v35 }
 0x133   : > { %v1761_v47 = vpop.f32.mrf.mxu0  ;;  %v1973_v44 = vadd.f32 %v1972_v56, %v1944_v21 }
 0x134   : > { %v1773_v37 = vadd.f32 %v1759_v7, %v1527_v36  ;;  %2884 = vst [vmem:[%s3390_s6 + $0x10] sm:$0xff] %v2873_v13   ;;  %v1996_v2 = vadd.f32 %v1995_v61, %v1989_v60 }
 0x135   : > { %v1974_v0 = vadd.f32 %v1973_v44, %v1946_v35 }
 0x136   : > { %v1796_v42 = vadd.f32 %v1795_v26, %v1773_v37  ;;  %v1811_v43 = vmul.f32 %v1773_v37, %v1773_v37  ;;  %v1381_v48 = vpop.f32.mrf.mxu2 }
 0x137   : > { %v1394_v39 = vadd.f32 %v1381_v48, %v3378_v34 }
 0x138   : > { %v1818_v50 = vadd.f32 %v1817_v29, %v1811_v43 }
 0x139   : > { %v1515_v52 = vpop.f32.mrf.mxu3  ;;  %v1949_v54 = vpop.f32.mrf.mxu1 }
 0x13a   : > { %v1528_v57 = vadd.f32 %v1515_v52, %v1394_v39  ;;  %v1990_v62 = vmul.f32 %v1949_v54, %v1949_v54  ;;  %v1975_v4 = vadd.f32 %v1974_v0, %v1949_v54 }
 0x13b   : > { %v1764_v8 = vpop.f32.mrf.mxu0 }
 0x13c   : > { %v1774_v51 = vadd.f32 %v1761_v47, %v1528_v57  ;;  %v1997_v6 = vadd.f32 %v1996_v2, %v1990_v62 }
 0x13e   : > { %v2853_v55 = vpack.c.bf16 %v1774_v51, %v1773_v37  ;;  %v1797_v1 = vadd.f32 %v1796_v42, %v1774_v51  ;;  %v1812_v59 = vmul.f32 %v1774_v51, %v1774_v51  ;;  %v1384_v34 = vpop.f32.mrf.mxu2 }
 0x13f   : > { %v1395_v63 = vadd.f32 %v1384_v34, %v3380_v41 }
 0x140   : > { %2881 = vst [vmem:[%s3397_s9 + $0x10] sm:$0xff] %v2853_v55   ;;  %v1819_v3 = vadd.f32 %v1818_v50, %v1812_v59 }
 0x141   : > { %v1518_v5 = vpop.f32.mrf.mxu3  ;;  %v1951_v9 = vpop.f32.mrf.mxu1 }
 0x142   : > { %v1529_v10 = vadd.f32 %v1518_v5, %v1395_v63  ;;  %v2878_v11 = vpack.c.bf16 %v1951_v9, %v1949_v54  ;;  %v1976_v12 = vadd.f32 %v1975_v4, %v1951_v9  ;;  %v1991_v14 = vmul.f32 %v1951_v9, %v1951_v9 }
 0x143   : > { %v1766_v32 = vpop.f32.mrf.mxu0 }
 0x144   : > { %v1775_v15 = vadd.f32 %v1764_v8, %v1529_v10  ;;  %2885 = vst [vmem:[%s3390_s6 + $0x18] sm:$0xff] %v2878_v11   ;;  %v1977_v17 = vrot.slane %v1976_v12, 4  ;;  %v1998_v18 = vadd.f32 %v1997_v6, %v1991_v14 }
 0x146   : > { %v1798_v19 = vadd.f32 %v1797_v1, %v1775_v15  ;;  %v1813_v20 = vmul.f32 %v1775_v15, %v1775_v15  ;;  %v1978_v21 = vadd.f32 %v1977_v17, %v1976_v12  ;;  %v1999_v22 = vrot.slane %v1998_v18, 4  ;;  %v1386_v23 = vpop.f32.mrf.mxu2 }
 0x147   : > { %v1396_v26 = vadd.f32 %v1386_v23, %v3385_v49 }
 0x148   : > { %v1820_v7 = vadd.f32 %v1819_v3, %v1813_v20  ;;  %v1979_v41 = vrot.slane %v1978_v21, 2  ;;  %v2000_v25 = vadd.f32 %v1999_v22, %v1998_v18 }
 0x149   : > { %v1520_v27 = vpop.f32.mrf.mxu3 }
 0x14a   : > { %v1980_v28 = vadd.f32 %v1979_v41, %v1978_v21  ;;  %v2001_v29 = vrot.slane %v2000_v25, 2  ;;  %v1530_v30 = vadd.f32 %v1520_v27, %v1396_v26 }
 0x14c   : > { %v1981_v35 = vrot.slane %v1980_v28, 1  ;;  %v2002_v36 = vadd.f32 %v2001_v29, %v2000_v25  ;;  %v1776_v13 = vadd.f32 %v1766_v32, %v1530_v30 }
 0x14e   : > { %v1982_v16 = vadd.f32 %v1981_v35, %v1980_v28  ;;  %v2003_v33 = vrot.slane %v2002_v36, 1  ;;  %v2858_v37 = vpack.c.bf16 %v1776_v13, %v1775_v15  ;;  %v1799_v38 = vadd.f32 %v1798_v19, %v1776_v13 }
 0x14f   : > { %v1814_v40 = vmul.f32 %v1776_v13, %v1776_v13 }
 0x150   : > { %1983 = vst [vmem:[%s247_s13 + $0x2] sm:$0x1] %v1982_v16  ;;  %v2004_v49 = vadd.f32 %v2003_v33, %v2002_v36  ;;  %v1800_v42 = vrot.slane %v1799_v38, 4 }
 0x151   : > { %2882 = vst [vmem:[%s3397_s9 + $0x18] sm:$0xff] %v2858_v37   ;;  %v1821_v43 = vadd.f32 %v1820_v7, %v1814_v40 }
 0x152   : > { %2005 = vst [vmem:[%s247_s13 + $0x3] sm:$0x1] %v2004_v49  ;;  %v1801_v31 = vadd.f32 %v1800_v42, %v1799_v38 }
 0x153   : > { %v1822_v46 = vrot.slane %v1821_v43, 4 }
 0x154   : > { %v1802_v47 = vrot.slane %v1801_v31, 2 }
 0x155   : > { %v1823_v48 = vadd.f32 %v1822_v46, %v1821_v43 }
 0x156   : > { %v1803_v24 = vadd.f32 %v1802_v47, %v1801_v31 }
 0x157   : > { %v1824_v50 = vrot.slane %v1823_v48, 2 }
 0x158   : > { %v1804_v39 = vrot.slane %v1803_v24, 1 }
 0x159   : > { %v1825_v52 = vadd.f32 %v1824_v50, %v1823_v48 }
 0x15a   : > { %v1805_v45 = vadd.f32 %v1804_v39, %v1803_v24 }
 0x15b   : > { %v1826_v53 = vrot.slane %v1825_v52, 1 }
 0x15c   : > { %1806 = vst [vmem:[%s247_s13] sm:$0x1] %v1805_v45 }
 0x15d   : > { %v1827_v54 = vadd.f32 %v1826_v53, %v1825_v52 }
 0x15f   : > { %1828 = vst [vmem:[%s247_s13 + $0x1] sm:$0x1] %v1827_v54 }
 0x160 PF: > { %s16_s18 = sadd.s32 1, %s2917_s18  }
 0x161   : > { %p13_p4 = scmp.ge.s32.totalorder %s16_s18, 4  }
 0x163   :  { %15 = sbr.rel (!%p13_p4) target bundleno = 1 (0x1), region = 95 }

// kernel: basic_block_forward.4
= control target key start
LH: loop header
LB: loop body
LE: loop exit
PB: predicated region body
PF: predicated region fallthrough
CT: control target
= control target key end

     0   :  { %s3022_s21 = smov 0   ;;  %s3671_s0 = inlined_call_operand.vmem [shape: bf16[2,64,128], index: 0, kind: input, shape index: {}]   ;;  %s3672_s1 = inlined_call_operand.vmem [shape: f32[2,4,128], index: 1, kind: input, shape index: {}]   ;;  %s3673_s2 = inlined_call_operand.vmem [shape: f32[1,128], index: 2, kind: input, shape index: {}]   ;;  %s3674_s3 = inlined_call_operand.vmem [shape: f32[1,128], index: 3, kind: input, shape index: {}]   ;;  %s3675_s4 = inlined_call_operand.vmem [shape: bf16[9,128,128], index: 4, kind: input, shape index: {}]   ;;  %s3676_s5 = inlined_call_operand.vmem [shape: bf16[2,64,128], index: 5, kind: output, shape index: {0}]   ;;  %s3677_s6 = inlined_call_operand.vmem [shape: f32[2,2,128], index: 6, kind: output, shape index: {1}]  }
   0x1 LB: > { %s2323_s22 = sadd.s32 4294967295, %s2984_s21   ;;  %p2327_p0 = scmp.ge.s32.totalorder %s2984_s21, 1  ;;  %s2984_s21 = sphi %s3022_s21, %s17_s21  }
   0x2   : > { %p215_p1 = scmp.lt.s32.totalorder %s2984_s21, 3 }
   0x4   : > { %p216_p2 = pnand %p2327_p0, %p215_p1 }
   0x5   : > { %p249_p3 = scmp.lt.s32.totalorder (!%p216_p2), %s2323_s22, 1 }
   0x6   : > { %219 = sbr.rel (%p216_p2) target bundleno = 402 (0x192), region = 40 }
   0xb   : > { %v2844_v0 = vld [vmem:[%s3675_s4 + $0x78] sm:$0xff]  ;;  %v2843_v2 = vld [vmem:[%s3675_s4 + $0x70] sm:$0xff]  ;;  %vm266_vm0 = vcmask 1043456   ;;  %v264_v6 = vld [vmem:[%s3672_s1] sm:$0xf]  ;;  %vm350_vm1 = vcmask 1040384  }
   0xc   : > { %v2852_v1 = vld [vmem:[%s3675_s4 + $0xb8] sm:$0xff]  ;;  %2951 = vmatpush.bf16.msra.mxu1 %v2844_v0  ;;  %769 = vmatpush.bf16.msra.mxu0 %v2844_v0  ;;  %v2851_v3 = vld [vmem:[%s3675_s4 + $0xb0] sm:$0xff]  ;;  %v2842_v7 = vld [vmem:[%s3675_s4 + $0x68] sm:$0xff]  ;;  %v267_v9 = vsel %vm266_vm0, %v264_v6, 0.0  ;;  %vm351_vm2 = vsmask.f32 256 }
   0xd   : > { %1039 = vmatpush.bf16.msra.mxu2 %v2852_v1  ;;  %v2864_v4 = vld [vmem:[%s3675_s4 + $0xf8] sm:$0xff]  ;;  %v2863_v5 = vld [vmem:[%s3675_s4 + $0xf0] sm:$0xff]  ;;  %v265_v8 = vld [vmem:[%s3672_s1 + $0x4] sm:$0xf]  ;;  %vm377_vm4 = vsmask.f32 7938 }
   0xe   : > { %1173 = vmatpush.bf16.msra.mxu3 %v2864_v4  ;;  %v2850_v10 = vld [vmem:[%s3675_s4 + $0xa8] sm:$0xff]  ;;  %v268_v11 = vsel %vm266_vm0, %v265_v8, 0.0  ;;  %v2841_v14 = vld [vmem:[%s3675_s4 + $0x60] sm:$0xff]  ;;  %v2840_v18 = vld [vmem:[%s3675_s4 + $0x58] sm:$0xff]  ;;  %s3689_s22 = smov (!%p249_p3, %s2323_s22), 1  ;;  %v2986_v54 = vmov 0  }
   0xf   : > { %v269_v12 = vadd.f32 %v268_v11, %v267_v9  ;;  %v2862_v13 = vld [vmem:[%s3675_s4 + $0xe8] sm:$0xff]  ;;  %v2849_v16 = vld [vmem:[%s3675_s4 + $0xa0] sm:$0xff]  ;;  %v2848_v20 = vld [vmem:[%s3675_s4 + $0x98] sm:$0xff]  ;;  %s2823_s15 = sshll.u32 %s3689_s22, 5  ;;  %344 = vst [vmem:[#allocation2] sm:$0xf] %v2986_v54 }
  0x10   : > { %2952 = vmatpush.bf16.msra.mxu1 %v2843_v2  ;;  %770 = vmatpush.bf16.msra.mxu0 %v2843_v2  ;;  %v2839_v22 = vld [vmem:[%s3675_s4 + $0x50] sm:$0xff]  ;;  %v2838_v26 = vld [vmem:[%s3675_s4 + $0x48] sm:$0xff]  ;;  %v2837_v27 = vld [vmem:[%s3675_s4 + $0x40] sm:$0xff]  ;;  %s253_s18 = scalar_lea.vmem %s3671_s0, %s2823_s15  ;;  %345 = vst [vmem:[#allocation2 + $0x4] sm:$0x1] %v2986_v54  ;;  %vm923_vm12 = vcmask 1042432   ;;  %s3649_s8 = scalar_lea.vmem %s3676_s5, %s2823_s15 }
  0x11   : > { %1040 = vmatpush.bf16.msra.mxu2 %v2851_v3  ;;  %v3068_v15 = vmul.f32 0.0078125, %v269_v12  ;;  %v2847_v24 = vld [vmem:[%s3675_s4 + $0x90] sm:$0xff]  ;;  %vm3094_vm3 = vmand %vm350_vm1, %vm351_vm2  ;;  %v362_v29 = vld [vmem:[#allocation2 + $0x20] sm:$0x1]  ;;  %347 = vst [vmem:[#allocation2 + $0x48] sm:$0xf] %v2986_v54 }
  0x12   : > { %1174 = vmatpush.bf16.msra.mxu3 %v2863_v5  ;;  %v365_v30 = vld [vmem:[#allocation2 + $0x28] sm:$0x1]  ;;  %v363_v31 = vsel %vm3094_vm3, 0, %v362_v29  ;;  %vm3103_vm5 = vmand %vm350_vm1, %vm377_vm4  ;;  %v388_v34 = vld [vmem:[#allocation2 + $0x24] sm:$0x1]  ;;  %vm924_vm13 = vcmask 1046532  }
  0x13   : > { %v273_v17 = vmul.f32 %v3068_v15, %v3068_v15  ;;  %v366_v32 = vsel %vm3094_vm3, 0, %v365_v30  ;;  %v391_v35 = vld [vmem:[#allocation2 + $0x2c] sm:$0x1]  ;;  %364 = vst [vmem:[#allocation2 + $0x20] sm:$0x1] %v363_v31  ;;  %v389_v37 = vsel %vm3103_vm5, 0, %v388_v34  ;;  %vm3204_vm11 = vmand %vm266_vm0, %vm377_vm4 }
  0x14   : > { %2953 = vmatpush.bf16.msra.mxu1 %v2842_v7  ;;  %771 = vmatpush.bf16.msra.mxu0 %v2842_v7  ;;  %v392_v38 = vsel %vm3103_vm5, 0, %v391_v35  ;;  %367 = vst [vmem:[#allocation2 + $0x28] sm:$0x1] %v366_v32  ;;  %v353_v42 = vld [vmem:[#allocation2 + $0x8] sm:$0x1]  ;;  %v3130_v50 = vld [vmem:[%s253_s18 + $0x8] sm:$0xff]   ;;  %vm3255_vm14 = vmor %vm923_vm12, %vm924_vm13 }
  0x15   : > { %1041 = vmatpush.bf16.msra.mxu2 %v2850_v10  ;;  %v275_v19 = vrot.slane %v273_v17, 7  ;;  %390 = vst [vmem:[#allocation2 + $0x24] sm:$0x1] %v389_v37  ;;  %v354_v44 = vsel %vm3094_vm3, 0, %v353_v42  ;;  %v379_v46 = vld [vmem:[#allocation2 + $0xc] sm:$0x1]  ;;  %v2916_v59 = vunpack.c.h.bf16 %v3130_v50  ;;  %v2915_v32 = vunpack.c.l.bf16 %v3130_v50 }
  0x16   : > { %1175 = vmatpush.bf16.msra.mxu3 %v2862_v13  ;;  %393 = vst [vmem:[#allocation2 + $0x2c] sm:$0x1] %v392_v38  ;;  %v380_v48 = vsel %vm3103_vm5, 0, %v379_v46  ;;  %v270_v49 = vld [vmem:[%s3673_s2] sm:$0x1]  ;;  %v2946_v52 = vld [vmem:[%s253_s18 + $0x10] sm:$0xff]  }
  0x17   : > { %v277_v21 = vsub.f32 %v3068_v15, %v275_v19  ;;  %355 = vst [vmem:[#allocation2 + $0x8] sm:$0x1] %v354_v44  ;;  %v368_v51 = vld [vmem:[#allocation2 + $0x30] sm:$0x1]  ;;  %v3132_v53 = vld [vmem:[%s253_s18] sm:$0xff]   ;;  %v2919_v62 = vunpack.c.l.bf16 %v2946_v52  ;;  %v2920_v2 = vunpack.c.h.bf16 %v2946_v52  ;;  %v2874_v28 = vld [vmem:[%s3675_s4 + $0x148] sm:$0xff] }
  0x18   : > { %2954 = vmatpush.bf16.msra.mxu1 %v2841_v14  ;;  %772 = vmatpush.bf16.msra.mxu0 %v2841_v14  ;;  %381 = vst [vmem:[#allocation2 + $0xc] sm:$0x1] %v380_v48  ;;  %v371_v55 = vld [vmem:[#allocation2 + $0x38] sm:$0x1]  ;;  %v3134_v56 = vld [vmem:[%s253_s18 + $0x18] sm:$0xff]   ;;  %v369_v60 = vsel %vm3094_vm3, 0, %v368_v51  ;;  %v2911_v63 = vunpack.c.l.bf16 %v3132_v53 }
  0x19   : > { %1042 = vmatpush.bf16.msra.mxu2 %v2849_v16  ;;  %v278_v23 = vmax.f32 %v277_v21, 0.0  ;;  %v271_v57 = vld [vmem:[%s3674_s3] sm:$0x1]  ;;  %v372_v0 = vsel %vm3094_vm3, 0, %v371_v55  ;;  %v394_v1 = vld [vmem:[#allocation2 + $0x34] sm:$0x1]  ;;  %v2923_v3 = vunpack.c.l.bf16 %v3134_v56 }
  0x1a   : > { %348 = vst [vmem:[#allocation2 + $0x4c] sm:$0x1] %v2986_v54  ;;  %v395_v4 = vsel %vm3103_vm5, 0, %v394_v1  ;;  %v397_v5 = vld [vmem:[#allocation2 + $0x3c] sm:$0x1]  ;;  %v2836_v38 = vld [vmem:[%s3675_s4 + $0x38] sm:$0xff] }
  0x1b   : > { %v279_v25 = vadd.f32 1e-05, %v278_v23  ;;  %370 = vst [vmem:[#allocation2 + $0x30] sm:$0x1] %v369_v60  ;;  %v398_v8 = vsel %vm3103_vm5, 0, %v397_v5  ;;  %v2835_v48 = vld [vmem:[%s3675_s4 + $0x30] sm:$0xff] }
  0x1c   : > { %2955 = vmatpush.bf16.msra.mxu1 %v2840_v18  ;;  %773 = vmatpush.bf16.msra.mxu0 %v2840_v18  ;;  %v356_v9 = vld [vmem:[#allocation2 + $0x10] sm:$0x1]  ;;  %373 = vst [vmem:[#allocation2 + $0x38] sm:$0x1] %v372_v0  ;;  %v359_v11 = vld [vmem:[#allocation2 + $0x18] sm:$0x1] }
  0x1d   : > { %1043 = vmatpush.bf16.msra.mxu2 %v2848_v20  ;;  %2976 = vrsqrt.f32 %v279_v25  ;;  %vm286_vm6 = vweird.f32 %v279_v25  ;;  %v357_v10 = vsel %vm3094_vm3, 0, %v356_v9  ;;  %396 = vst [vmem:[#allocation2 + $0x34] sm:$0x1] %v395_v4  ;;  %v360_v20 = vsel %vm3094_vm3, 0, %v359_v11  ;;  %v382_v21 = vld [vmem:[#allocation2 + $0x14] sm:$0x1] }
  0x1e   : > { %399 = vst [vmem:[#allocation2 + $0x3c] sm:$0x1] %v398_v8  ;;  %v2872_v0 = vld [vmem:[%s3675_s4 + $0x138] sm:$0xff]  ;;  %vm573_vm9 = vsmask.f32 3328  ;;  %v2834_v11 = vld [vmem:[%s3675_s4 + $0x28] sm:$0xff] }
  0x1f   : > { %358 = vst [vmem:[#allocation2 + $0x10] sm:$0x1] %v357_v10  ;;  %vm574_vm10 = vsmask.f32 7440  ;;  %v3198_v4 = vld [vmem:[#allocation2 + $0x4] sm:$0x1] }
  0x20   : > { %2956 = vmatpush.bf16.msra.mxu1 %v2839_v22  ;;  %774 = vmatpush.bf16.msra.mxu0 %v2839_v22  ;;  %361 = vst [vmem:[#allocation2 + $0x18] sm:$0x1] %v360_v20  ;;  %v493_v10 = vld [vmem:[#allocation2 + $0x8] sm:$0xf]  ;;  %v496_v20 = vld [vmem:[#allocation2 + $0xc] sm:$0x1]  ;;  %vm3265_vm15 = vmor %vm573_vm9, %vm574_vm10 }
  0x21   : > { %1044 = vmatpush.bf16.msra.mxu2 %v2847_v24  ;;  %v2912_v24 = vunpack.c.h.bf16 %v3132_v53  ;;  %s2332_s15 = sshll.u32 %s3689_s22, 1 }
  0x22   : > { %s262_s11 = scalar_lea.vmem %s3677_s6, %s2332_s15 }
  0x23   : > { %v2977_v36 = vpop.eup %2976 }
  0x24   : > { %2957 = vmatpush.bf16.msra.mxu1 %v2838_v26  ;;  %775 = vmatpush.bf16.msra.mxu0 %v2838_v26  ;;  %v281_v39 = vmul.f32 %v2977_v36, %v279_v25  ;;  %vm287_vm7 = vweird.f32 %v2977_v36  ;;  %v383_v25 = vsel %vm3103_vm5, 0, %v382_v21  ;;  %v2859_v21 = vld [vmem:[%s3675_s4 + $0xd0] sm:$0xff] }
  0x25   : > { %vm288_vm8 = vmor %vm286_vm6, %vm287_vm7  ;;  %384 = vst [vmem:[#allocation2 + $0x14] sm:$0x1] %v383_v25  ;;  %v586_v25 = vshll.u32 %v3198_v4, 16 }
  0x26   : > { %v282_v40 = vmul.f32 %v2977_v36, %v281_v39  ;;  %v2846_v39 = vld [vmem:[%s3675_s4 + $0x88] sm:$0xff] }
  0x27   : > { %1045 = vmatpush.bf16.msra.mxu2 %v2846_v39  ;;  %v2858_v39 = vld [vmem:[%s3675_s4 + $0xc8] sm:$0xff] }
  0x28   : > { %2958 = vmatpush.bf16.msra.mxu1 %v2837_v27  ;;  %776 = vmatpush.bf16.msra.mxu0 %v2837_v27  ;;  %v283_v41 = vmul.f32 0.5, %v282_v40 }
  0x2a   : > { %v284_v43 = vsub.f32 1.5, %v283_v41 }
  0x2c   : > { %v285_v45 = vmul.f32 %v2977_v36, %v284_v43  ;;  %870 = vmatpush.bf16.msrb.mxu1 %v2836_v38  ;;  %1419 = vmatpush.bf16.msrb.mxu0 %v2872_v0  ;;  %v2833_v38 = vld [vmem:[%s3675_s4 + $0x20] sm:$0xff] }
  0x2e   : > { %v289_v47 = vsel %vm288_vm8, %v2977_v36, %v285_v45  ;;  %v2861_v45 = vld [vmem:[%s3675_s4 + $0xe0] sm:$0xff] }
  0x2f   : > { %291 = vst [vmem:[#allocation1] sm:$0xff] %v289_v47  ;;  %1176 = vmatpush.bf16.msra.mxu3 %v2861_v45 }
  0x30   : > { %871 = vmatpush.bf16.msrb.mxu1 %v2835_v48 }
  0x34   : > { %872 = vmatpush.bf16.msrb.mxu1 %v2834_v11  ;;  %v2892_v11 = vld [vmem:[%s3675_s4 + $0x1b8] sm:$0xff] }
  0x36   : > { %v293_v58 = vld [vmem:[#allocation1 + $0x1] ss:$9 sm:$0xff] }
  0x37   : > { %v295_v61 = vmul.f32 %v293_v58, %v270_v49  ;;  %v2845_v49 = vld [vmem:[%s3675_s4 + $0x80] sm:$0xff]  ;;  %v514_v58 = vld [vmem:[#allocation2 + $0x24] sm:$0x1] }
  0x38   : > { %1046 = vmatpush.bf16.msra.mxu2 %v2845_v49  ;;  %v588_v49 = vrot.slane %v586_v25, 5  ;;  %873 = vmatpush.bf16.msrb.mxu1 %v2833_v38 }
  0x39   : > { %v296_v6 = vmul.f32 %v295_v61, %v3068_v15  ;;  %v3149_v7 = vperm.slane %v295_v61, 0  ;;  %v541_v15 = vld [vmem:[#allocation2] sm:$0xf] }
  0x3a   : > { %v577_v22 = vshrl.u32 %v541_v15, 16  ;;  %v580_v23 = vshll.u32 %v541_v15, 16 }
  0x3b   : > { %v297_v12 = vsub.f32 %v271_v57, %v296_v6  ;;  %v320_v13 = vmul.f32 %v2916_v59, %v3149_v7  ;;  %v321_v14 = vmul.f32 %v2919_v62, %v3149_v7  ;;  %v317_v16 = vmul.f32 %v2911_v63, %v3149_v7  ;;  %v511_v57 = vld [vmem:[#allocation2 + $0x20] sm:$0xf]  ;;  %v517_v59 = vld [vmem:[#allocation2 + $0x28] sm:$0xf]  ;;  %v2860_v63 = vld [vmem:[%s3675_s4 + $0xd8] sm:$0xff] }
  0x3c   : > { %v322_v17 = vmul.f32 %v2920_v2, %v3149_v7  ;;  %v323_v18 = vmul.f32 %v2923_v3, %v3149_v7  ;;  %v579_v40 = vrot.slane %v577_v22, 4  ;;  %v582_v41 = vrot.slane %v580_v23, 5  ;;  %v520_v3 = vld [vmem:[#allocation2 + $0x2c] sm:$0x1]  ;;  %1177 = vmatpush.bf16.msra.mxu3 %v2860_v63  ;;  %1728 = vmatpush.bf16.msrb.mxu2 %v2892_v11 }
  0x3d   : > { %v3160_v19 = vperm.slane %v297_v12, 0  ;;  %v318_v42 = vmul.f32 %v2912_v24, %v3149_v7  ;;  %v319_v51 = vmul.f32 %v2915_v32, %v3149_v7  ;;  %v2871_v22 = vld [vmem:[%s3675_s4 + $0x130] sm:$0xff] }
  0x3e   : > { %v583_v62 = vor.u32 %v582_v41, %v579_v40  ;;  %v2870_v40 = vld [vmem:[%s3675_s4 + $0x128] sm:$0xff]  ;;  %1420 = vmatpush.bf16.msrb.mxu0 %v2871_v22 }
  0x3f   : > { %v331_v26 = vadd.f32 %v3160_v19, %v320_v13  ;;  %v332_v27 = vadd.f32 %v3160_v19, %v321_v14  ;;  %v328_v29 = vadd.f32 %v3160_v19, %v317_v16  ;;  %v333_v30 = vadd.f32 %v3160_v19, %v322_v17 }
  0x40   : > { %v334_v31 = vadd.f32 %v3160_v19, %v323_v18  ;;  %v329_v6 = vadd.f32 %v3160_v19, %v318_v42  ;;  %v330_v14 = vadd.f32 %v3160_v19, %v319_v51  ;;  %v3226_v32 = vrot.slane %v583_v62, 4  ;;  %1178 = vmatpush.bf16.msra.mxu3 %v2859_v21  ;;  %v2869_v21 = vld [vmem:[%s3675_s4 + $0x120] sm:$0xff] }
  0x41   : > { %v339_v34 = vmax.f32 %v331_v26, 0.0  ;;  %v340_v35 = vmax.f32 %v332_v27, 0.0  ;;  %v336_v36 = vmax.f32 %v328_v29, 0.0  ;;  %v341_v37 = vmax.f32 %v333_v30, 0.0  ;;  %v523_v27 = vld [vmem:[#allocation2 + $0x30] sm:$0xf] }
  0x42   : > { %v342_v50 = vmax.f32 %v334_v31, 0.0  ;;  %1421 = vmatpush.bf16.msrb.mxu0 %v2870_v40  ;;  %v2831_v40 = vld [vmem:[%s3675_s4 + $0x10] sm:$0xff] }
  0x43   : > { %v406_v43 = vpack.c.bf16 %v339_v34, %v339_v34  ;;  %v407_v44 = vpack.c.bf16 %v340_v35, %v340_v35  ;;  %v403_v46 = vpack.c.bf16 %v336_v36, %v336_v36  ;;  %v3183_v47 = vpack.c.bf16 %v341_v37, %v341_v37  ;;  %v899_v34 = vld [vmem:[#allocation2] sm:$0xe]  ;;  %v526_v35 = vld [vmem:[#allocation2 + $0x34] sm:$0x1] }
  0x44   : > { %v409_v12 = vpack.c.bf16 %v342_v50, %v342_v50  ;;  %1179 = vmatpush.bf16.msra.mxu3 %v2858_v39 }
  0x45   : > { %v436_v52 = vshrl.u32 %v406_v43, 16  ;;  %v439_v53 = vshll.u32 %v406_v43, 16  ;;  %v444_v54 = vshrl.u32 %v407_v44, 16  ;;  %v447_v55 = vshll.u32 %v407_v44, 16  ;;  %v3241_v43 = vld [vmem:[#allocation2 + $0x1c] sm:$0x1] }
  0x46   : > { %v412_v60 = vshrl.u32 %v403_v46, 16  ;;  %v415_v61 = vshll.u32 %v403_v46, 16  ;;  %v452_v5 = vshrl.u32 %v3183_v47, 16  ;;  %v455_v13 = vshll.u32 %v3183_v47, 16  ;;  %1422 = vmatpush.bf16.msrb.mxu0 %v2869_v21 }
  0x47   : > { %v438_v1 = vrot.slane %v436_v52, 7  ;;  %v446_v2 = vrot.slane %v444_v54, 7  ;;  %v460_v44 = vshrl.u32 %v409_v12, 16  ;;  %v463_v45 = vshll.u32 %v409_v12, 16  ;;  %v529_v52 = vld [vmem:[#allocation2 + $0x38] sm:$0xf] }
  0x48   : > { %v414_v9 = vrot.slane %v412_v60, 7  ;;  %v454_v26 = vrot.slane %v452_v5, 7  ;;  %v337_v46 = vmax.f32 %v329_v6, 0.0  ;;  %v338_v47 = vmax.f32 %v330_v14, 0.0  ;;  %v2857_v12 = vld [vmem:[%s3675_s4 + $0xc0] sm:$0xff] }
  0x49   : > { %v441_v16 = vor.u32 %v439_v53, %v438_v1  ;;  %v442_v15 = vrot.slane %v438_v1, 4  ;;  %v449_v17 = vor.u32 %v447_v55, %v446_v2  ;;  %v450_v18 = vrot.slane %v446_v2, 4  ;;  %v2832_v2 = vld [vmem:[%s3675_s4 + $0x18] sm:$0xff]  ;;  %1180 = vmatpush.bf16.msra.mxu3 %v2857_v12 }
  0x4a   : > { %v417_v23 = vor.u32 %v415_v61, %v414_v9  ;;  %v418_v24 = vrot.slane %v414_v9, 4  ;;  %v457_v41 = vor.u32 %v455_v13, %v454_v26  ;;  %v458_v42 = vrot.slane %v454_v26, 4  ;;  %874 = vmatpush.bf16.msrb.mxu1 %v2832_v2 }
  0x4b   : > { %v512_v29 = vsel %vm3204_vm11, %v441_v16, %v511_v57  ;;  %v515_v30 = vsel %vm3094_vm3, %v442_v15, %v514_v58  ;;  %v518_v31 = vsel %vm3204_vm11, %v449_v17, %v517_v59  ;;  %v521_v36 = vsel %vm3094_vm3, %v450_v18, %v520_v3  ;;  %v532_v59 = vld [vmem:[#allocation2 + $0x3c] sm:$0x1] }
  0x4c   : > { %513 = vst [vmem:[#allocation2 + $0x20] sm:$0xf] %v512_v29  ;;  %v494_v37 = vsel %vm3204_vm11, %v417_v23, %v493_v10  ;;  %v497_v48 = vsel %vm3094_vm3, %v418_v24, %v496_v20  ;;  %v462_v50 = vrot.slane %v460_v44, 7  ;;  %v524_v51 = vsel %vm3204_vm11, %v457_v41, %v523_v27 }
  0x4d   : > { %516 = vst [vmem:[#allocation2 + $0x24] sm:$0x1] %v515_v30  ;;  %v3247_v53 = vpack.c.bf16 %v337_v46, %v337_v46  ;;  %v3249_v54 = vpack.c.bf16 %v338_v47, %v338_v47  ;;  %v2429_v55 = vrot.slane %v899_v34, 9  ;;  %v928_v57 = vrot.slane %v3198_v4, 5 }
  0x4e   : > { %519 = vst [vmem:[#allocation2 + $0x28] sm:$0xf] %v518_v31  ;;  %v527_v58 = vsel %vm3094_vm3, %v458_v42, %v526_v35  ;;  %v465_v61 = vor.u32 %v463_v45, %v462_v50  ;;  %v466_v62 = vrot.slane %v462_v50, 4  ;;  %v386_v63 = vsel %vm3103_vm5, 0, %v3241_v43  ;;  %875 = vmatpush.bf16.msrb.mxu1 %v2831_v40  ;;  %v499_v40 = vld [vmem:[#allocation2 + $0x10] sm:$0xf] }
  0x4f   : > { %522 = vst [vmem:[#allocation2 + $0x2c] sm:$0x1] %v521_v36  ;;  %v420_v0 = vshrl.u32 %v3247_v53, 16  ;;  %v423_v3 = vshll.u32 %v3247_v53, 16  ;;  %v428_v4 = vshrl.u32 %v3249_v54, 16  ;;  %v431_v5 = vshll.u32 %v3249_v54, 16 }
  0x50   : > { %495 = vst [vmem:[#allocation2 + $0x8] sm:$0xf] %v494_v37  ;;  %v530_v9 = vsel %vm3204_vm11, %v465_v61, %v529_v52  ;;  %v533_v10 = vsel %vm3094_vm3, %v466_v62, %v532_v59  ;;  %v589_v15 = vsel %vm3265_vm15, %v3226_v32, %v588_v49  ;;  %v3292_v17 = vsel %vm3255_vm14, %v2429_v55, %v928_v57  ;;  %v2890_v53 = vld [vmem:[%s3675_s4 + $0x1a8] sm:$0xff] }
  0x51   : > { %498 = vst [vmem:[#allocation2 + $0xc] sm:$0x1] %v497_v48  ;;  %v3301_v31 = vunpack.c.l.b16 %v589_v15  ;;  %v975_v34 = vunpack.c.l.b16 %v3292_v17  ;;  %v2830_v15 = vld [vmem:[%s3675_s4 + $0x8] sm:$0xff] }
  0x52   : > { %525 = vst [vmem:[#allocation2 + $0x30] sm:$0xf] %v524_v51  ;;  %876 = vmatpush.bf16.msrb.mxu1 %v2830_v15 }
  0x53   : > { %v545_v6 = vld [vmem:[#allocation2 + $0x20] sm:$0xf]  ;;  %528 = vst [vmem:[#allocation2 + $0x34] sm:$0x1] %v527_v58 }
  0x54   : > { %v3285_v13 = vld [vmem:[#allocation2 + $0x24] sm:$0x1]  ;;  %v633_v14 = vshrl.u32 %v545_v6, 16  ;;  %v636_v16 = vshll.u32 %v545_v6, 16  ;;  %531 = vst [vmem:[#allocation2 + $0x38] sm:$0xf] %v530_v9 }
  0x55   : > { %v546_v18 = vld [vmem:[#allocation2 + $0x28] sm:$0xf]  ;;  %v642_v20 = vshll.u32 %v3285_v13, 16  ;;  %534 = vst [vmem:[#allocation2 + $0x3c] sm:$0x1] %v533_v10 }
  0x56   : > { %v3298_v22 = vld [vmem:[#allocation2 + $0x2c] sm:$0x1]  ;;  %v635_v23 = vrot.slane %v633_v14, 4  ;;  %v638_v24 = vrot.slane %v636_v16, 5  ;;  %v647_v25 = vshrl.u32 %v546_v18, 16  ;;  %v650_v26 = vshll.u32 %v546_v18, 16 }
  0x57   : > { %v644_v27 = vrot.slane %v642_v20, 5  ;;  %v656_v29 = vshll.u32 %v3298_v22, 16  ;;  %v542_v30 = vld [vmem:[#allocation2 + $0x8] sm:$0xf]  ;;  %387 = vst [vmem:[#allocation2 + $0x1c] sm:$0x1] %v386_v63 }
  0x58   : > { %v900_v32 = vld [vmem:[#allocation2 + $0x8] sm:$0xe]  ;;  %v639_v35 = vor.u32 %v638_v24, %v635_v23  ;;  %v649_v36 = vrot.slane %v647_v25, 4  ;;  %v652_v37 = vrot.slane %v650_v26, 5  ;;  %v566_v38 = vld [vmem:[#allocation2 + $0xc] sm:$0x1] }
  0x59   : > { %v591_v39 = vshrl.u32 %v542_v30, 16  ;;  %v658_v41 = vrot.slane %v656_v29, 5  ;;  %v594_v42 = vshll.u32 %v542_v30, 16  ;;  %v600_v44 = vshll.u32 %v566_v38, 16  ;;  %v547_v46 = vld [vmem:[#allocation2 + $0x30] sm:$0xf] }
  0x5a   : > { %v2430_v45 = vrot.slane %v900_v32, 9  ;;  %v640_v47 = vrot.slane %v639_v35, 4  ;;  %v653_v48 = vor.u32 %v652_v37, %v649_v36  ;;  %v932_v50 = vrot.slane %v566_v38, 5  ;;  %v3307_v51 = vld [vmem:[#allocation2 + $0x34] sm:$0x1]  ;;  %v2891_v20 = vld [vmem:[%s3675_s4 + $0x1b0] sm:$0xff] }
  0x5b   : > { %v593_v49 = vrot.slane %v591_v39, 4  ;;  %v596_v52 = vrot.slane %v594_v42, 5  ;;  %v602_v55 = vrot.slane %v600_v44, 5  ;;  %v548_v57 = vld [vmem:[#allocation2 + $0x38] sm:$0xf]  ;;  %v661_v58 = vshrl.u32 %v547_v46, 16  ;;  %1729 = vmatpush.bf16.msrb.mxu2 %v2891_v20 }
  0x5c   : > { %v664_v59 = vshll.u32 %v547_v46, 16  ;;  %v645_v61 = vsel %vm3265_vm15, %v640_v47, %v644_v27  ;;  %v654_v62 = vrot.slane %v653_v48, 4  ;;  %v933_v2 = vsel %vm3255_vm14, %v2430_v45, %v932_v50  ;;  %v3318_v12 = vld [vmem:[#allocation2 + $0x3c] sm:$0x1]  ;;  %v2868_v16 = vld [vmem:[%s3675_s4 + $0x118] sm:$0xff]  ;;  %v2867_v26 = vld [vmem:[%s3675_s4 + $0x110] sm:$0xff] }
  0x5d   : > { %v670_v6 = vshll.u32 %v3307_v51, 16  ;;  %v709_v9 = vunpack.c.l.b16 %v645_v61  ;;  %v597_v10 = vor.u32 %v596_v52, %v593_v49  ;;  %v976_v11 = vunpack.c.l.b16 %v933_v2  ;;  %1423 = vmatpush.bf16.msrb.mxu0 %v2868_v16  ;;  %v2900_v27 = vld [vmem:[%s3675_s4 + $0x1f8] sm:$0xff]  ;;  %v505_v46 = vld [vmem:[#allocation2 + $0x18] sm:$0xf]  ;;  %v2866_v47 = vld [vmem:[%s3675_s4 + $0x108] sm:$0xff] }
  0x5e   : > { %v663_v14 = vrot.slane %v661_v58, 4  ;;  %v659_v17 = vsel %vm3265_vm15, %v654_v62, %v658_v41  ;;  %v666_v18 = vrot.slane %v664_v59, 5  ;;  %v675_v63 = vshrl.u32 %v548_v57, 16  ;;  %v502_v41 = vld [vmem:[#allocation2 + $0x14] sm:$0x1]  ;;  %1974 = vmatpush.bf16.msrb.mxu3 %v2900_v27  ;;  %v2865_v62 = vld [vmem:[%s3675_s4 + $0x100] sm:$0xff] }
  0x5f   : > { %v672_v43 = vrot.slane %v670_v6, 5  ;;  %v710_v21 = vunpack.c.l.b16 %v659_v17  ;;  %v598_v23 = vrot.slane %v597_v10, 4  ;;  %v983_v24 = vpack.c.b16 %v976_v11, %v975_v34  ;;  %v2829_v34 = vld [vmem:[%s3675_s4] sm:$0xff]  ;;  %1730 = vmatpush.bf16.msrb.mxu2 %v2890_v53  ;;  %v1210_v2 = vld [vmem:[#allocation2 + $0x8] sm:$0xf] }
  0x60   : > { %v678_v25 = vshll.u32 %v548_v57, 16  ;;  %v667_v29 = vor.u32 %v666_v18, %v663_v14  ;;  %v677_v30 = vrot.slane %v675_v63, 4  ;;  %v684_v32 = vshll.u32 %v3318_v12, 16  ;;  %v508_v52 = vld [vmem:[#allocation2 + $0x1c] sm:$0x1]  ;;  %877 = vmatpush.bf16.msrb.mxu1 %v2829_v34 }
  0x61   : > { %v422_v35 = vrot.slane %v420_v0, 7  ;;  %v715_v36 = vpack.c.b16 %v710_v21, %v709_v9  ;;  %v603_v37 = vsel %vm3265_vm15, %v598_v23, %v602_v55  ;;  %1047 = vmatmul.bf16.vlgmr.msra.gmra.mxu2 %v983_v24  ;;  %v430_v39 = vrot.slane %v428_v4, 7  ;;  %1424 = vmatpush.bf16.msrb.mxu0 %v2867_v26  ;;  %v2880_v55 = vld [vmem:[%s3675_s4 + $0x178] sm:$0xff]  ;;  %v2503_v10 = vld [vmem:[#allocation2 + $0x8] sm:$0xf] }
  0x62   : > { %v680_v38 = vrot.slane %v678_v25, 5  ;;  %v706_v42 = vunpack.c.l.b16 %v603_v37  ;;  %v668_v44 = vrot.slane %v667_v29, 4  ;;  %v686_v0 = vrot.slane %v684_v32, 5  ;;  %v2899_v23 = vld [vmem:[%s3675_s4 + $0x1f0] sm:$0xff] }
  0x63   : > { %v425_v45 = vor.u32 %v423_v3, %v422_v35  ;;  %787 = vmatmul.bf16.vlgmr.msra.gmra.mxu1 %v715_v36  ;;  %v426_v49 = vrot.slane %v422_v35, 4  ;;  %v433_v4 = vor.u32 %v431_v5, %v430_v39  ;;  %v434_v50 = vrot.slane %v430_v39, 4  ;;  %1975 = vmatpush.bf16.msrb.mxu3 %v2899_v23  ;;  %v3392_v53 = vld [vmem:[#allocation2 + $0xc] sm:$0x1]  ;;  %v2854_v23 = vld [vmem:[#allocation2 + $0x1c] sm:$0xf0] }
  0x64   : > { %v681_v48 = vor.u32 %v680_v38, %v677_v30  ;;  %v713_v3 = vpack.c.b16 %v706_v42, %v3301_v31  ;;  %1593 = vmatpush.bf16.msra.mxu1 %v2880_v55  ;;  %v673_v31 = vsel %vm3265_vm15, %v668_v44, %v672_v43  ;;  %v1227_v11 = vshrl.u32 %v1210_v2, 16 }
  0x65   : > { %v500_v57 = vsel %vm3204_vm11, %v425_v45, %v499_v40  ;;  %v503_v54 = vsel %vm3094_vm3, %v426_v49, %v502_v41  ;;  %v506_v5 = vsel %vm3204_vm11, %v433_v4, %v505_v46  ;;  %v509_v59 = vsel %vm3094_vm3, %v434_v50, %v508_v52  ;;  %1425 = vmatpush.bf16.msrb.mxu0 %v2866_v47  ;;  %v2879_v41 = vld [vmem:[%s3675_s4 + $0x170] sm:$0xff]  ;;  %v2889_v47 = vld [vmem:[%s3675_s4 + $0x1a0] sm:$0xff]  ;;  %v2898_v4 = vld [vmem:[%s3675_s4 + $0x1e8] sm:$0xff] }
  0x66   : > { %v682_v58 = vrot.slane %v681_v48, 4  ;;  %501 = vst [vmem:[#allocation2 + $0x10] sm:$0xf] %v500_v57  ;;  %777 = vmatmul.bf16.vlgmr.msra.gmra.mxu0 %v713_v3  ;;  %v711_v6 = vunpack.c.l.b16 %v673_v31  ;;  %v1230_v14 = vshll.u32 %v1210_v2, 16  ;;  %v903_v57 = vld [vmem:[#allocation2 + $0x20] sm:$0xe]  ;;  %1731 = vmatpush.bf16.msrb.mxu2 %v2889_v47 }
  0x67   : > { %504 = vst [vmem:[#allocation2 + $0x14] sm:$0x1] %v503_v54  ;;  %v1229_v54 = vrot.slane %v1227_v11, 4  ;;  %1976 = vmatpush.bf16.msrb.mxu3 %v2898_v4  ;;  %v2878_v31 = vld [vmem:[%s3675_s4 + $0x168] sm:$0xff] }
  0x68   : > { %v687_v61 = vsel %vm3265_vm15, %v682_v58, %v686_v0  ;;  %507 = vst [vmem:[#allocation2 + $0x18] sm:$0xf] %v506_v5  ;;  %1594 = vmatpush.bf16.msra.mxu1 %v2879_v41  ;;  %v1232_v5 = vrot.slane %v1230_v14, 5 }
  0x69   : > { %510 = vst [vmem:[#allocation2 + $0x1c] sm:$0x1] %v509_v59  ;;  %v712_v9 = vunpack.c.l.b16 %v687_v61  ;;  %1426 = vmatpush.bf16.msrb.mxu0 %v2865_v62  ;;  %v2888_v61 = vld [vmem:[%s3675_s4 + $0x198] sm:$0xff] }
  0x6a   : > { %v3403_v62 = vld [vmem:[%s3675_s4 + $0x238] sm:$0xff]  ;;  %1732 = vmatpush.bf16.msrb.mxu2 %v2888_v61 }
  0x6b   : > { %v716_v24 = vpack.c.b16 %v712_v9, %v711_v6 }
  0x6c   : > { %1595 = vmatpush.bf16.msra.mxu1 %v2878_v31  ;;  %v3448_v31 = vld [vmem:[#allocation2 + $0x24] sm:$0x1] }
  0x6d   : > { %v543_v16 = vld [vmem:[#allocation2 + $0x10] sm:$0xf]  ;;  %2148 = vmatpush.bf16.msra.mxu0 %v3403_v62 }
  0x6e   : > { %v2853_v15 = vld [vmem:[#allocation2 + $0xc] sm:$0xf0]  ;;  %v567_v18 = vld [vmem:[#allocation2 + $0x14] sm:$0x1]  ;;  %v605_v43 = vshrl.u32 %v543_v16, 16  ;;  %v608_v63 = vshll.u32 %v543_v16, 16 }
  0x6f   : > { %v901_v17 = vld [vmem:[#allocation2 + $0x10] sm:$0xe]  ;;  %v2504_v20 = vor.u32 %v2853_v15, %v2503_v10  ;;  %v544_v25 = vld [vmem:[#allocation2 + $0x18] sm:$0xf]  ;;  %v614_v26 = vshll.u32 %v567_v18, 16  ;;  %v936_v29 = vrot.slane %v567_v18, 5 }
  0x70   : > { %v2431_v21 = vrot.slane %v901_v17, 9  ;;  %v902_v27 = vld [vmem:[#allocation2 + $0x18] sm:$0xe]  ;;  %v568_v30 = vld [vmem:[#allocation2 + $0x1c] sm:$0x1]  ;;  %v607_v32 = vrot.slane %v605_v43, 4 }
  0x71   : > { %v610_v35 = vrot.slane %v608_v63, 5  ;;  %v619_v34 = vshrl.u32 %v544_v25, 16  ;;  %v622_v36 = vshll.u32 %v544_v25, 16  ;;  %1181 = vmatmul.bf16.vlgmr.msra.gmra.mxu3 %v2504_v20  ;;  %v616_v37 = vrot.slane %v614_v26, 5  ;;  %v1212_v46 = vld [vmem:[#allocation2 + $0x10] sm:$0xf] }
  0x72   : > { %v628_v38 = vshll.u32 %v568_v30, 16  ;;  %v937_v39 = vsel %vm3255_vm14, %v2431_v21, %v936_v29  ;;  %v2432_v40 = vrot.slane %v902_v27, 9  ;;  %v940_v45 = vrot.slane %v568_v30, 5  ;;  %v904_v10 = vld [vmem:[#allocation2 + $0x28] sm:$0xe] }
  0x73   : > { %v611_v42 = vor.u32 %v610_v35, %v607_v32  ;;  %v621_v44 = vrot.slane %v619_v34, 4  ;;  %v624_v0 = vrot.slane %v622_v36, 5  ;;  %v977_v49 = vunpack.c.l.b16 %v937_v39  ;;  %792 = vmatmul.bf16.gmra.mxu1 %v716_v24  ;;  %v3407_v16 = vld [vmem:[#allocation2 + $0x14] sm:$0x1]  ;;  %v2507_v21 = vld [vmem:[#allocation2 + $0x18] sm:$0xf] }
  0x74   : > { %v630_v48 = vrot.slane %v628_v38, 5  ;;  %v941_v55 = vsel %vm3255_vm14, %v2432_v40, %v940_v45  ;;  %v1241_v3 = vshrl.u32 %v1212_v46, 16  ;;  %v1244_v59 = vshll.u32 %v1212_v46, 16  ;;  %v2383_v32 = vld [vmem:[#allocation2] sm:$0xf] }
  0x75   : > { %v612_v50 = vrot.slane %v611_v42, 4  ;;  %v625_v52 = vor.u32 %v624_v0, %v621_v44  ;;  %v978_v58 = vunpack.c.l.b16 %v941_v55  ;;  %v1236_v18 = vshll.u32 %v3392_v53, 16  ;;  %v1214_v35 = vld [vmem:[#allocation2 + $0x18] sm:$0xf]  ;;  %v2825_v34 = vld [vmem:[#allocation2 + $0x4] sm:$0xf0] }
  0x76   : > { %v1243_v9 = vrot.slane %v1241_v3, 4  ;;  %v1246_v15 = vrot.slane %v1244_v59, 5  ;;  %v2433_v43 = vrot.slane %v903_v57, 9  ;;  %v944_v63 = vrot.slane %v3285_v13, 5  ;;  %v374_v38 = vld [vmem:[#allocation2 + $0x40] sm:$0x1] }
  0x77   : > { %v617_v2 = vsel %vm3265_vm15, %v612_v50, %v616_v37  ;;  %v626_v6 = vrot.slane %v625_v52, 4  ;;  %v984_v14 = vpack.c.b16 %v978_v58, %v977_v49  ;;  %v1233_v24 = vor.u32 %v1232_v5, %v1229_v54  ;;  %v1216_v37 = vld [vmem:[#allocation2 + $0x20] sm:$0xf]  ;;  %v2877_v42 = vld [vmem:[%s3675_s4 + $0x160] sm:$0xff]  ;;  %v2887_v44 = vld [vmem:[%s3675_s4 + $0x190] sm:$0xff] }
  0x78   : > { %v707_v11 = vunpack.c.l.b16 %v617_v2  ;;  %v2434_v25 = vrot.slane %v904_v10, 9  ;;  %v948_v26 = vrot.slane %v3298_v22, 5  ;;  %v1247_v27 = vor.u32 %v1246_v15, %v1243_v9  ;;  %v2897_v22 = vld [vmem:[%s3675_s4 + $0x1e0] sm:$0xff]  ;;  %1596 = vmatpush.bf16.msra.mxu1 %v2877_v42  ;;  %v2896_v50 = vld [vmem:[%s3675_s4 + $0x1d8] sm:$0xff]  ;;  %1733 = vmatpush.bf16.msrb.mxu2 %v2887_v44  ;;  %v2886_v15 = vld [vmem:[%s3675_s4 + $0x188] sm:$0xff] }
  0x79   : > { %v631_v17 = vsel %vm3265_vm15, %v626_v6, %v630_v48  ;;  %1052 = vmatmul.bf16.gmra.mxu2 %v984_v14  ;;  %v1250_v29 = vshll.u32 %v3407_v16, 16  ;;  %v2508_v36 = vor.u32 %v2854_v23, %v2507_v21  ;;  %v1234_v13 = vrot.slane %v1233_v24, 4  ;;  %v3432_v48 = vld [vmem:[%s3675_s4 + $0x230] sm:$0xff]  ;;  %1977 = vmatpush.bf16.msrb.mxu3 %v2897_v22  ;;  %v3440_v54 = vld [vmem:[#allocation2 + $0x1c] sm:$0x1] }
  0x7a   : > { %v708_v20 = vunpack.c.l.b16 %v631_v17  ;;  %v1238_v39 = vrot.slane %v1236_v18, 5  ;;  %v945_v40 = vsel %vm3255_vm14, %v2433_v43, %v944_v63  ;;  %v949_v41 = vsel %vm3255_vm14, %v2434_v25, %v948_v26  ;;  %2149 = vmatpush.bf16.msra.mxu0 %v3432_v48  ;;  %v905_v2 = vld [vmem:[#allocation2 + $0x30] sm:$0xe]  ;;  %v400_v14 = vld [vmem:[#allocation2 + $0x44] sm:$0x1]  ;;  %v2885_v25 = vld [vmem:[%s3675_s4 + $0x180] sm:$0xff] }
  0x7b   : > { %v1248_v0 = vrot.slane %v1247_v27, 4  ;;  %v1252_v45 = vrot.slane %v1250_v29, 5  ;;  %v1255_v46 = vshrl.u32 %v1214_v35, 16  ;;  %v1258_v47 = vshll.u32 %v1214_v35, 16  ;;  %v3460_v17 = vld [vmem:[%s3675_s4 + $0x228] sm:$0xff] }
  0x7c   : > { %v714_v30 = vpack.c.b16 %v708_v20, %v707_v11  ;;  %v1269_v49 = vshrl.u32 %v1216_v37, 16  ;;  %v1272_v4 = vshll.u32 %v1216_v37, 16  ;;  %v2924_v52 = vunpack.c.h.bf16 %v3134_v56  ;;  %v906_v20 = vld [vmem:[#allocation2 + $0x38] sm:$0xe]  ;;  %1734 = vmatpush.bf16.msrb.mxu2 %v2886_v15  ;;  %v2511_v37 = vld [vmem:[#allocation2 + $0x28] sm:$0xf] }
  0x7d   : > { %v375_v55 = vsel %vm3094_vm3, 0, %v374_v38  ;;  %v2384_v3 = vor.u32 %v2825_v34, %v2383_v32  ;;  %v979_v57 = vunpack.c.l.b16 %v945_v40  ;;  %v980_v58 = vunpack.c.l.b16 %v949_v41  ;;  %1978 = vmatpush.bf16.msrb.mxu3 %v2896_v50  ;;  %v2855_v38 = vld [vmem:[#allocation2 + $0x2c] sm:$0xf0]  ;;  %v2826_v33 = vld [vmem:[#allocation2 + $0x14] sm:$0xf0] }
  0x7e   : > { %782 = vmatmul.bf16.gmra.mxu0 %v714_v30  ;;  %376 = vst [vmem:[#allocation2 + $0x40] sm:$0x1] %v375_v55  ;;  %v324_v5 = vmul.f32 %v2924_v52, %v3149_v7  ;;  %v1239_v59 = vsel %vm3265_vm15, %v1234_v13, %v1238_v39  ;;  %v1253_v56 = vsel %vm3265_vm15, %v1248_v0, %v1252_v45  ;;  %v1257_v61 = vrot.slane %v1255_v46, 4  ;;  %v2876_v7 = vld [vmem:[%s3675_s4 + $0x158] sm:$0xff]  ;;  %v1218_v45 = vld [vmem:[#allocation2 + $0x28] sm:$0xf] }
  0x7f   : > { %v1260_v6 = vrot.slane %v1258_v47, 5  ;;  %v1271_v9 = vrot.slane %v1269_v49, 4  ;;  %v1274_v10 = vrot.slane %v1272_v4, 5  ;;  %v1355_v18 = vunpack.c.l.b16 %v1239_v59  ;;  %1597 = vmatpush.bf16.msra.mxu1 %v2876_v7  ;;  %2150 = vmatpush.bf16.msra.mxu0 %v3460_v17  ;;  %v2387_v40 = vld [vmem:[#allocation2 + $0x10] sm:$0xf]  ;;  %v2895_v52 = vld [vmem:[%s3675_s4 + $0x1d0] sm:$0xff] }
  0x80   : > { %v335_v11 = vadd.f32 %v3160_v19, %v324_v5  ;;  %v1356_v43 = vunpack.c.l.b16 %v1253_v56  ;;  %v985_v63 = vpack.c.b16 %v980_v58, %v979_v57  ;;  %v1264_v21 = vshll.u32 %v3440_v54, 16  ;;  %1735 = vmatpush.bf16.msrb.mxu2 %v2885_v25  ;;  %v1220_v49 = vld [vmem:[#allocation2 + $0x30] sm:$0xf]  ;;  %v2875_v55 = vld [vmem:[%s3675_s4 + $0x150] sm:$0xff]  ;;  %v1767_v7 = vld [vmem:[#allocation2 + $0x18] sm:$0xf] }
  0x81   : > { %1186 = vmatmul.bf16.gmra.mxu3 %v2508_v36  ;;  %v1278_v23 = vshll.u32 %v3448_v31, 16  ;;  %v2435_v24 = vrot.slane %v905_v2, 9  ;;  %v401_v26 = vsel %vm3103_vm5, 0, %v400_v14  ;;  %v1261_v27 = vor.u32 %v1260_v6, %v1257_v61  ;;  %v2894_v2 = vld [vmem:[%s3675_s4 + $0x1c8] sm:$0xff]  ;;  %v1765_v8 = vld [vmem:[#allocation2 + $0x10] sm:$0xf] }
  0x82   : > { %v343_v19 = vmax.f32 %v335_v11, 0.0  ;;  %v1275_v29 = vor.u32 %v1274_v10, %v1271_v9  ;;  %v952_v30 = vrot.slane %v3307_v51, 5  ;;  %402 = vst [vmem:[#allocation2 + $0x44] sm:$0x1] %v401_v26  ;;  %v2436_v35 = vrot.slane %v906_v20, 9  ;;  %1979 = vmatpush.bf16.msrb.mxu3 %v2895_v52  ;;  %v2873_v52 = vld [vmem:[%s3675_s4 + $0x140] sm:$0xff] }
  0x83   : > { %878 = vmatmul.bf16.vlgmr.msrb.gmra.mxu1 %v2384_v3  ;;  %v956_v34 = vrot.slane %v3318_v12, 5  ;;  %v1363_v36 = vpack.c.b16 %v1356_v43, %v1355_v18  ;;  %v1266_v41 = vrot.slane %v1264_v21, 5  ;;  %v1280_v22 = vrot.slane %v1278_v23, 5  ;;  %v3498_v43 = vld [vmem:[#allocation2 + $0x2c] sm:$0x1] }
  0x84   : > { %v410_v32 = vpack.c.bf16 %v343_v19, %v343_v19  ;;  %v1262_v42 = vrot.slane %v1261_v27, 4  ;;  %v1276_v51 = vrot.slane %v1275_v29, 4  ;;  %v953_v44 = vsel %vm3255_vm14, %v2435_v24, %v952_v30  ;;  %2959 = vmatpush.bf16.msra.mxu2 %v3403_v62  ;;  %v2905_v62 = vld [vmem:[%s3675_s4 + $0x220] sm:$0xff]  ;;  %1598 = vmatpush.bf16.msra.mxu1 %v2875_v55  ;;  %v3509_v25 = vld [vmem:[#allocation2 + $0x34] sm:$0x1]  ;;  %v2903_v55 = vld [vmem:[%s3675_s4 + $0x210] sm:$0xff] }
  0x85   : > { %v2512_v12 = vor.u32 %v2855_v38, %v2511_v37  ;;  %v957_v46 = vsel %vm3255_vm14, %v2436_v35, %v956_v34  ;;  %v535_v47 = vld [vmem:[#allocation2 + $0x40] sm:$0xf]  ;;  %v2388_v3 = vor.u32 %v2826_v33, %v2387_v40  ;;  %v981_v57 = vunpack.c.l.b16 %v953_v44  ;;  %2151 = vmatpush.bf16.msra.mxu0 %v2905_v62  ;;  %v2893_v24 = vld [vmem:[%s3675_s4 + $0x1c0] sm:$0xff] }
  0x86   : > { %v468_v13 = vshrl.u32 %v410_v32, 16  ;;  %v471_v39 = vshll.u32 %v410_v32, 16  ;;  %v1283_v58 = vshrl.u32 %v1218_v45, 16  ;;  %v1267_v5 = vsel %vm3265_vm15, %v1262_v42, %v1266_v41  ;;  %1980 = vmatpush.bf16.msrb.mxu3 %v2894_v2  ;;  %v2515_v34 = vld [vmem:[#allocation2 + $0x38] sm:$0xf] }
  0x87   : > { %v1281_v59 = vsel %vm3265_vm15, %v1276_v51, %v1280_v22  ;;  %v982_v56 = vunpack.c.l.b16 %v957_v46  ;;  %v1286_v9 = vshll.u32 %v1218_v45, 16  ;;  %v1297_v10 = vshrl.u32 %v1220_v49, 16  ;;  %v3514_v22 = vld [vmem:[#allocation2 + $0x14] sm:$0x1]  ;;  %v2391_v51 = vld [vmem:[#allocation2 + $0x20] sm:$0xf] }
  0x88   : > { %v470_v0 = vrot.slane %v468_v13, 7  ;;  %v1300_v11 = vshll.u32 %v1220_v49, 16  ;;  %2960 = vmatpush.bf16.msra.mxu2 %v3432_v48  ;;  %v1357_v15 = vunpack.c.l.b16 %v1267_v5  ;;  %v1358_v18 = vunpack.c.l.b16 %v1281_v59  ;;  %v2904_v48 = vld [vmem:[%s3675_s4 + $0x218] sm:$0xff]  ;;  %1599 = vmatpush.bf16.msra.mxu1 %v2874_v28  ;;  %v2827_v46 = vld [vmem:[#allocation2 + $0x24] sm:$0xf0]  ;;  %v2901_v28 = vld [vmem:[%s3675_s4 + $0x200] sm:$0xff] }
  0x89   : > { %1057 = vmatmul.bf16.gmra.mxu2 %v985_v63  ;;  %v538_v6 = vld [vmem:[#allocation2 + $0x44] sm:$0x1]  ;;  %v1285_v63 = vrot.slane %v1283_v58, 4  ;;  %v986_v20 = vpack.c.b16 %v982_v56, %v981_v57  ;;  %v1288_v19 = vrot.slane %v1286_v9, 5  ;;  %v1299_v21 = vrot.slane %v1297_v10, 4  ;;  %2152 = vmatpush.bf16.msra.mxu0 %v2904_v48 }
  0x8a   : > { %v473_v4 = vor.u32 %v471_v39, %v470_v0  ;;  %v474_v50 = vrot.slane %v470_v0, 4  ;;  %v1302_v23 = vrot.slane %v1300_v11, 5  ;;  %v1782_v26 = vshrl.u32 %v1765_v8, 16  ;;  %1981 = vmatpush.bf16.msrb.mxu3 %v2893_v24  ;;  %v2902_v57 = vld [vmem:[%s3675_s4 + $0x208] sm:$0xff]  ;;  %v2671_v2 = vld [vmem:[#allocation2 + $0x10] sm:$0xf] }
  0x8b   : > { %v1785_v27 = vshll.u32 %v1765_v8, 16  ;;  %v1796_v29 = vshrl.u32 %v1767_v7, 16  ;;  %v1799_v30 = vshll.u32 %v1767_v7, 16  ;;  %v1292_v32 = vshll.u32 %v3498_v43, 16  ;;  %v1769_v56 = vld [vmem:[#allocation2 + $0x20] sm:$0xf] }
  0x8c   : > { %v536_v61 = vsel %vm3204_vm11, %v473_v4, %v535_v47  ;;  %v539_v14 = vsel %vm3094_vm3, %v474_v50, %v538_v6  ;;  %2961 = vmatpush.bf16.msra.mxu2 %v3460_v17  ;;  %v1364_v35 = vpack.c.b16 %v1358_v18, %v1357_v15  ;;  %v1303_v37 = vor.u32 %v1302_v23, %v1299_v21  ;;  %v3516_v17 = vld [vmem:[#allocation2 + $0x1c] sm:$0x1] }
  0x8d   : > { %537 = vst [vmem:[#allocation2 + $0x40] sm:$0xf] %v536_v61  ;;  %v1306_v38 = vshll.u32 %v3509_v25, 16  ;;  %v1784_v39 = vrot.slane %v1782_v26, 4  ;;  %v1787_v40 = vrot.slane %v1785_v27, 5  ;;  %v1798_v33 = vrot.slane %v1796_v29, 4  ;;  %1600 = vmatpush.bf16.msra.mxu1 %v2873_v52  ;;  %2153 = vmatpush.bf16.msra.mxu0 %v2903_v55 }
  0x8e   : > { %1427 = vmatmul.bf16.vlgmr.msrb.gmra.mxu0 %v1363_v36  ;;  %540 = vst [vmem:[#allocation2 + $0x44] sm:$0x1] %v539_v14  ;;  %v1289_v36 = vor.u32 %v1288_v19, %v1285_v63  ;;  %v1801_v41 = vrot.slane %v1799_v30, 5  ;;  %v1294_v42 = vrot.slane %v1292_v32, 5  ;;  %v1304_v45 = vrot.slane %v1303_v37, 4 }
  0x8f   : > { %v1788_v47 = vor.u32 %v1787_v40, %v1784_v39  ;;  %v1791_v49 = vshll.u32 %v3514_v22, 16  ;;  %v1805_v50 = vshll.u32 %v3516_v17, 16  ;;  %v2392_v58 = vor.u32 %v2827_v46, %v2391_v51  ;;  %v1771_v61 = vld [vmem:[#allocation2 + $0x28] sm:$0xf]  ;;  %v2881_v14 = vld [vmem:[#allocation2 + $0x14] sm:$0xf0] }
  0x90   : > { %2962 = vmatpush.bf16.msra.mxu2 %v2905_v62  ;;  %v1290_v0 = vrot.slane %v1289_v36, 4  ;;  %v1802_v4 = vor.u32 %v1801_v41, %v1798_v33  ;;  %v1222_v62 = vld [vmem:[#allocation2 + $0x38] sm:$0xf]  ;;  %v1810_v63 = vshrl.u32 %v1769_v56, 16  ;;  %v1824_v19 = vshrl.u32 %v1771_v61, 16 }
  0x91   : > { %1191 = vmatmul.bf16.gmra.mxu3 %v2512_v12  ;;  %v1308_v12 = vrot.slane %v1306_v38, 5  ;;  %v1789_v6 = vrot.slane %v1788_v47, 4  ;;  %v1793_v9 = vrot.slane %v1791_v49, 5  ;;  %v1807_v11 = vrot.slane %v1805_v50, 5  ;;  %2154 = vmatpush.bf16.msra.mxu0 %v2902_v57  ;;  %v3540_v29 = vld [vmem:[#allocation2 + $0x3c] sm:$0x1] }
  0x92   : > { %v1295_v5 = vsel %vm3265_vm15, %v1290_v0, %v1294_v42  ;;  %v1803_v10 = vrot.slane %v1802_v4, 4  ;;  %v1311_v8 = vshrl.u32 %v1222_v62, 16  ;;  %v1314_v7 = vshll.u32 %v1222_v62, 16  ;;  %v3544_v41 = vld [vmem:[#allocation2 + $0x24] sm:$0x1] }
  0x93   : > { %883 = vmatmul.bf16.gmra.mxu1 %v2388_v3  ;;  %v1309_v59 = vsel %vm3265_vm15, %v1304_v45, %v1308_v12  ;;  %v1827_v21 = vshll.u32 %v1771_v61, 16  ;;  %v1359_v23 = vunpack.c.l.b16 %v1295_v5  ;;  %v2672_v24 = vor.u32 %v2881_v14, %v2671_v2  ;;  %v3546_v42 = vld [vmem:[#allocation2 + $0x2c] sm:$0x1]  ;;  %v2395_v52 = vld [vmem:[#allocation2 + $0x30] sm:$0xf] }
  0x94   : > { %v2856_v13 = vld [vmem:[#allocation2 + $0x3c] sm:$0xf0]  ;;  %2963 = vmatpush.bf16.msra.mxu2 %v2904_v48  ;;  %v1360_v48 = vunpack.c.l.b16 %v1309_v59  ;;  %v1794_v26 = vsel %vm3265_vm15, %v1789_v6, %v1793_v9  ;;  %v1808_v27 = vsel %vm3265_vm15, %v1803_v10, %v1807_v11  ;;  %v1313_v30 = vrot.slane %v1311_v8, 4  ;;  %v1456_v6 = vld [vmem:[#allocation2 + $0x8] sm:$0xe] }
  0x95   : > { %v2516_v44 = vor.u32 %v2856_v13, %v2515_v34  ;;  %v1224_v3 = vld [vmem:[#allocation2 + $0x40] sm:$0xf]  ;;  %v1316_v32 = vrot.slane %v1314_v7, 5  ;;  %v3542_v36 = vld [vmem:[#allocation2 + $0x44] sm:$0x1]  ;;  %2155 = vmatpush.bf16.msra.mxu0 %v2901_v28  ;;  %v1812_v37 = vrot.slane %v1810_v63, 4  ;;  %v1910_v40 = vunpack.c.l.b16 %v1794_v26 }
  0x96   : > { %v1325_v15 = vshrl.u32 %v1224_v3, 16  ;;  %v1328_v18 = vshll.u32 %v1224_v3, 16  ;;  %v1826_v13 = vrot.slane %v1824_v19, 4  ;;  %v1829_v39 = vrot.slane %v1827_v21, 5  ;;  %v1457_v9 = vld [vmem:[#allocation2 + $0x10] sm:$0xe] }
  0x97   : > { %v1911_v33 = vunpack.c.l.b16 %v1808_v27  ;;  %v1365_v51 = vpack.c.b16 %v1360_v48, %v1359_v23  ;;  %v1320_v0 = vshll.u32 %v3540_v29, 16  ;;  %v1334_v12 = vshll.u32 %v3542_v36, 16  ;;  %v1773_v10 = vld [vmem:[#allocation2 + $0x30] sm:$0xf]  ;;  %v1775_v11 = vld [vmem:[#allocation2 + $0x38] sm:$0xf] }
  0x98   : > { %2964 = vmatpush.bf16.msra.mxu2 %v2903_v55  ;;  %v1330_v34 = vrot.slane %v1328_v18, 5  ;;  %v1819_v47 = vshll.u32 %v3544_v41, 16  ;;  %v1830_v49 = vor.u32 %v1829_v39, %v1826_v13  ;;  %v1833_v4 = vshll.u32 %v3546_v42, 16  ;;  %v2828_v55 = vld [vmem:[#allocation2 + $0x34] sm:$0xf0] }
  0x99   : > { %1062 = vmatmul.bf16.gmra.mxu2 %v986_v20  ;;  %v1813_v20 = vshll.u32 %v1769_v56, 16  ;;  %v1918_v50 = vpack.c.b16 %v1911_v33, %v1910_v40  ;;  %v1322_v3 = vrot.slane %v1320_v0, 5  ;;  %v2396_v2 = vor.u32 %v2828_v55, %v2395_v52  ;;  %v2675_v18 = vld [vmem:[#allocation2 + $0x20] sm:$0xf]  ;;  %v2882_v63 = vld [vmem:[#allocation2 + $0x24] sm:$0xf0] }
  0x9a   : > { %v1821_v59 = vrot.slane %v1819_v47, 5  ;;  %v1831_v56 = vrot.slane %v1830_v49, 4  ;;  %v1835_v61 = vrot.slane %v1833_v4, 5  ;;  %v1482_v14 = vrot.slane %v3392_v53, 5  ;;  %v3568_v0 = vld [vmem:[#allocation2 + $0x3c] sm:$0x1] }
  0x9b   : > { %v1815_v38 = vrot.slane %v1813_v20, 5  ;;  %v1486_v8 = vrot.slane %v3407_v16, 5  ;;  %v2597_v20 = vrot.slane %v1456_v6, 9  ;;  %v2598_v19 = vrot.slane %v1457_v9, 9  ;;  %v1458_v6 = vld [vmem:[#allocation2 + $0x18] sm:$0xe] }
  0x9c   : > { %2965 = vmatpush.bf16.msra.mxu2 %v2902_v57  ;;  %v1836_v23 = vsel %vm3265_vm15, %v1831_v56, %v1835_v61  ;;  %v1838_v53 = vshrl.u32 %v1773_v10, 16  ;;  %v1852_v16 = vshrl.u32 %v1775_v11, 16  ;;  %v1855_v48 = vshll.u32 %v1775_v11, 16  ;;  %v1459_v9 = vld [vmem:[#allocation2 + $0x20] sm:$0xe] }
  0x9d   : > { %v1816_v46 = vor.u32 %v1815_v38, %v1812_v37  ;;  %v2676_v27 = vor.u32 %v2882_v63, %v2675_v18  ;;  %v2011_v37 = vld [vmem:[#allocation2 + $0x10] sm:$0xe]  ;;  %v2012_v38 = vld [vmem:[#allocation2 + $0x18] sm:$0xe]  ;;  %v1777_v11 = vld [vmem:[#allocation2 + $0x40] sm:$0xf] }
  0x9e   : > { %1432 = vmatmul.bf16.gmra.mxu0 %v1364_v35  ;;  %v1327_v35 = vrot.slane %v1325_v15, 4  ;;  %v1840_v13 = vrot.slane %v1838_v53, 4  ;;  %v1854_v40 = vrot.slane %v1852_v16, 4  ;;  %v1857_v33 = vrot.slane %v1855_v48, 5 }
  0x9f   : > { %v1817_v5 = vrot.slane %v1816_v46, 4  ;;  %v2765_v4 = vrot.slane %v2011_v37, 9  ;;  %v1494_v18 = vrot.slane %v3448_v31, 5  ;;  %v2599_v63 = vrot.slane %v1458_v6, 9 }
  0xa0   : > { %v1331_v45 = vor.u32 %v1330_v34, %v1327_v35  ;;  %2966 = vmatpush.bf16.msra.mxu2 %v2901_v28  ;;  %v1841_v28 = vshll.u32 %v1773_v10, 16  ;;  %v1913_v34 = vunpack.c.l.b16 %v1836_v23  ;;  %v1866_v23 = vshrl.u32 %v1777_v11, 16 }
  0xa1   : > { %1196 = vmatmul.bf16.gmra.mxu3 %v2516_v44  ;;  %v1317_v44 = vor.u32 %v1316_v32, %v1313_v30  ;;  %v1822_v21 = vsel %vm3265_vm15, %v1817_v5, %v1821_v59  ;;  %v1483_v30 = vsel %vm3255_vm14, %v2597_v20, %v1482_v14  ;;  %v1487_v32 = vsel %vm3255_vm14, %v2598_v19, %v1486_v8  ;;  %v2883_v5 = vld [vmem:[#allocation2 + $0x34] sm:$0xf0]  ;;  %v1779_v14 = vld [vmem:[#allocation2 + $0x48] sm:$0xf] }
  0xa2   : > { %v1332_v57 = vrot.slane %v1331_v45, 4  ;;  %v1912_v35 = vunpack.c.l.b16 %v1822_v21  ;;  %v1843_v39 = vrot.slane %v1841_v28, 5  ;;  %v2037_v45 = vrot.slane %v3514_v22, 5 }
  0xa3   : > { %888 = vmatmul.bf16.gmra.mxu1 %v2392_v58  ;;  %v1318_v62 = vrot.slane %v1317_v44, 4  ;;  %v1336_v58 = vrot.slane %v1334_v12, 5  ;;  %v3566_v44 = vld [vmem:[#allocation2 + $0x34] sm:$0x1]  ;;  %v2041_v12 = vrot.slane %v3516_v17, 5  ;;  %v1529_v46 = vunpack.c.l.b16 %v1483_v30 }
  0xa4   : > { %v1530_v47 = vunpack.c.l.b16 %v1487_v32  ;;  %v1919_v49 = vpack.c.b16 %v1913_v34, %v1912_v35  ;;  %v1844_v52 = vor.u32 %v1843_v39, %v1840_v13  ;;  %v1847_v55 = vshll.u32 %v3566_v44, 16  ;;  %v2679_v17 = vld [vmem:[#allocation2 + $0x30] sm:$0xf]  ;;  %v2014_v30 = vld [vmem:[#allocation2 + $0x28] sm:$0xe] }
  0xa5   : > { %v1323_v7 = vsel %vm3265_vm15, %v1318_v62, %v1322_v3  ;;  %v1337_v15 = vsel %vm3265_vm15, %v1332_v57, %v1336_v58  ;;  %v1858_v62 = vor.u32 %v1857_v33, %v1854_v40  ;;  %v1861_v3 = vshll.u32 %v3568_v0, 16  ;;  %v1780_v13 = vld [vmem:[#allocation2 + $0x4c] sm:$0x1] }
  0xa6   : > { %v1362_v26 = vunpack.c.l.b16 %v1337_v15  ;;  %v1537_v57 = vpack.c.b16 %v1530_v47, %v1529_v46  ;;  %v2038_v58 = vsel %vm3255_vm14, %v2765_v4, %v2037_v45  ;;  %v1845_v59 = vrot.slane %v1844_v52, 4 }
  0xa7   : > { %v1849_v56 = vrot.slane %v1847_v55, 5  ;;  %v1859_v61 = vrot.slane %v1858_v62, 4  ;;  %v2084_v10 = vunpack.c.l.b16 %v2038_v58  ;;  %v1490_v15 = vrot.slane %v3440_v54, 5 }
  0xa8   : > { %v2600_v20 = vrot.slane %v1459_v9, 9  ;;  %v1869_v53 = vshll.u32 %v1777_v11, 16  ;;  %v1880_v28 = vshrl.u32 %v1779_v14, 16  ;;  %v1883_v16 = vshll.u32 %v1779_v14, 16 }
  0xa9   : > { %1736 = vmatmul.bf16.vlgmr.msrb.gmra.mxu2 %v2672_v24  ;;  %v1361_v24 = vunpack.c.l.b16 %v1323_v7  ;;  %v2680_v7 = vor.u32 %v2883_v5, %v2679_v17  ;;  %v1850_v19 = vsel %vm3265_vm15, %v1845_v59, %v1849_v56  ;;  %v1868_v32 = vrot.slane %v1866_v23, 4  ;;  %v2884_v5 = vld [vmem:[#allocation2 + $0x44] sm:$0xf0] }
  0xaa   : > { %v1495_v54 = vsel %vm3255_vm14, %v2600_v20, %v1494_v18  ;;  %v1914_v31 = vunpack.c.l.b16 %v1850_v19  ;;  %v1871_v35 = vrot.slane %v1869_v53, 5  ;;  %v1882_v34 = vrot.slane %v1880_v28, 4  ;;  %v2016_v28 = vld [vmem:[#allocation2 + $0x38] sm:$0xe] }
  0xab   : > { %v1885_v37 = vrot.slane %v1883_v16, 5  ;;  %v1532_v40 = vunpack.c.l.b16 %v1495_v54  ;;  %v2045_v45 = vrot.slane %v3544_v41, 5  ;;  %v2049_v46 = vrot.slane %v3546_v42, 5  ;;  %v2683_v42 = vld [vmem:[#allocation2 + $0x40] sm:$0xf] }
  0xac   : > { %v1872_v47 = vor.u32 %v1871_v35, %v1868_v32  ;;  %v1502_v9 = vrot.slane %v3509_v25, 5  ;;  %v2065_v19 = vrot.slane %v1780_v13, 5  ;;  %v2053_v54 = vrot.slane %v3566_v44, 5 }
  0xad   : > { %v1886_v4 = vor.u32 %v1885_v37, %v1882_v34 }
  0xae   : > { %1437 = vmatmul.bf16.gmra.mxu0 %v1365_v51  ;;  %v1366_v51 = vpack.c.b16 %v1362_v26, %v1361_v24  ;;  %v1491_v24 = vsel %vm3255_vm14, %v2599_v63, %v1490_v15  ;;  %v1873_v58 = vrot.slane %v1872_v47, 4 }
  0xaf   : > { %v1531_v39 = vunpack.c.l.b16 %v1491_v24 }
  0xb1   : > { %1982 = vmatmul.bf16.vlgmr.msrb.gmra.mxu3 %v1918_v50  ;;  %v2766_v50 = vrot.slane %v2012_v38, 9  ;;  %v1778_v38 = vld [vmem:[#allocation2 + $0x44] sm:$0x1]  ;;  %v1538_v52 = vpack.c.b16 %v1532_v40, %v1531_v39 }
  0xb2   : > { %v2061_v25 = vrot.slane %v1778_v38, 5 }
  0xb3   : > { %893 = vmatmul.bf16.gmra.mxu1 %v2396_v2  ;;  %v2042_v22 = vsel %vm3255_vm14, %v2766_v50, %v2041_v12  ;;  %v1863_v2 = vrot.slane %v1861_v3, 5  ;;  %v2768_v12 = vrot.slane %v2014_v30, 9  ;;  %v1889_v50 = vshll.u32 %v1780_v13, 16  ;;  %v1460_v3 = vld [vmem:[#allocation2 + $0x28] sm:$0xe] }
  0xb4   : > { %v2085_v8 = vunpack.c.l.b16 %v2042_v22  ;;  %v1887_v22 = vrot.slane %v1886_v4, 4  ;;  %v1462_v13 = vld [vmem:[#allocation2 + $0x38] sm:$0xe] }
  0xb5   : > { %v1864_v21 = vsel %vm3265_vm15, %v1859_v61, %v1863_v2  ;;  %v2050_v62 = vsel %vm3255_vm14, %v2768_v12, %v2049_v46  ;;  %v1891_v17 = vrot.slane %v1889_v50, 5  ;;  %v2601_v61 = vrot.slane %v1460_v3, 9 }
  0xb6   : > { %v2092_v48 = vpack.c.b16 %v2085_v8, %v2084_v10  ;;  %v1915_v26 = vunpack.c.l.b16 %v1864_v21  ;;  %v2087_v56 = vunpack.c.l.b16 %v2050_v62  ;;  %v1498_v2 = vrot.slane %v3498_v43, 5  ;;  %v2017_v8 = vld [vmem:[#allocation2 + $0x40] sm:$0xe]  ;;  %v2015_v21 = vld [vmem:[#allocation2 + $0x30] sm:$0xe] }
  0xb7   : > { %v2684_v10 = vor.u32 %v2884_v5, %v2683_v42  ;;  %v1892_v14 = vsel %vm3265_vm15, %v1887_v22, %v1891_v17  ;;  %v2771_v23 = vrot.slane %v2017_v8, 9  ;;  %v2769_v24 = vrot.slane %v2015_v21, 9 }
  0xb8   : > { %v1499_v18 = vsel %vm3255_vm14, %v2601_v61, %v1498_v2  ;;  %v1917_v20 = vunpack.c.l.b16 %v1892_v14  ;;  %v1510_v46 = vrot.slane %v3542_v36, 5 }
  0xb9   : > { %1741 = vmatmul.bf16.gmra.mxu2 %v2676_v27  ;;  %v2013_v27 = vld [vmem:[#allocation2 + $0x20] sm:$0xe]  ;;  %v1533_v1 = vunpack.c.l.b16 %v1499_v18 }
  0xba   : > { %v2767_v33 = vrot.slane %v2013_v27, 9  ;;  %v2062_v27 = vsel %vm3255_vm14, %v2771_v23, %v2061_v25 }
  0xbb   : > { %v2090_v35 = vunpack.c.l.b16 %v2062_v27 }
  0xbc   : > { %v2046_v55 = vsel %vm3255_vm14, %v2767_v33, %v2045_v45  ;;  %v1506_v45 = vrot.slane %v3540_v29, 5 }
  0xbd   : > { %v2086_v59 = vunpack.c.l.b16 %v2046_v55 }
  0xbe   : > { %1442 = vmatmul.bf16.gmra.mxu0 %v1366_v51  ;;  %v1920_v51 = vpack.c.b16 %v1915_v26, %v1914_v31  ;;  %v2770_v31 = vrot.slane %v2016_v28, 9  ;;  %v2057_v26 = vrot.slane %v3568_v0, 5  ;;  %v1463_v0 = vld [vmem:[#allocation2 + $0x40] sm:$0xe] }
  0xbf   : > { %v2093_v15 = vpack.c.b16 %v2087_v56, %v2086_v59  ;;  %v2604_v12 = vrot.slane %v1463_v0, 9 }
  0xc0   : > { %v2058_v44 = vsel %vm3255_vm14, %v2770_v31, %v2057_v26 }
  0xc1   : > { %1987 = vmatmul.bf16.gmra.mxu3 %v1919_v49  ;;  %v1875_v49 = vshll.u32 %v1778_v38, 16  ;;  %v2054_v38 = vsel %vm3255_vm14, %v2769_v24, %v2053_v54  ;;  %v2089_v40 = vunpack.c.l.b16 %v2058_v44  ;;  %v1511_v55 = vsel %vm3255_vm14, %v2604_v12, %v1510_v46 }
  0xc2   : > { %v2088_v39 = vunpack.c.l.b16 %v2054_v38  ;;  %v1536_v3 = vunpack.c.l.b16 %v1511_v55 }
  0xc3   : > { %1601 = vmatmul.bf16.vlgmr.msra.gmra.mxu1 %v1537_v57  ;;  %v1461_v57 = vld [vmem:[#allocation2 + $0x30] sm:$0xe]  ;;  %v1877_v41 = vrot.slane %v1875_v49, 5 }
  0xc4   : > { %v2602_v6 = vrot.slane %v1461_v57, 9  ;;  %v2094_v50 = vpack.c.b16 %v2089_v40, %v2088_v39 }
  0xc5   : > { %v1878_v11 = vsel %vm3265_vm15, %v1873_v58, %v1877_v41 }
  0xc6   : > { %v1503_v63 = vsel %vm3255_vm14, %v2602_v6, %v1502_v9  ;;  %v1916_v43 = vunpack.c.l.b16 %v1878_v11 }
  0xc7   : > { %v1534_v16 = vunpack.c.l.b16 %v1503_v63 }
  0xc9   : > { %1746 = vmatmul.bf16.gmra.mxu2 %v2680_v7  ;;  %v2018_v7 = vld [vmem:[#allocation2 + $0x48] sm:$0xe]  ;;  %v1539_v32 = vpack.c.b16 %v1534_v16, %v1533_v1 }
  0xca   : > { %v2772_v53 = vrot.slane %v2018_v7, 9 }
  0xcc   : > { %v2066_v30 = vsel %vm3255_vm14, %v2772_v53, %v2065_v19 }
  0xcd   : > { %v2091_v34 = vunpack.c.l.b16 %v2066_v30 }
  0xce   : > { %2156 = vmatmul.bf16.vlgmr.msra.gmra.mxu0 %v2092_v48  ;;  %v1921_v48 = vpack.c.b16 %v1917_v20, %v1916_v43 }
  0xcf   : > { %v2095_v33 = vpack.c.b16 %v2091_v34, %v2090_v35 }
  0xd1   : > { %1992 = vmatmul.bf16.gmra.mxu3 %v1920_v51  ;;  %v2603_v51 = vrot.slane %v1462_v13, 9 }
  0xd3   : > { %1606 = vmatmul.bf16.gmra.mxu1 %v1538_v52  ;;  %v1507_v52 = vsel %vm3255_vm14, %v2603_v51, %v1506_v45 }
  0xd4   : > { %v1535_v62 = vunpack.c.l.b16 %v1507_v52 }
  0xd6   : > { %v1540_v58 = vpack.c.b16 %v1536_v3, %v1535_v62 }
  0xd9   : > { %1751 = vmatmul.bf16.gmra.mxu2 %v2684_v10 }
  0xde   : > { %2161 = vmatmul.bf16.gmra.mxu0 %v2093_v15 }
  0xe0   : > { %v3610_v37 = vpop.f32.mrf.mxu1 }
  0xe1   : > { %1997 = vmatmul.bf16.gmra.mxu3 %v1921_v48 }
  0xe3   : > { %1611 = vmatmul.bf16.gmra.mxu1 %v1539_v32  ;;  %v778_v47 = vpop.f32.mrf.mxu0 }
  0xe4   : > { %v1048_v49 = vpop.f32.mrf.mxu2 }
  0xe8   : > { %v790_v4 = vpop.f32.mrf.mxu1 }
  0xe9   : > { %2171 = vmatmul.bf16.vlgmr.msra.gmra.mxu2 %v2095_v33 }
  0xeb   : > { %v780_v57 = vpop.f32.mrf.mxu0 }
  0xec   : > { %v1050_v41 = vpop.f32.mrf.mxu2 }
  0xee   : > { %2166 = vmatmul.bf16.gmra.mxu0 %v2094_v50 }
  0xf0   : > { %v793_v29 = vpop.f32.mrf.mxu1 }
  0xf3   : > { %1616 = vmatmul.bf16.gmra.mxu1 %v1540_v58 }
  0xf4   : > { %v1182_v22 = vpop.f32.mrf.mxu3 }
  0xf8   : > { %v795_v36 = vpop.f32.mrf.mxu1 }
  0xfb   : > { %v783_v17 = vpop.f32.mrf.mxu0 }
  0xfc   : > { %v1184_v42 = vpop.f32.mrf.mxu3  ;;  %v1053_v5 = vpop.f32.mrf.mxu2 }
 0x100   : > { %v879_v59 = vpop.f32.mrf.mxu1 }
 0x101   : > { %v880_v61 = vadd.f32 %v879_v59, %v778_v47 }
 0x103   : > { %v785_v56 = vpop.f32.mrf.mxu0  ;;  %v1068_v6 = vadd.f32 %v1048_v49, %v880_v61 }
 0x104   : > { %v1187_v2 = vpop.f32.mrf.mxu3  ;;  %v1055_v60 = vpop.f32.mrf.mxu2 }
 0x105   : > { %v1202_v9 = vadd.f32 %v1182_v22, %v1068_v6 }
 0x108   : > { %v881_v10 = vpop.f32.mrf.mxu1 }
 0x109   : > { %v882_v14 = vadd.f32 %v881_v10, %v780_v57 }
 0x10b   : > { %v1428_v11 = vpop.f32.mrf.mxu0  ;;  %v1069_v15 = vadd.f32 %v1050_v41, %v882_v14 }
 0x10c   : > { %v1448_v8 = vadd.f32 %v1428_v11, %v1202_v9  ;;  %v3622_v7 = vpop.f32.mrf.mxu3  ;;  %v1058_v18 = vpop.f32.mrf.mxu2 }
 0x10d   : > { %v1203_v58 = vadd.f32 %v1184_v42, %v1069_v15 }
 0x110   : > { %v884_v63 = vpop.f32.mrf.mxu1 }
 0x111   : > { %v885_v20 = vadd.f32 %v884_v63, %v783_v17 }
 0x113   : > { %v1430_v43 = vpop.f32.mrf.mxu0  ;;  %v1070_v19 = vadd.f32 %v1053_v5, %v885_v20 }
 0x114   : > { %v1192_v25 = vpop.f32.mrf.mxu3  ;;  %v1060_v21 = vpop.f32.mrf.mxu2  ;;  %v1449_v17 = vadd.f32 %v1430_v43, %v1203_v58 }
 0x115   : > { %v1204_v23 = vadd.f32 %v1187_v2, %v1070_v19 }
 0x118   : > { %v886_v53 = vpop.f32.mrf.mxu1 }
 0x119   : > { %v887_v1 = vadd.f32 %v886_v53, %v785_v56 }
 0x11b   : > { %v1433_v28 = vpop.f32.mrf.mxu0  ;;  %v1071_v24 = vadd.f32 %v1055_v60, %v887_v1 }
 0x11c   : > { %v1450_v16 = vadd.f32 %v1433_v28, %v1204_v23  ;;  %v3624_v48 = vpop.f32.mrf.mxu3  ;;  %v1063_v54 = vpop.f32.mrf.mxu2 }
 0x11d   : > { %v1205_v42 = vadd.f32 %v3622_v7, %v1071_v24 }
 0x120   : > { %v889_v31 = vpop.f32.mrf.mxu1 }
 0x121   : > { %v890_v27 = vadd.f32 %v889_v31, %v3610_v37 }
 0x123   : > { %v1435_v26 = vpop.f32.mrf.mxu0  ;;  %v1072_v32 = vadd.f32 %v1058_v18, %v890_v27 }
 0x124   : > { %v3627_v30 = vpop.f32.mrf.mxu3  ;;  %v1065_v35 = vpop.f32.mrf.mxu2  ;;  %v1451_v53 = vadd.f32 %v1435_v26, %v1205_v42 }
 0x125   : > { %v1206_v34 = vadd.f32 %v1192_v25, %v1072_v32 }
 0x128   : > { %v891_v38 = vpop.f32.mrf.mxu1 }
 0x129   : > { %v892_v13 = vadd.f32 %v891_v38, %v790_v4 }
 0x12b   : > { %v1438_v44 = vpop.f32.mrf.mxu0  ;;  %v3629_v39 = vadd.f32 %v1060_v21, %v892_v13 }
 0x12c   : > { %v1452_v0 = vadd.f32 %v1438_v44, %v1206_v34  ;;  %v1737_v40 = vpop.f32.mrf.mxu2  ;;  %v3631_v33 = vpop.f32.mrf.mxu3 }
 0x130   : > { %v894_v51 = vpop.f32.mrf.mxu1 }
 0x131   : > { %v895_v12 = vadd.f32 %v894_v51, %v793_v29  ;;  %v1207_v51 = vadd.f32 %v3624_v48, %v3629_v39 }
 0x133   : > { %v3633_v45 = vpop.f32.mrf.mxu0  ;;  %v3635_v46 = vadd.f32 %v1063_v54, %v895_v12 }
 0x134   : > { %v1739_v37 = vpop.f32.mrf.mxu2  ;;  %v1983_v47 = vpop.f32.mrf.mxu3 }
 0x138   : > { %v896_v49 = vpop.f32.mrf.mxu1 }
 0x139   : > { %v897_v52 = vadd.f32 %v896_v49, %v795_v36 }
 0x13b   : > { %v3637_v50 = vpop.f32.mrf.mxu0  ;;  %v3639_v55 = vadd.f32 %v1065_v35, %v897_v52 }
 0x13c   : > { %v1742_v4 = vpop.f32.mrf.mxu2  ;;  %v1985_v3 = vpop.f32.mrf.mxu3 }
 0x140   : > { %v1602_v62 = vpop.f32.mrf.mxu1 }
 0x141   : > { %v1622_v22 = vadd.f32 %v1602_v62, %v1448_v8 }
 0x143   : > { %v3641_v57 = vpop.f32.mrf.mxu0  ;;  %v1757_v29 = vadd.f32 %v1737_v40, %v1622_v22 }
 0x144   : > { %v1744_v41 = vpop.f32.mrf.mxu2  ;;  %v1988_v61 = vpop.f32.mrf.mxu3 }
 0x145   : > { %v2003_v6 = vadd.f32 %v1983_v47, %v1757_v29 }
 0x148   : > { %v1604_v5 = vpop.f32.mrf.mxu1 }
 0x149   : > { %v1623_v56 = vadd.f32 %v1604_v5, %v1449_v17 }
 0x14b   : > { %v2157_v59 = vpop.f32.mrf.mxu0  ;;  %v1758_v2 = vadd.f32 %v1739_v37, %v1623_v56 }
 0x14c   : > { %v1747_v36 = vpop.f32.mrf.mxu2  ;;  %v2177_v9 = vadd.f32 %v2157_v59, %v2003_v6  ;;  %v1990_v25 = vpop.f32.mrf.mxu3 }
 0x14d   : > { %v2004_v60 = vadd.f32 %v1985_v3, %v1758_v2 }
 0x14e   : > { %v2215_v15 = vmul.f32 %v2177_v9, %v2177_v9 }
 0x150   : > { %v1607_v10 = vpop.f32.mrf.mxu1 }
 0x151   : > { %v1624_v14 = vadd.f32 %v1607_v10, %v1450_v16 }
 0x153   : > { %v2159_v11 = vpop.f32.mrf.mxu0  ;;  %v1759_v8 = vadd.f32 %v1742_v4, %v1624_v14  ;;  %v1453_v4 = vadd.f32 %v3633_v45, %v1207_v51 }
 0x154   : > { %v2178_v18 = vadd.f32 %v2159_v11, %v2004_v60  ;;  %v1749_v21 = vpop.f32.mrf.mxu2  ;;  %v1993_v32 = vpop.f32.mrf.mxu3  ;;  %v1209_v60 = vadd.f32 %v3631_v33, %v3639_v55 }
 0x155   : > { %v2005_v23 = vadd.f32 %v1988_v61, %v1759_v8 }
 0x156   : > { %v2928_v63 = vpack.c.bf16 %v2178_v18, %v2177_v9  ;;  %v2201_v43 = vadd.f32 %v2178_v18, %v2177_v9  ;;  %v2216_v20 = vmul.f32 %v2178_v18, %v2178_v18  ;;  %v1455_v42 = vadd.f32 %v3641_v57, %v1209_v60 }
 0x158   : > { %2929 = vst [vmem:[%s3649_s8] sm:$0xff] %v2928_v63   ;;  %v2223_v19 = vadd.f32 %v2216_v20, %v2215_v15  ;;  %v1609_v28 = vpop.f32.mrf.mxu1 }
 0x159   : > { %v1625_v1 = vadd.f32 %v1609_v28, %v1451_v53 }
 0x15b   : > { %v2162_v7 = vpop.f32.mrf.mxu0  ;;  %v1760_v24 = vadd.f32 %v1744_v41, %v1625_v1 }
 0x15c   : > { %v2179_v16 = vadd.f32 %v2162_v7, %v2005_v23  ;;  %v1752_v34 = vpop.f32.mrf.mxu2  ;;  %v1995_v62 = vpop.f32.mrf.mxu3 }
 0x15d   : > { %v2006_v35 = vadd.f32 %v1990_v25, %v1760_v24 }
 0x15e   : > { %v2202_v54 = vadd.f32 %v2201_v43, %v2179_v16  ;;  %v2217_v31 = vmul.f32 %v2179_v16, %v2179_v16 }
 0x160   : > { %v2224_v27 = vadd.f32 %v2223_v19, %v2217_v31  ;;  %v1612_v38 = vpop.f32.mrf.mxu1 }
 0x161   : > { %v1626_v13 = vadd.f32 %v1612_v38, %v1452_v0  ;;  %v1208_v0 = vadd.f32 %v3627_v30, %v3635_v46 }
 0x163   : > { %v2164_v44 = vpop.f32.mrf.mxu0  ;;  %v1761_v26 = vadd.f32 %v1747_v36, %v1626_v13  ;;  %v1454_v56 = vadd.f32 %v3637_v50, %v1208_v0 }
 0x164   : > { %v2180_v40 = vadd.f32 %v2164_v44, %v2006_v35  ;;  %v1754_v22 = vpop.f32.mrf.mxu2  ;;  %v1998_v6 = vpop.f32.mrf.mxu3 }
 0x165   : > { %v2007_v52 = vadd.f32 %v1993_v32, %v1761_v26 }
 0x166   : > { %v2933_v12 = vpack.c.bf16 %v2180_v40, %v2179_v16  ;;  %v2203_v37 = vadd.f32 %v2202_v54, %v2180_v40  ;;  %v2218_v47 = vmul.f32 %v2180_v40, %v2180_v40 }
 0x168   : > { %2948 = vst [vmem:[%s3649_s8 + $0x8] sm:$0xff] %v2933_v12   ;;  %v2225_v49 = vadd.f32 %v2224_v27, %v2218_v47  ;;  %v1614_v3 = vpop.f32.mrf.mxu1 }
 0x169   : > { %v1627_v41 = vadd.f32 %v1614_v3, %v1453_v4 }
 0x16b   : > { %v2167_v58 = vpop.f32.mrf.mxu0  ;;  %v1762_v29 = vadd.f32 %v1749_v21, %v1627_v41 }
 0x16c   : > { %v2181_v17 = vadd.f32 %v2167_v58, %v2007_v52  ;;  %v2172_v46 = vpop.f32.mrf.mxu2  ;;  %v2000_v33 = vpop.f32.mrf.mxu3 }
 0x16d   : > { %v2008_v59 = vadd.f32 %v1995_v62, %v1762_v29 }
 0x16e   : > { %v2204_v48 = vadd.f32 %v2203_v37, %v2181_v17  ;;  %v2219_v39 = vmul.f32 %v2181_v17, %v2181_v17 }
 0x170   : > { %v2226_v5 = vadd.f32 %v2225_v49, %v2219_v39  ;;  %v1617_v61 = vpop.f32.mrf.mxu1 }
 0x171   : > { %v1628_v45 = vadd.f32 %v1617_v61, %v1454_v56 }
 0x173   : > { %v2169_v2 = vpop.f32.mrf.mxu0  ;;  %v1763_v9 = vadd.f32 %v1752_v34, %v1628_v45 }
 0x174   : > { %v2182_v36 = vadd.f32 %v2169_v2, %v2008_v59  ;;  %v2174_v19 = vpop.f32.mrf.mxu2 }
 0x175   : > { %v2009_v14 = vadd.f32 %v1998_v6, %v1763_v9 }
 0x176   : > { %v2938_v10 = vpack.c.bf16 %v2182_v36, %v2181_v17  ;;  %v2205_v11 = vadd.f32 %v2204_v48, %v2182_v36  ;;  %v2220_v30 = vmul.f32 %v2182_v36, %v2182_v36 }
 0x177   : > { %v2183_v50 = vadd.f32 %v2172_v46, %v2009_v14 }
 0x178   : > { %2949 = vst [vmem:[%s3649_s8 + $0x10] sm:$0xff] %v2938_v10   ;;  %v2227_v18 = vadd.f32 %v2226_v5, %v2220_v30  ;;  %v1619_v8 = vpop.f32.mrf.mxu1 }
 0x179   : > { %v2206_v15 = vadd.f32 %v2205_v11, %v2183_v50  ;;  %v2221_v63 = vmul.f32 %v2183_v50, %v2183_v50  ;;  %v1629_v43 = vadd.f32 %v1619_v8, %v1455_v42 }
 0x17b   : > { %v2228_v20 = vadd.f32 %v2227_v18, %v2221_v63  ;;  %v1764_v25 = vadd.f32 %v1754_v22, %v1629_v43 }
 0x17d   : > { %v2010_v55 = vadd.f32 %v2000_v33, %v1764_v25 }
 0x17f   : > { %v2184_v21 = vadd.f32 %v2174_v19, %v2010_v55 }
 0x181   : > { %v2943_v23 = vpack.c.bf16 %v2184_v21, %v2183_v50  ;;  %v2207_v53 = vadd.f32 %v2206_v15, %v2184_v21  ;;  %v2222_v28 = vmul.f32 %v2184_v21, %v2184_v21 }
 0x183   : > { %2950 = vst [vmem:[%s3649_s8 + $0x18] sm:$0xff] %v2943_v23   ;;  %v2208_v7 = vrot.slane %v2207_v53, 4  ;;  %v2229_v1 = vadd.f32 %v2228_v20, %v2222_v28 }
 0x185   : > { %v2209_v16 = vadd.f32 %v2208_v7, %v2207_v53  ;;  %v2230_v57 = vrot.slane %v2229_v1, 4 }
 0x187   : > { %v2210_v24 = vrot.slane %v2209_v16, 2  ;;  %v2231_v54 = vadd.f32 %v2230_v57, %v2229_v1 }
 0x189   : > { %v2211_v31 = vadd.f32 %v2210_v24, %v2209_v16  ;;  %v2232_v27 = vrot.slane %v2231_v54, 2 }
 0x18b   : > { %v2212_v32 = vrot.slane %v2211_v31, 1  ;;  %v2233_v35 = vadd.f32 %v2232_v27, %v2231_v54 }
 0x18d   : > { %v2213_v34 = vadd.f32 %v2212_v32, %v2211_v31  ;;  %v2234_v38 = vrot.slane %v2233_v35, 1 }
 0x18f   : > { %2214 = vst [vmem:[%s262_s11] sm:$0x1] %v2213_v34  ;;  %v2235_v44 = vadd.f32 %v2234_v38, %v2233_v35 }
 0x191   : > { %2236 = vst [vmem:[%s262_s11 + $0x1] sm:$0x1] %v2235_v44 }
 0x192 PF: > { %s17_s21 = sadd.s32 1, %s2984_s21  }
 0x193   : > { %p14_p4 = scmp.ge.s32.totalorder %s17_s21, 4  }
 0x195   :  { %16 = sbr.rel (!%p14_p4) target bundleno = 1 (0x1), region = 94 }

</bundles_post_ra>
